<compile_context>
chip_gen: v7x
topology: tpu7x:2x2x1
jax: 0.10.0
libtpu: 0.0.40
codegen_flags: <defaults>
</compile_context>

<pallas_src>
import functools
import math

import jax
import jax.numpy as jnp
from jax.experimental import pallas as pl
from jax.experimental.pallas import tpu as pltpu

# ---------------------------------------------------------------------------
# Model dimensions (value_as_supervision=True, action_distribution='beta',
# squash_outputs=True, dim_features_supervision=0)
# ---------------------------------------------------------------------------
PERCEPTION_OUT = 512
MEAS_HIDDEN = 128
JOIN_OUT = 512
HEAD_HIDDEN = 256
NUM_BRANCHES = 6
NUM_HEADS = 2 * NUM_BRANCHES        # heads 0..5 = mu, 6..11 = sigma
INPUT_STATES_LEN = 1 + 2 + 6        # 'speed' + 'vec' + 'cmd' = 9
CONV_CH = 128                       # stand-in conv width (lane-dense)
HEADS_PER_STEP = 4                  # branch-head group streamed per grid step
ROW_TILE = 128                      # perception im2col rows per grid step

assert NUM_HEADS % HEADS_PER_STEP == 0


# ---------------------------------------------------------------------------
# Small helpers
# ---------------------------------------------------------------------------
def _bf16(w):
    return w.astype(jnp.bfloat16)


def _relu(v):
    return jnp.maximum(v, 0.0)


def _mm(h, w, b=None):
    """2-D MXU matmul, f32 accumulation; lhs cast to the weight dtype."""
    y = jnp.dot(h.astype(w.dtype), w, preferred_element_type=jnp.float32)
    if b is not None:
        y = y + b
    return y


def _bmm(h, w):
    """(G,B,K) @ (G,K,N) -> (G,B,N) batched MXU matmul, f32 accumulation."""
    return jnp.einsum("gbk,gkn->gbn", h.astype(w.dtype), w,
                      preferred_element_type=jnp.float32)


def _full_spec(shape):
    n = len(shape)
    return pl.BlockSpec(tuple(shape), lambda *_, _n=n: (0,) * _n)


def _nbytes(a):
    return math.prod(a.shape) * jnp.dtype(a.dtype).itemsize


# ---------------------------------------------------------------------------
# Kernel 1: perception stand-in (fused conv3x3 matmul + ReLU + GAP + FC-512)
# ---------------------------------------------------------------------------
def _perception_kernel(cols_ref, wc_ref, bc_ref, wf_ref, bf_ref, o_ref,
                       pool_sc, *, inv_hw):
    r = pl.program_id(1)

    @pl.when(r == 0)
    def _():
        pool_sc[...] = jnp.zeros_like(pool_sc)

    # Single fused bf16 im2col matmul for this row tile: (ROW_TILE, KPAD)@(KPAD, CONV_CH)
    y = jnp.dot(cols_ref[0], wc_ref[...], preferred_element_type=jnp.float32)
    act = _relu(y + bc_ref[...])                              # (ROW_TILE, CONV_CH)
    pool_sc[...] += jnp.sum(act, axis=0, keepdims=True)       # pool partial

    @pl.when(r == pl.num_programs(1) - 1)
    def _():
        pooled = pool_sc[...] * inv_hw                        # (1, CONV_CH)
        o_ref[0] = _mm(pooled, wf_ref[...], bf_ref[...])      # (1, PERCEPTION_OUT)


def perception_forward(p, cols):
    B, HW, KP = cols.shape
    rt = ROW_TILE if HW % ROW_TILE == 0 else HW
    n_tiles = HW // rt

    out_shape = jax.ShapeDtypeStruct((B, 1, PERCEPTION_OUT), jnp.float32)
    flops = 2 * B * (HW * KP * CONV_CH + CONV_CH * PERCEPTION_OUT)
    bytes_acc = (_nbytes(cols) + _nbytes(p["w_conv"]) + _nbytes(p["b_conv"])
                 + _nbytes(p["w_fc"]) + _nbytes(p["b_fc"]) + _nbytes(out_shape))

    out = pl.pallas_call(
        functools.partial(_perception_kernel, inv_hw=1.0 / HW),
        out_shape=out_shape,
        grid=(B, n_tiles),
        in_specs=[
            pl.BlockSpec((1, rt, KP), lambda b, r: (b, r, 0)),
            _full_spec(p["w_conv"].shape),
            _full_spec(p["b_conv"].shape),
            _full_spec(p["w_fc"].shape),
            _full_spec(p["b_fc"].shape),
        ],
        out_specs=pl.BlockSpec((1, 1, PERCEPTION_OUT), lambda b, r: (b, 0, 0)),
        scratch_shapes=[pltpu.VMEM((1, CONV_CH), jnp.float32)],
        compiler_params=pltpu.CompilerParams(
            dimension_semantics=("parallel", "arbitrary")),
        cost_estimate=pl.CostEstimate(flops=flops, transcendentals=0,
                                      bytes_accessed=bytes_acc),
    )(cols, p["w_conv"], p["b_conv"], p["w_fc"], p["b_fc"])
    return out.reshape(B, PERCEPTION_OUT)


# ---------------------------------------------------------------------------
# Kernel 2: all FC heads; grid streams the 12 mu/sigma heads in groups
# ---------------------------------------------------------------------------
_HEADS_PARAM_ORDER = (
    "wm1", "bm1", "wm2", "bm2",
    "wjx", "wjm", "bj",
    "ws1", "bs1", "ws2", "bs2", "ws3", "bs3",
    "wv1", "bv1", "wv2", "bv2", "wv3", "bv3",
    "wb1", "bb1", "wb2", "bb2", "wb3", "bb3",
)


def _heads_kernel(x_ref, s_ref,
                  wm1, bm1, wm2, bm2,
                  wjx, wjm, bj,
                  ws1, bs1, ws2, bs2, ws3, bs3,
                  wv1, bv1, wv2, bv2, wv3, bv3,
                  wb1, bb1, wb2, bb2, wb3, bb3,
                  speed_ref, value_ref, branch_ref,
                  j_sc):
    g = pl.program_id(0)

    # Trunk (measurements, join, speed, value) runs once; joined features
    # persist in VMEM scratch for every subsequent head group.
    @pl.when(g == 0)
    def _trunk():
        x = x_ref[...]                                        # (B, 512)
        s = s_ref[...]                                        # (B, 9)

        m = _relu(_mm(s, wm1[...], bm1[...]))
        m = _relu(_mm(m, wm2[...], bm2[...]))

        # join: relu(cat([x, m]) @ Wj + b), concat-free with K split 512/128
        j = _relu(_mm(x, wjx[...]) + _mm(m, wjm[...]) + bj[...])
        j_sc[...] = j

        # speed branch (input: perception features), end layer Sigmoid
        hs = _relu(_mm(x, ws1[...], bs1[...]))
        hs = _relu(_mm(hs, ws2[...], bs2[...]))
        speed_ref[...] = jax.nn.sigmoid(_mm(hs, ws3[...], bs3[...]))

        # value branch (input: joined features), end layer None
        hv = _relu(_mm(j, wv1[...], bv1[...]))
        hv = _relu(_mm(hv, wv2[...], bv2[...]))
        value_ref[...] = _mm(hv, wv3[...], bv3[...])

    # Streamed group of mu/sigma heads, stacked batched einsums (no head loop).
    wg1 = wb1[...]                                            # (G, 512, 256) bf16
    G = wg1.shape[0]
    B = x_ref.shape[0]
    jb = jnp.broadcast_to(j_sc[...].astype(wg1.dtype)[None], (G, B, JOIN_OUT))
    h1 = _relu(_bmm(jb, wg1) + bb1[...])                      # (G, B, 256)
    h2 = _relu(_bmm(h1, wb2[...]) + bb2[...])                 # (G, B, 256)
    branch_ref[...] = jax.nn.softplus(_bmm(h2, wb3[...]) + bb3[...])   # (G, B, 2)


def heads_forward(p, x, state):
    B = x.shape[0]
    G = HEADS_PER_STEP
    n_steps = NUM_HEADS // G
    args = [x, state] + [p[k] for k in _HEADS_PARAM_ORDER]

    per_group_specs = {
        "wb1": pl.BlockSpec((G, JOIN_OUT, HEAD_HIDDEN), lambda g: (g, 0, 0)),
        "bb1": pl.BlockSpec((G, 1, HEAD_HIDDEN), lambda g: (g, 0, 0)),
        "wb2": pl.BlockSpec((G, HEAD_HIDDEN, HEAD_HIDDEN), lambda g: (g, 0, 0)),
        "bb2": pl.BlockSpec((G, 1, HEAD_HIDDEN), lambda g: (g, 0, 0)),
        "wb3": pl.BlockSpec((G, HEAD_HIDDEN, 2), lambda g: (g, 0, 0)),
        "bb3": pl.BlockSpec((G, 1, 2), lambda g: (g, 0, 0)),
    }
    in_specs = [_full_spec(x.shape), _full_spec(state.shape)]
    for k in _HEADS_PARAM_ORDER:
        in_specs.append(per_group_specs[k] if k in per_group_specs
                        else _full_spec(p[k].shape))

    out_shape = (
        jax.ShapeDtypeStruct((B, 1), jnp.float32),             # pred_speed
        jax.ShapeDtypeStruct((B, 1), jnp.float32),             # pred_value
        jax.ShapeDtypeStruct((NUM_HEADS, B, 2), jnp.float32),  # mu/sigma heads
    )
    out_specs = (
        pl.BlockSpec((B, 1), lambda g: (0, 0)),
        pl.BlockSpec((B, 1), lambda g: (0, 0)),
        pl.BlockSpec((G, B, 2), lambda g: (g, 0, 0)),
    )

    flops = 2 * B * (
        INPUT_STATES_LEN * MEAS_HIDDEN + MEAS_HIDDEN * MEAS_HIDDEN
        + PERCEPTION_OUT * JOIN_OUT + MEAS_HIDDEN * JOIN_OUT
        + PERCEPTION_OUT * HEAD_HIDDEN + HEAD_HIDDEN * HEAD_HIDDEN + HEAD_HIDDEN
        + JOIN_OUT * HEAD_HIDDEN + HEAD_HIDDEN * HEAD_HIDDEN + HEAD_HIDDEN
        + NUM_HEADS * (JOIN_OUT * HEAD_HIDDEN + HEAD_HIDDEN * HEAD_HIDDEN
                       + HEAD_HIDDEN * 2))
    bytes_acc = (sum(_nbytes(a) for a in args)
                 + sum(_nbytes(o) for o in out_shape))

    return pl.pallas_call(
        _heads_kernel,
        out_shape=out_shape,
        grid=(n_steps,),
        in_specs=in_specs,
        out_specs=out_specs,
        scratch_shapes=[pltpu.VMEM((B, JOIN_OUT), jnp.float32)],
        compiler_params=pltpu.CompilerParams(dimension_semantics=("arbitrary",)),
        cost_estimate=pl.CostEstimate(flops=flops,
                                      transcendentals=B * (1 + 2 * NUM_HEADS),
                                      bytes_accessed=bytes_acc),
    )(*args)


# ---------------------------------------------------------------------------
# Parameter init (xavier_uniform weights, bias = 0.1, matches nn.Linear shapes)
# ---------------------------------------------------------------------------
def xavier_uniform(key, fan_in, fan_out, shape=None):
    bound = (6.0 / (fan_in + fan_out)) ** 0.5
    if shape is None:
        shape = (fan_in, fan_out)
    return jax.random.uniform(key, shape, jnp.float32, -bound, bound)


def init_perception(key, in_ch):
    k1, k2 = jax.random.split(key)
    k_raw = 9 * in_ch
    kpad = max(32, ((k_raw + 7) // 8) * 8)                    # pad im2col K
    w = xavier_uniform(k1, k_raw, CONV_CH)
    w = jnp.pad(w, ((0, kpad - k_raw), (0, 0)))
    return {
        "w_conv": _bf16(w),                                    # (KPAD, CONV_CH)
        "b_conv": jnp.full((1, CONV_CH), 0.1, jnp.float32),
        "w_fc": _bf16(xavier_uniform(k2, CONV_CH, PERCEPTION_OUT)),
        "b_fc": jnp.full((1, PERCEPTION_OUT), 0.1, jnp.float32),
    }


def init_heads(key):
    ks = jax.random.split(key, 12)
    p = {}
    # measurements FC: [9, 128, 128], end ReLU
    p["wm1"] = _bf16(xavier_uniform(ks[0], INPUT_STATES_LEN, MEAS_HIDDEN))
    p["bm1"] = jnp.full((1, MEAS_HIDDEN), 0.1, jnp.float32)
    p["wm2"] = _bf16(xavier_uniform(ks[1], MEAS_HIDDEN, MEAS_HIDDEN))
    p["bm2"] = jnp.full((1, MEAS_HIDDEN), 0.1, jnp.float32)
    # join FC: [640, 512] end ReLU, weight split at row 512 (x part / m part)
    wj = xavier_uniform(ks[2], PERCEPTION_OUT + MEAS_HIDDEN, JOIN_OUT)
    p["wjx"] = _bf16(wj[:PERCEPTION_OUT])
    p["wjm"] = _bf16(wj[PERCEPTION_OUT:])
    p["bj"] = jnp.full((1, JOIN_OUT), 0.1, jnp.float32)
    # speed branch FC: [512, 256, 256, 1], end Sigmoid
    p["ws1"] = _bf16(xavier_uniform(ks[3], PERCEPTION_OUT, HEAD_HIDDEN))
    p["bs1"] = jnp.full((1, HEAD_HIDDEN), 0.1, jnp.float32)
    p["ws2"] = _bf16(xavier_uniform(ks[4], HEAD_HIDDEN, HEAD_HIDDEN))
    p["bs2"] = jnp.full((1, HEAD_HIDDEN), 0.1, jnp.float32)
    p["ws3"] = _bf16(xavier_uniform(ks[5], HEAD_HIDDEN, 1))
    p["bs3"] = jnp.full((1, 1), 0.1, jnp.float32)
    # value branch FC: [512, 256, 256, 1], end None
    p["wv1"] = _bf16(xavier_uniform(ks[6], JOIN_OUT, HEAD_HIDDEN))
    p["bv1"] = jnp.full((1, HEAD_HIDDEN), 0.1, jnp.float32)
    p["wv2"] = _bf16(xavier_uniform(ks[7], HEAD_HIDDEN, HEAD_HIDDEN))
    p["bv2"] = jnp.full((1, HEAD_HIDDEN), 0.1, jnp.float32)
    p["wv3"] = _bf16(xavier_uniform(ks[8], HEAD_HIDDEN, 1))
    p["bv3"] = jnp.full((1, 1), 0.1, jnp.float32)
    # 12 mu/sigma branch FCs [512, 256, 256, 2], end Softplus, stacked per head
    p["wb1"] = _bf16(xavier_uniform(
        ks[9], JOIN_OUT, HEAD_HIDDEN, shape=(NUM_HEADS, JOIN_OUT, HEAD_HIDDEN)))
    p["bb1"] = jnp.full((NUM_HEADS, 1, HEAD_HIDDEN), 0.1, jnp.float32)
    p["wb2"] = _bf16(xavier_uniform(
        ks[10], HEAD_HIDDEN, HEAD_HIDDEN, shape=(NUM_HEADS, HEAD_HIDDEN, HEAD_HIDDEN)))
    p["bb2"] = jnp.full((NUM_HEADS, 1, HEAD_HIDDEN), 0.1, jnp.float32)
    p["wb3"] = _bf16(xavier_uniform(
        ks[11], HEAD_HIDDEN, 2, shape=(NUM_HEADS, HEAD_HIDDEN, 2)))
    p["bb3"] = jnp.full((NUM_HEADS, 1, 2), 0.1, jnp.float32)
    return p


def init_coilicra(key, in_ch):
    k1, k2 = jax.random.split(key)
    return {"perception": init_perception(k1, in_ch), "heads": init_heads(k2)}


# ---------------------------------------------------------------------------
# Forward pass
# ---------------------------------------------------------------------------
def coilicra_forward(params, im, state):
    """
    im:    (B, C, T, H, W) uint8
    state: (B, INPUT_STATES_LEN) float32
    """
    B, C, T, H, W = im.shape
    cin = C * T

    # uint8 decode + 3x3 SAME halo + lane-dense im2col packing (layout only;
    # the conv matmul itself runs inside the Pallas kernel, in bf16).
    img = im.reshape(B, cin, H, W).astype(jnp.float32) * (1.0 / 255.0)
    img = jnp.transpose(img, (0, 2, 3, 1))                    # NHWC
    img = jnp.pad(img, ((0, 0), (1, 1), (1, 1), (0, 0)))
    taps = [img[:, di:di + H, dj:dj + W, :] for di in range(3) for dj in range(3)]
    cols = jnp.concatenate(taps, axis=-1).reshape(B, H * W, 9 * cin)
    kpad = params["perception"]["w_conv"].shape[0]
    cols = jnp.pad(cols, ((0, 0), (0, 0), (0, kpad - 9 * cin)))
    cols = cols.astype(jnp.bfloat16)                          # (B, H*W, KPAD)

    x = perception_forward(params["perception"], cols)        # (B, 512)
    speed, value, heads = heads_forward(params["heads"], x, state)

    return {
        "pred_speed": speed,                                                 # (B, 1)
        "pred_value": value,                                                 # (B, 1)
        "mu_branches": [heads[g] for g in range(NUM_BRANCHES)],              # 6 x (B, 2)
        "sigma_branches": [heads[NUM_BRANCHES + g] for g in range(NUM_BRANCHES)],
    }


# ---------------------------------------------------------------------------
if __name__ == "__main__":
    key = jax.random.PRNGKey(0)
    k_params, k_im, k_state = jax.random.split(key, 3)

    B, C, T, H, W = 2, 3, 1, 16, 16
    im = jax.random.randint(k_im, (B, C, T, H, W), 0, 256, dtype=jnp.int32).astype(jnp.uint8)
    state = jax.random.normal(k_state, (B, INPUT_STATES_LEN), jnp.float32)

    params = init_coilicra(k_params, C * T)
    fwd = jax.jit(coilicra_forward)
    outputs = jax.block_until_ready(fwd(params, im, state))

    assert outputs["pred_speed"].shape == (B, 1)
    assert outputs["pred_value"].shape == (B, 1)
    assert len(outputs["mu_branches"]) == NUM_BRANCHES
    assert len(outputs["sigma_branches"]) == NUM_BRANCHES
    assert all(o.shape == (B, 2) for o in outputs["mu_branches"])
    assert all(o.shape == (B, 2) for o in outputs["sigma_branches"])
    assert bool(jnp.all(jnp.isfinite(outputs["pred_speed"])))
    assert bool(jnp.all(jnp.isfinite(outputs["pred_value"])))

    print("KERNEL_OK")
</pallas_src>

<mosaic_0001>
module attributes {stable_mosaic.version = 11 : i64} {
  func.func @_perception_kernel(%arg0: i32, %arg1: i32, %arg2: memref<1x128x32xbf16, #tpu.memory_space<vmem>>, %arg3: memref<32x128xbf16, #tpu.memory_space<vmem>>, %arg4: memref<1x128xf32, #tpu.memory_space<vmem>>, %arg5: memref<128x512xbf16, #tpu.memory_space<vmem>>, %arg6: memref<1x512xf32, #tpu.memory_space<vmem>>, %arg7: memref<1x1x512xf32, #tpu.memory_space<vmem>>, %arg8: memref<1x128xf32, #tpu.memory_space<vmem>>) attributes {dimension_semantics = [#tpu.dimension_semantics<parallel>, #tpu.dimension_semantics<arbitrary>], iteration_bounds = array<i64: 2, 2>, scalar_prefetch = 0 : i64, scratch_operands = 1 : i64, tpu.core_type = #tpu.core_type<tc>, window_params = [{transform_indices = @transform_0, window_bounds = array<i64: 1, 128, 32>}, {pipeline_mode = #tpu.pipeline_mode<synchronous>, transform_indices = @transform_1, window_bounds = array<i64: 32, 128>}, {pipeline_mode = #tpu.pipeline_mode<synchronous>, transform_indices = @transform_2, window_bounds = array<i64: 1, 128>}, {pipeline_mode = #tpu.pipeline_mode<synchronous>, transform_indices = @transform_3, window_bounds = array<i64: 128, 512>}, {pipeline_mode = #tpu.pipeline_mode<synchronous>, transform_indices = @transform_4, window_bounds = array<i64: 1, 512>}, {transform_indices = @transform_5, window_bounds = array<i64: 1, 1, 512>}]} {
    %c0_i32 = arith.constant 0 : i32
    %0 = arith.cmpi eq, %arg1, %c0_i32 : i32
    %1 = arith.extui %0 : i1 to i32
    %c0_i32_0 = arith.constant 0 : i32
    %2 = arith.cmpi ne, %1, %c0_i32_0 : i32
    scf.if %2 {
      %cst_14 = arith.constant 0.000000e+00 : f32
      %20 = vector.broadcast %cst_14 : f32 to vector<1x128xf32>
      %c0_15 = arith.constant 0 : index
      %c0_16 = arith.constant 0 : index
      %21 = vector.load %arg8[%c0_15, %c0_16] : memref<1x128xf32, #tpu.memory_space<vmem>>, vector<1x128xf32>
      tpu.vector_store %arg8[%c0_15, %c0_16], %20 {strides = array<i32>} : memref<1x128xf32, #tpu.memory_space<vmem>>, vector<1x128xf32>,
    } else {
    }
    %c0 = arith.constant 0 : index
    %c0_1 = arith.constant 0 : index
    %c0_2 = arith.constant 0 : index
    %3 = vector.load %arg2[%c0, %c0_1, %c0_2] : memref<1x128x32xbf16, #tpu.memory_space<vmem>>, vector<1x128x32xbf16>
    %4 = vector.shape_cast %3 : vector<1x128x32xbf16> to vector<128x32xbf16>
    %c0_3 = arith.constant 0 : index
    %c0_4 = arith.constant 0 : index
    %5 = vector.load %arg3[%c0_3, %c0_4] : memref<32x128xbf16, #tpu.memory_space<vmem>>, vector<32x128xbf16>
    %cst = arith.constant dense<0.000000e+00> : vector<128x128xf32>
    %6 = tpu.matmul %4, %5, %cst {dimension_numbers = #tpu.dot_dimension_numbers<[1], [0], [0], [1], [0, 0, 1, 1], [], []>} : vector<128x32xbf16>, vector<32x128xbf16>, vector<128x128xf32> -> vector<128x128xf32>
    %c0_5 = arith.constant 0 : index
    %c0_6 = arith.constant 0 : index
    %7 = vector.load %arg4[%c0_5, %c0_6] : memref<1x128xf32, #tpu.memory_space<vmem>>, vector<1x128xf32>
    %8 = vector.broadcast %7 : vector<1x128xf32> to vector<128x128xf32>
    %9 = arith.addf %6, %8 : vector<128x128xf32>
    %cst_7 = arith.constant 0.000000e+00 : f32
    %10 = vector.broadcast %cst_7 : f32 to vector<128x128xf32>
    %11 = arith.maximumf %9, %10 : vector<128x128xf32>
    %c0_8 = arith.constant 0 : index
    %c0_9 = arith.constant 0 : index
    %12 = vector.load %arg8[%c0_8, %c0_9] : memref<1x128xf32, #tpu.memory_space<vmem>>, vector<1x128xf32>
    %cst_10 = arith.constant dense<0.000000e+00> : vector<128xf32>
    %13 = vector.multi_reduction <add>, %11, %cst_10 [0] : vector<128x128xf32> to vector<128xf32>
    %14 = vector.shape_cast %13 : vector<128xf32> to vector<1x128xf32>
    %15 = arith.addf %12, %14 : vector<1x128xf32>
    %c0_11 = arith.constant 0 : index
    %c0_12 = arith.constant 0 : index
    %16 = vector.load %arg8[%c0_11, %c0_12] : memref<1x128xf32, #tpu.memory_space<vmem>>, vector<1x128xf32>
    tpu.vector_store %arg8[%c0_11, %c0_12], %15 {strides = array<i32>} : memref<1x128xf32, #tpu.memory_space<vmem>>, vector<1x128xf32>,
    %c1_i32 = arith.constant 1 : i32
    %17 = arith.cmpi eq, %arg1, %c1_i32 : i32
    %18 = arith.extui %17 : i1 to i32
    %c0_i32_13 = arith.constant 0 : i32
    %19 = arith.cmpi ne, %18, %c0_i32_13 : i32
    scf.if %19 {
      %c0_14 = arith.constant 0 : index
      %c0_15 = arith.constant 0 : index
      %20 = vector.load %arg8[%c0_14, %c0_15] : memref<1x128xf32, #tpu.memory_space<vmem>>, vector<1x128xf32>
      %cst_16 = arith.constant 3.906250e-03 : f32
      %21 = vector.broadcast %cst_16 : f32 to vector<1x128xf32>
      %22 = arith.mulf %20, %21 : vector<1x128xf32>
      %c0_17 = arith.constant 0 : index
      %c0_18 = arith.constant 0 : index
      %23 = vector.load %arg5[%c0_17, %c0_18] : memref<128x512xbf16, #tpu.memory_space<vmem>>, vector<128x512xbf16>
      %c0_19 = arith.constant 0 : index
      %c0_20 = arith.constant 0 : index
      %24 = vector.load %arg6[%c0_19, %c0_20] : memref<1x512xf32, #tpu.memory_space<vmem>>, vector<1x512xf32>
      %25 = arith.truncf %22 : vector<1x128xf32> to vector<1x128xbf16>
      %cst_21 = arith.constant dense<0.000000e+00> : vector<1x512xf32>
      %26 = tpu.matmul %25, %23, %cst_21 {dimension_numbers = #tpu.dot_dimension_numbers<[1], [0], [0], [1], [0, 0, 1, 1], [], []>} : vector<1x128xbf16>, vector<128x512xbf16>, vector<1x512xf32> -> vector<1x512xf32>
      %27 = arith.addf %26, %24 : vector<1x512xf32>
      %c0_22 = arith.constant 0 : index
      %c0_23 = arith.constant 0 : index
      %c0_24 = arith.constant 0 : index
      %28 = vector.load %arg7[%c0_22, %c0_23, %c0_24] : memref<1x1x512xf32, #tpu.memory_space<vmem>>, vector<1x1x512xf32>
      %29 = vector.shape_cast %28 : vector<1x1x512xf32> to vector<1x512xf32>
      %30 = vector.shape_cast %27 : vector<1x512xf32> to vector<1x1x512xf32>
      tpu.vector_store %arg7[%c0_22, %c0_23, %c0_24], %30 {strides = array<i32>} : memref<1x1x512xf32, #tpu.memory_space<vmem>>, vector<1x1x512xf32>,
    } else {
    }
    return
  }
  func.func @transform_0(%arg0: i32, %arg1: i32) -> (i32, i32, i32) {
    %c0_i32 = arith.constant 0 : i32
    %c0_i32_0 = arith.constant 0 : i32
    return %arg0, %arg1, %c0_i32 : i32, i32, i32
  }
  func.func @transform_1(%arg0: i32, %arg1: i32) -> (i32, i32) {
    %c0_i32 = arith.constant 0 : i32
    %c0_i32_0 = arith.constant 0 : i32
    %c0_i32_1 = arith.constant 0 : i32
    return %c0_i32, %c0_i32_0 : i32, i32
  }
  func.func @transform_2(%arg0: i32, %arg1: i32) -> (i32, i32) {
    %c0_i32 = arith.constant 0 : i32
    %c0_i32_0 = arith.constant 0 : i32
    %c0_i32_1 = arith.constant 0 : i32
    return %c0_i32, %c0_i32_0 : i32, i32
  }
  func.func @transform_3(%arg0: i32, %arg1: i32) -> (i32, i32) {
    %c0_i32 = arith.constant 0 : i32
    %c0_i32_0 = arith.constant 0 : i32
    %c0_i32_1 = arith.constant 0 : i32
    return %c0_i32, %c0_i32_0 : i32, i32
  }
  func.func @transform_4(%arg0: i32, %arg1: i32) -> (i32, i32) {
    %c0_i32 = arith.constant 0 : i32
    %c0_i32_0 = arith.constant 0 : i32
    %c0_i32_1 = arith.constant 0 : i32
    return %c0_i32, %c0_i32_0 : i32, i32
  }
  func.func @transform_5(%arg0: i32, %arg1: i32) -> (i32, i32, i32) {
    %c0_i32 = arith.constant 0 : i32
    %c0_i32_0 = arith.constant 0 : i32
    %c0_i32_1 = arith.constant 0 : i32
    return %arg0, %c0_i32, %c0_i32_0 : i32, i32, i32
  }
}

module attributes {stable_mosaic.version = 11 : i64} {
  func.func @_heads_kernel(%arg0: i32, %arg1: memref<2x512xf32, #tpu.memory_space<vmem>>, %arg2: memref<2x9xf32, #tpu.memory_space<vmem>>, %arg3: memref<9x128xbf16, #tpu.memory_space<vmem>>, %arg4: memref<1x128xf32, #tpu.memory_space<vmem>>, %arg5: memref<128x128xbf16, #tpu.memory_space<vmem>>, %arg6: memref<1x128xf32, #tpu.memory_space<vmem>>, %arg7: memref<512x512xbf16, #tpu.memory_space<vmem>>, %arg8: memref<128x512xbf16, #tpu.memory_space<vmem>>, %arg9: memref<1x512xf32, #tpu.memory_space<vmem>>, %arg10: memref<512x256xbf16, #tpu.memory_space<vmem>>, %arg11: memref<1x256xf32, #tpu.memory_space<vmem>>, %arg12: memref<256x256xbf16, #tpu.memory_space<vmem>>, %arg13: memref<1x256xf32, #tpu.memory_space<vmem>>, %arg14: memref<256x1xbf16, #tpu.memory_space<vmem>>, %arg15: memref<1x1xf32, #tpu.memory_space<vmem>>, %arg16: memref<512x256xbf16, #tpu.memory_space<vmem>>, %arg17: memref<1x256xf32, #tpu.memory_space<vmem>>, %arg18: memref<256x256xbf16, #tpu.memory_space<vmem>>, %arg19: memref<1x256xf32, #tpu.memory_space<vmem>>, %arg20: memref<256x1xbf16, #tpu.memory_space<vmem>>, %arg21: memref<1x1xf32, #tpu.memory_space<vmem>>, %arg22: memref<4x512x256xbf16, #tpu.memory_space<vmem>>, %arg23: memref<4x1x256xf32, #tpu.memory_space<vmem>>, %arg24: memref<4x256x256xbf16, #tpu.memory_space<vmem>>, %arg25: memref<4x1x256xf32, #tpu.memory_space<vmem>>, %arg26: memref<4x256x2xbf16, #tpu.memory_space<vmem>>, %arg27: memref<4x1x2xf32, #tpu.memory_space<vmem>>, %arg28: memref<2x1xf32, #tpu.memory_space<vmem>>, %arg29: memref<2x1xf32, #tpu.memory_space<vmem>>, %arg30: memref<4x2x2xf32, #tpu.memory_space<vmem>>, %arg31: memref<2x512xf32, #tpu.memory_space<vmem>>) attributes {dimension_semantics = [#tpu.dimension_semantics<arbitrary>], iteration_bounds = array<i64: 3>, scalar_prefetch = 0 : i64, scratch_operands = 1 : i64, tpu.core_type = #tpu.core_type<tc>, window_params = [{pipeline_mode = #tpu.pipeline_mode<synchronous>, transform_indices = @transform_0, window_bounds = array<i64: 2, 512>}, {pipeline_mode = #tpu.pipeline_mode<synchronous>, transform_indices = @transform_1, window_bounds = array<i64: 2, 9>}, {pipeline_mode = #tpu.pipeline_mode<synchronous>, transform_indices = @transform_2, window_bounds = array<i64: 9, 128>}, {pipeline_mode = #tpu.pipeline_mode<synchronous>, transform_indices = @transform_3, window_bounds = array<i64: 1, 128>}, {pipeline_mode = #tpu.pipeline_mode<synchronous>, transform_indices = @transform_4, window_bounds = array<i64: 128, 128>}, {pipeline_mode = #tpu.pipeline_mode<synchronous>, transform_indices = @transform_5, window_bounds = array<i64: 1, 128>}, {pipeline_mode = #tpu.pipeline_mode<synchronous>, transform_indices = @transform_6, window_bounds = array<i64: 512, 512>}, {pipeline_mode = #tpu.pipeline_mode<synchronous>, transform_indices = @transform_7, window_bounds = array<i64: 128, 512>}, {pipeline_mode = #tpu.pipeline_mode<synchronous>, transform_indices = @transform_8, window_bounds = array<i64: 1, 512>}, {pipeline_mode = #tpu.pipeline_mode<synchronous>, transform_indices = @transform_9, window_bounds = array<i64: 512, 256>}, {pipeline_mode = #tpu.pipeline_mode<synchronous>, transform_indices = @transform_10, window_bounds = array<i64: 1, 256>}, {pipeline_mode = #tpu.pipeline_mode<synchronous>, transform_indices = @transform_11, window_bounds = array<i64: 256, 256>}, {pipeline_mode = #tpu.pipeline_mode<synchronous>, transform_indices = @transform_12, window_bounds = array<i64: 1, 256>}, {pipeline_mode = #tpu.pipeline_mode<synchronous>, transform_indices = @transform_13, window_bounds = array<i64: 256, 1>}, {pipeline_mode = #tpu.pipeline_mode<synchronous>, transform_indices = @transform_14, window_bounds = array<i64: 1, 1>}, {pipeline_mode = #tpu.pipeline_mode<synchronous>, transform_indices = @transform_15, window_bounds = array<i64: 512, 256>}, {pipeline_mode = #tpu.pipeline_mode<synchronous>, transform_indices = @transform_16, window_bounds = array<i64: 1, 256>}, {pipeline_mode = #tpu.pipeline_mode<synchronous>, transform_indices = @transform_17, window_bounds = array<i64: 256, 256>}, {pipeline_mode = #tpu.pipeline_mode<synchronous>, transform_indices = @transform_18, window_bounds = array<i64: 1, 256>}, {pipeline_mode = #tpu.pipeline_mode<synchronous>, transform_indices = @transform_19, window_bounds = array<i64: 256, 1>}, {pipeline_mode = #tpu.pipeline_mode<synchronous>, transform_indices = @transform_20, window_bounds = array<i64: 1, 1>}, {transform_indices = @transform_21, window_bounds = array<i64: 4, 512, 256>}, {transform_indices = @transform_22, window_bounds = array<i64: 4, 1, 256>}, {transform_indices = @transform_23, window_bounds = array<i64: 4, 256, 256>}, {transform_indices = @transform_24, window_bounds = array<i64: 4, 1, 256>}, {transform_indices = @transform_25, window_bounds = array<i64: 4, 256, 2>}, {transform_indices = @transform_26, window_bounds = array<i64: 4, 1, 2>}, {pipeline_mode = #tpu.pipeline_mode<synchronous>, transform_indices = @transform_27, window_bounds = array<i64: 2, 1>}, {pipeline_mode = #tpu.pipeline_mode<synchronous>, transform_indices = @transform_28, window_bounds = array<i64: 2, 1>}, {transform_indices = @transform_29, window_bounds = array<i64: 4, 2, 2>}]} {
    %c0_i32 = arith.constant 0 : i32
    %0 = arith.cmpi eq, %arg0, %c0_i32 : i32
    %1 = arith.extui %0 : i1 to i32
    %c0_i32_0 = arith.constant 0 : i32
    %2 = arith.cmpi ne, %1, %c0_i32_0 : i32
    scf.if %2 {
      %c0_29 = arith.constant 0 : index
      %c0_30 = arith.constant 0 : index
      %44 = vector.load %arg1[%c0_29, %c0_30] : memref<2x512xf32, #tpu.memory_space<vmem>>, vector<2x512xf32>
      %c0_31 = arith.constant 0 : index
      %c0_32 = arith.constant 0 : index
      %45 = vector.load %arg2[%c0_31, %c0_32] : memref<2x9xf32, #tpu.memory_space<vmem>>, vector<2x9xf32>
      %c0_33 = arith.constant 0 : index
      %c0_34 = arith.constant 0 : index
      %46 = vector.load %arg3[%c0_33, %c0_34] : memref<9x128xbf16, #tpu.memory_space<vmem>>, vector<9x128xbf16>
      %c0_35 = arith.constant 0 : index
      %c0_36 = arith.constant 0 : index
      %47 = vector.load %arg4[%c0_35, %c0_36] : memref<1x128xf32, #tpu.memory_space<vmem>>, vector<1x128xf32>
      %48 = arith.truncf %45 : vector<2x9xf32> to vector<2x9xbf16>
      %cst_37 = arith.constant dense<0.000000e+00> : vector<2x128xf32>
      %49 = tpu.matmul %48, %46, %cst_37 {dimension_numbers = #tpu.dot_dimension_numbers<[1], [0], [0], [1], [0, 0, 1, 1], [], []>} : vector<2x9xbf16>, vector<9x128xbf16>, vector<2x128xf32> -> vector<2x128xf32>
      %50 = vector.broadcast %47 : vector<1x128xf32> to vector<2x128xf32>
      %51 = arith.addf %49, %50 : vector<2x128xf32>
      %cst_38 = arith.constant 0.000000e+00 : f32
      %52 = vector.broadcast %cst_38 : f32 to vector<2x128xf32>
      %53 = arith.maximumf %51, %52 : vector<2x128xf32>
      %c0_39 = arith.constant 0 : index
      %c0_40 = arith.constant 0 : index
      %54 = vector.load %arg5[%c0_39, %c0_40] : memref<128x128xbf16, #tpu.memory_space<vmem>>, vector<128x128xbf16>
      %c0_41 = arith.constant 0 : index
      %c0_42 = arith.constant 0 : index
      %55 = vector.load %arg6[%c0_41, %c0_42] : memref<1x128xf32, #tpu.memory_space<vmem>>, vector<1x128xf32>
      %56 = arith.truncf %53 : vector<2x128xf32> to vector<2x128xbf16>
      %cst_43 = arith.constant dense<0.000000e+00> : vector<2x128xf32>
      %57 = tpu.matmul %56, %54, %cst_43 {dimension_numbers = #tpu.dot_dimension_numbers<[1], [0], [0], [1], [0, 0, 1, 1], [], []>} : vector<2x128xbf16>, vector<128x128xbf16>, vector<2x128xf32> -> vector<2x128xf32>
      %58 = vector.broadcast %55 : vector<1x128xf32> to vector<2x128xf32>
      %59 = arith.addf %57, %58 : vector<2x128xf32>
      %cst_44 = arith.constant 0.000000e+00 : f32
      %60 = vector.broadcast %cst_44 : f32 to vector<2x128xf32>
      %61 = arith.maximumf %59, %60 : vector<2x128xf32>
      %c0_45 = arith.constant 0 : index
      %c0_46 = arith.constant 0 : index
      %62 = vector.load %arg7[%c0_45, %c0_46] : memref<512x512xbf16, #tpu.memory_space<vmem>>, vector<512x512xbf16>
      %63 = arith.truncf %44 : vector<2x512xf32> to vector<2x512xbf16>
      %cst_47 = arith.constant dense<0.000000e+00> : vector<2x512xf32>
      %64 = tpu.matmul %63, %62, %cst_47 {dimension_numbers = #tpu.dot_dimension_numbers<[1], [0], [0], [1], [0, 0, 1, 1], [], []>} : vector<2x512xbf16>, vector<512x512xbf16>, vector<2x512xf32> -> vector<2x512xf32>
      %c0_48 = arith.constant 0 : index
      %c0_49 = arith.constant 0 : index
      %65 = vector.load %arg8[%c0_48, %c0_49] : memref<128x512xbf16, #tpu.memory_space<vmem>>, vector<128x512xbf16>
      %66 = arith.truncf %61 : vector<2x128xf32> to vector<2x128xbf16>
      %cst_50 = arith.constant dense<0.000000e+00> : vector<2x512xf32>
      %67 = tpu.matmul %66, %65, %cst_50 {dimension_numbers = #tpu.dot_dimension_numbers<[1], [0], [0], [1], [0, 0, 1, 1], [], []>} : vector<2x128xbf16>, vector<128x512xbf16>, vector<2x512xf32> -> vector<2x512xf32>
      %68 = arith.addf %64, %67 : vector<2x512xf32>
      %c0_51 = arith.constant 0 : index
      %c0_52 = arith.constant 0 : index
      %69 = vector.load %arg9[%c0_51, %c0_52] : memref<1x512xf32, #tpu.memory_space<vmem>>, vector<1x512xf32>
      %70 = vector.broadcast %69 : vector<1x512xf32> to vector<2x512xf32>
      %71 = arith.addf %68, %70 : vector<2x512xf32>
      %cst_53 = arith.constant 0.000000e+00 : f32
      %72 = vector.broadcast %cst_53 : f32 to vector<2x512xf32>
      %73 = arith.maximumf %71, %72 : vector<2x512xf32>
      %c0_54 = arith.constant 0 : index
      %c0_55 = arith.constant 0 : index
      %74 = vector.load %arg31[%c0_54, %c0_55] : memref<2x512xf32, #tpu.memory_space<vmem>>, vector<2x512xf32>
      tpu.vector_store %arg31[%c0_54, %c0_55], %73 {strides = array<i32>} : memref<2x512xf32, #tpu.memory_space<vmem>>, vector<2x512xf32>,
      %c0_56 = arith.constant 0 : index
      %c0_57 = arith.constant 0 : index
      %75 = vector.load %arg10[%c0_56, %c0_57] : memref<512x256xbf16, #tpu.memory_space<vmem>>, vector<512x256xbf16>
      %c0_58 = arith.constant 0 : index
      %c0_59 = arith.constant 0 : index
      %76 = vector.load %arg11[%c0_58, %c0_59] : memref<1x256xf32, #tpu.memory_space<vmem>>, vector<1x256xf32>
      %77 = arith.truncf %44 : vector<2x512xf32> to vector<2x512xbf16>
      %cst_60 = arith.constant dense<0.000000e+00> : vector<2x256xf32>
      %78 = tpu.matmul %77, %75, %cst_60 {dimension_numbers = #tpu.dot_dimension_numbers<[1], [0], [0], [1], [0, 0, 1, 1], [], []>} : vector<2x512xbf16>, vector<512x256xbf16>, vector<2x256xf32> -> vector<2x256xf32>
      %79 = vector.broadcast %76 : vector<1x256xf32> to vector<2x256xf32>
      %80 = arith.addf %78, %79 : vector<2x256xf32>
      %cst_61 = arith.constant 0.000000e+00 : f32
      %81 = vector.broadcast %cst_61 : f32 to vector<2x256xf32>
      %82 = arith.maximumf %80, %81 : vector<2x256xf32>
      %c0_62 = arith.constant 0 : index
      %c0_63 = arith.constant 0 : index
      %83 = vector.load %arg12[%c0_62, %c0_63] : memref<256x256xbf16, #tpu.memory_space<vmem>>, vector<256x256xbf16>
      %c0_64 = arith.constant 0 : index
      %c0_65 = arith.constant 0 : index
      %84 = vector.load %arg13[%c0_64, %c0_65] : memref<1x256xf32, #tpu.memory_space<vmem>>, vector<1x256xf32>
      %85 = arith.truncf %82 : vector<2x256xf32> to vector<2x256xbf16>
      %cst_66 = arith.constant dense<0.000000e+00> : vector<2x256xf32>
      %86 = tpu.matmul %85, %83, %cst_66 {dimension_numbers = #tpu.dot_dimension_numbers<[1], [0], [0], [1], [0, 0, 1, 1], [], []>} : vector<2x256xbf16>, vector<256x256xbf16>, vector<2x256xf32> -> vector<2x256xf32>
      %87 = vector.broadcast %84 : vector<1x256xf32> to vector<2x256xf32>
      %88 = arith.addf %86, %87 : vector<2x256xf32>
      %cst_67 = arith.constant 0.000000e+00 : f32
      %89 = vector.broadcast %cst_67 : f32 to vector<2x256xf32>
      %90 = arith.maximumf %88, %89 : vector<2x256xf32>
      %c0_68 = arith.constant 0 : index
      %c0_69 = arith.constant 0 : index
      %91 = vector.load %arg14[%c0_68, %c0_69] : memref<256x1xbf16, #tpu.memory_space<vmem>>, vector<256x1xbf16>
      %c0_70 = arith.constant 0 : index
      %c0_71 = arith.constant 0 : index
      %92 = vector.load %arg15[%c0_70, %c0_71] : memref<1x1xf32, #tpu.memory_space<vmem>>, vector<1x1xf32>
      %93 = arith.truncf %90 : vector<2x256xf32> to vector<2x256xbf16>
      %cst_72 = arith.constant dense<0.000000e+00> : vector<2x1xf32>
      %94 = tpu.matmul %93, %91, %cst_72 {dimension_numbers = #tpu.dot_dimension_numbers<[1], [0], [0], [1], [0, 0, 1, 1], [], []>} : vector<2x256xbf16>, vector<256x1xbf16>, vector<2x1xf32> -> vector<2x1xf32>
      %95 = vector.broadcast %92 : vector<1x1xf32> to vector<2x1xf32>
      %96 = arith.addf %94, %95 : vector<2x1xf32>
      %97 = arith.negf %96 : vector<2x1xf32>
      %98 = math.exp %97 : vector<2x1xf32>
      %cst_73 = arith.constant 1.000000e+00 : f32
      %99 = vector.broadcast %cst_73 : f32 to vector<2x1xf32>
      %100 = arith.addf %99, %98 : vector<2x1xf32>
      %101 = arith.divf %99, %100 : vector<2x1xf32>
      %c0_74 = arith.constant 0 : index
      %c0_75 = arith.constant 0 : index
      %102 = vector.load %arg28[%c0_74, %c0_75] : memref<2x1xf32, #tpu.memory_space<vmem>>, vector<2x1xf32>
      tpu.vector_store %arg28[%c0_74, %c0_75], %101 {strides = array<i32>} : memref<2x1xf32, #tpu.memory_space<vmem>>, vector<2x1xf32>,
      %c0_76 = arith.constant 0 : index
      %c0_77 = arith.constant 0 : index
      %103 = vector.load %arg16[%c0_76, %c0_77] : memref<512x256xbf16, #tpu.memory_space<vmem>>, vector<512x256xbf16>
      %c0_78 = arith.constant 0 : index
      %c0_79 = arith.constant 0 : index
      %104 = vector.load %arg17[%c0_78, %c0_79] : memref<1x256xf32, #tpu.memory_space<vmem>>, vector<1x256xf32>
      %105 = arith.truncf %73 : vector<2x512xf32> to vector<2x512xbf16>
      %cst_80 = arith.constant dense<0.000000e+00> : vector<2x256xf32>
      %106 = tpu.matmul %105, %103, %cst_80 {dimension_numbers = #tpu.dot_dimension_numbers<[1], [0], [0], [1], [0, 0, 1, 1], [], []>} : vector<2x512xbf16>, vector<512x256xbf16>, vector<2x256xf32> -> vector<2x256xf32>
      %107 = vector.broadcast %104 : vector<1x256xf32> to vector<2x256xf32>
      %108 = arith.addf %106, %107 : vector<2x256xf32>
      %cst_81 = arith.constant 0.000000e+00 : f32
      %109 = vector.broadcast %cst_81 : f32 to vector<2x256xf32>
      %110 = arith.maximumf %108, %109 : vector<2x256xf32>
      %c0_82 = arith.constant 0 : index
      %c0_83 = arith.constant 0 : index
      %111 = vector.load %arg18[%c0_82, %c0_83] : memref<256x256xbf16, #tpu.memory_space<vmem>>, vector<256x256xbf16>
      %c0_84 = arith.constant 0 : index
      %c0_85 = arith.constant 0 : index
      %112 = vector.load %arg19[%c0_84, %c0_85] : memref<1x256xf32, #tpu.memory_space<vmem>>, vector<1x256xf32>
      %113 = arith.truncf %110 : vector<2x256xf32> to vector<2x256xbf16>
      %cst_86 = arith.constant dense<0.000000e+00> : vector<2x256xf32>
      %114 = tpu.matmul %113, %111, %cst_86 {dimension_numbers = #tpu.dot_dimension_numbers<[1], [0], [0], [1], [0, 0, 1, 1], [], []>} : vector<2x256xbf16>, vector<256x256xbf16>, vector<2x256xf32> -> vector<2x256xf32>
      %115 = vector.broadcast %112 : vector<1x256xf32> to vector<2x256xf32>
      %116 = arith.addf %114, %115 : vector<2x256xf32>
      %cst_87 = arith.constant 0.000000e+00 : f32
      %117 = vector.broadcast %cst_87 : f32 to vector<2x256xf32>
      %118 = arith.maximumf %116, %117 : vector<2x256xf32>
      %c0_88 = arith.constant 0 : index
      %c0_89 = arith.constant 0 : index
      %119 = vector.load %arg20[%c0_88, %c0_89] : memref<256x1xbf16, #tpu.memory_space<vmem>>, vector<256x1xbf16>
      %c0_90 = arith.constant 0 : index
      %c0_91 = arith.constant 0 : index
      %120 = vector.load %arg21[%c0_90, %c0_91] : memref<1x1xf32, #tpu.memory_space<vmem>>, vector<1x1xf32>
      %121 = arith.truncf %118 : vector<2x256xf32> to vector<2x256xbf16>
      %cst_92 = arith.constant dense<0.000000e+00> : vector<2x1xf32>
      %122 = tpu.matmul %121, %119, %cst_92 {dimension_numbers = #tpu.dot_dimension_numbers<[1], [0], [0], [1], [0, 0, 1, 1], [], []>} : vector<2x256xbf16>, vector<256x1xbf16>, vector<2x1xf32> -> vector<2x1xf32>
      %123 = vector.broadcast %120 : vector<1x1xf32> to vector<2x1xf32>
      %124 = arith.addf %122, %123 : vector<2x1xf32>
      %c0_93 = arith.constant 0 : index
      %c0_94 = arith.constant 0 : index
      %125 = vector.load %arg29[%c0_93, %c0_94] : memref<2x1xf32, #tpu.memory_space<vmem>>, vector<2x1xf32>
      tpu.vector_store %arg29[%c0_93, %c0_94], %124 {strides = array<i32>} : memref<2x1xf32, #tpu.memory_space<vmem>>, vector<2x1xf32>,
    } else {
    }
    %c0 = arith.constant 0 : index
    %c0_1 = arith.constant 0 : index
    %c0_2 = arith.constant 0 : index
    %3 = vector.load %arg22[%c0, %c0_1, %c0_2] : memref<4x512x256xbf16, #tpu.memory_space<vmem>>, vector<4x512x256xbf16>
    %c0_3 = arith.constant 0 : index
    %c0_4 = arith.constant 0 : index
    %4 = vector.load %arg31[%c0_3, %c0_4] : memref<2x512xf32, #tpu.memory_space<vmem>>, vector<2x512xf32>
    %5 = arith.truncf %4 : vector<2x512xf32> to vector<2x512xbf16>
    %6 = vector.shape_cast %5 : vector<2x512xbf16> to vector<1x2x512xbf16>
    %7 = vector.shape_cast %6 : vector<1x2x512xbf16> to vector<1x2x512xbf16>
    %8 = vector.broadcast %7 : vector<1x2x512xbf16> to vector<4x2x512xbf16>
    "tpu.trace_start"() <{level = 10 : i32, message = "gbk,gkn->gbn"}> : () -> ()
    %cst = arith.constant dense<0.000000e+00> : vector<4x2x256xf32>
    %9 = tpu.matmul %8, %3, %cst {dimension_numbers = #tpu.dot_dimension_numbers<[2], [1], [1], [2], [0, 0, 0, 1, 1, 2], [0], [0]>} : vector<4x2x512xbf16>, vector<4x512x256xbf16>, vector<4x2x256xf32> -> vector<4x2x256xf32>
    "tpu.trace_stop"() : () -> ()
    %c0_5 = arith.constant 0 : index
    %c0_6 = arith.constant 0 : index
    %c0_7 = arith.constant 0 : index
    %10 = vector.load %arg23[%c0_5, %c0_6, %c0_7] : memref<4x1x256xf32, #tpu.memory_space<vmem>>, vector<4x1x256xf32>
    %11 = vector.broadcast %10 : vector<4x1x256xf32> to vector<4x2x256xf32>
    %12 = arith.addf %9, %11 : vector<4x2x256xf32>
    %cst_8 = arith.constant 0.000000e+00 : f32
    %13 = vector.broadcast %cst_8 : f32 to vector<4x2x256xf32>
    %14 = arith.maximumf %12, %13 : vector<4x2x256xf32>
    %c0_9 = arith.constant 0 : index
    %c0_10 = arith.constant 0 : index
    %c0_11 = arith.constant 0 : index
    %15 = vector.load %arg24[%c0_9, %c0_10, %c0_11] : memref<4x256x256xbf16, #tpu.memory_space<vmem>>, vector<4x256x256xbf16>
    %16 = arith.truncf %14 : vector<4x2x256xf32> to vector<4x2x256xbf16>
    "tpu.trace_start"() <{level = 10 : i32, message = "gbk,gkn->gbn"}> : () -> ()
    %cst_12 = arith.constant dense<0.000000e+00> : vector<4x2x256xf32>
    %17 = tpu.matmul %16, %15, %cst_12 {dimension_numbers = #tpu.dot_dimension_numbers<[2], [1], [1], [2], [0, 0, 0, 1, 1, 2], [0], [0]>} : vector<4x2x256xbf16>, vector<4x256x256xbf16>, vector<4x2x256xf32> -> vector<4x2x256xf32>
    "tpu.trace_stop"() : () -> ()
    %c0_13 = arith.constant 0 : index
    %c0_14 = arith.constant 0 : index
    %c0_15 = arith.constant 0 : index
    %18 = vector.load %arg25[%c0_13, %c0_14, %c0_15] : memref<4x1x256xf32, #tpu.memory_space<vmem>>, vector<4x1x256xf32>
    %19 = vector.broadcast %18 : vector<4x1x256xf32> to vector<4x2x256xf32>
    %20 = arith.addf %17, %19 : vector<4x2x256xf32>
    %cst_16 = arith.constant 0.000000e+00 : f32
    %21 = vector.broadcast %cst_16 : f32 to vector<4x2x256xf32>
    %22 = arith.maximumf %20, %21 : vector<4x2x256xf32>
    %c0_17 = arith.constant 0 : index
    %c0_18 = arith.constant 0 : index
    %c0_19 = arith.constant 0 : index
    %23 = vector.load %arg26[%c0_17, %c0_18, %c0_19] : memref<4x256x2xbf16, #tpu.memory_space<vmem>>, vector<4x256x2xbf16>
    %24 = arith.truncf %22 : vector<4x2x256xf32> to vector<4x2x256xbf16>
    "tpu.trace_start"() <{level = 10 : i32, message = "gbk,gkn->gbn"}> : () -> ()
    %cst_20 = arith.constant dense<0.000000e+00> : vector<4x2x2xf32>
    %25 = tpu.matmul %24, %23, %cst_20 {dimension_numbers = #tpu.dot_dimension_numbers<[2], [1], [1], [2], [0, 0, 0, 1, 1, 2], [0], [0]>} : vector<4x2x256xbf16>, vector<4x256x2xbf16>, vector<4x2x2xf32> -> vector<4x2x2xf32>
    "tpu.trace_stop"() : () -> ()
    %c0_21 = arith.constant 0 : index
    %c0_22 = arith.constant 0 : index
    %c0_23 = arith.constant 0 : index
    %26 = vector.load %arg27[%c0_21, %c0_22, %c0_23] : memref<4x1x2xf32, #tpu.memory_space<vmem>>, vector<4x1x2xf32>
    %27 = vector.broadcast %26 : vector<4x1x2xf32> to vector<4x2x2xf32>
    %28 = arith.addf %25, %27 : vector<4x2x2xf32>
    %cst_24 = arith.constant 0.000000e+00 : f32
    %29 = vector.broadcast %cst_24 : f32 to vector<4x2x2xf32>
    %30 = arith.maximumf %28, %29 : vector<4x2x2xf32>
    %31 = vector.broadcast %cst_24 : f32 to vector<4x2x2xf32>
    %32 = arith.subf %28, %31 : vector<4x2x2xf32>
    %33 = arith.cmpf one, %32, %32 : vector<4x2x2xf32>
    %34 = vector.broadcast %cst_24 : f32 to vector<4x2x2xf32>
    %35 = arith.addf %28, %34 : vector<4x2x2xf32>
    %36 = math.absf %32 : vector<4x2x2xf32>
    %cst_25 = arith.constant 0.000000e+00 : f32
    %37 = vector.broadcast %cst_25 : f32 to vector<4x2x2xf32>
    %38 = arith.subf %37, %36 : vector<4x2x2xf32>
    %39 = math.exp %38 : vector<4x2x2xf32>
    %40 = math.log1p %39 : vector<4x2x2xf32>
    %41 = arith.addf %30, %40 : vector<4x2x2xf32>
    %42 = arith.select %33, %35, %41 : vector<4x2x2xi1>, vector<4x2x2xf32>
    %c0_26 = arith.constant 0 : index
    %c0_27 = arith.constant 0 : index
    %c0_28 = arith.constant 0 : index
    %43 = vector.load %arg30[%c0_26, %c0_27, %c0_28] : memref<4x2x2xf32, #tpu.memory_space<vmem>>, vector<4x2x2xf32>
    tpu.vector_store %arg30[%c0_26, %c0_27, %c0_28], %42 {strides = array<i32>} : memref<4x2x2xf32, #tpu.memory_space<vmem>>, vector<4x2x2xf32>,
    return
  }
  func.func @transform_0(%arg0: i32) -> (i32, i32) {
    %c0_i32 = arith.constant 0 : i32
    %c0_i32_0 = arith.constant 0 : i32
    %c0_i32_1 = arith.constant 0 : i32
    return %c0_i32, %c0_i32_0 : i32, i32
  }
  func.func @transform_1(%arg0: i32) -> (i32, i32) {
    %c0_i32 = arith.constant 0 : i32
    %c0_i32_0 = arith.constant 0 : i32
    %c0_i32_1 = arith.constant 0 : i32
    return %c0_i32, %c0_i32_0 : i32, i32
  }
  func.func @transform_2(%arg0: i32) -> (i32, i32) {
    %c0_i32 = arith.constant 0 : i32
    %c0_i32_0 = arith.constant 0 : i32
    %c0_i32_1 = arith.constant 0 : i32
    return %c0_i32, %c0_i32_0 : i32, i32
  }
  func.func @transform_3(%arg0: i32) -> (i32, i32) {
    %c0_i32 = arith.constant 0 : i32
    %c0_i32_0 = arith.constant 0 : i32
    %c0_i32_1 = arith.constant 0 : i32
    return %c0_i32, %c0_i32_0 : i32, i32
  }
  func.func @transform_4(%arg0: i32) -> (i32, i32) {
    %c0_i32 = arith.constant 0 : i32
    %c0_i32_0 = arith.constant 0 : i32
    %c0_i32_1 = arith.constant 0 : i32
    return %c0_i32, %c0_i32_0 : i32, i32
  }
  func.func @transform_5(%arg0: i32) -> (i32, i32) {
    %c0_i32 = arith.constant 0 : i32
    %c0_i32_0 = arith.constant 0 : i32
    %c0_i32_1 = arith.constant 0 : i32
    return %c0_i32, %c0_i32_0 : i32, i32
  }
  func.func @transform_6(%arg0: i32) -> (i32, i32) {
    %c0_i32 = arith.constant 0 : i32
    %c0_i32_0 = arith.constant 0 : i32
    %c0_i32_1 = arith.constant 0 : i32
    return %c0_i32, %c0_i32_0 : i32, i32
  }
  func.func @transform_7(%arg0: i32) -> (i32, i32) {
    %c0_i32 = arith.constant 0 : i32
    %c0_i32_0 = arith.constant 0 : i32
    %c0_i32_1 = arith.constant 0 : i32
    return %c0_i32, %c0_i32_0 : i32, i32
  }
  func.func @transform_8(%arg0: i32) -> (i32, i32) {
    %c0_i32 = arith.constant 0 : i32
    %c0_i32_0 = arith.constant 0 : i32
    %c0_i32_1 = arith.constant 0 : i32
    return %c0_i32, %c0_i32_0 : i32, i32
  }
  func.func @transform_9(%arg0: i32) -> (i32, i32) {
    %c0_i32 = arith.constant 0 : i32
    %c0_i32_0 = arith.constant 0 : i32
    %c0_i32_1 = arith.constant 0 : i32
    return %c0_i32, %c0_i32_0 : i32, i32
  }
  func.func @transform_10(%arg0: i32) -> (i32, i32) {
    %c0_i32 = arith.constant 0 : i32
    %c0_i32_0 = arith.constant 0 : i32
    %c0_i32_1 = arith.constant 0 : i32
    return %c0_i32, %c0_i32_0 : i32, i32
  }
  func.func @transform_11(%arg0: i32) -> (i32, i32) {
    %c0_i32 = arith.constant 0 : i32
    %c0_i32_0 = arith.constant 0 : i32
    %c0_i32_1 = arith.constant 0 : i32
    return %c0_i32, %c0_i32_0 : i32, i32
  }
  func.func @transform_12(%arg0: i32) -> (i32, i32) {
    %c0_i32 = arith.constant 0 : i32
    %c0_i32_0 = arith.constant 0 : i32
    %c0_i32_1 = arith.constant 0 : i32
    return %c0_i32, %c0_i32_0 : i32, i32
  }
  func.func @transform_13(%arg0: i32) -> (i32, i32) {
    %c0_i32 = arith.constant 0 : i32
    %c0_i32_0 = arith.constant 0 : i32
    %c0_i32_1 = arith.constant 0 : i32
    return %c0_i32, %c0_i32_0 : i32, i32
  }
  func.func @transform_14(%arg0: i32) -> (i32, i32) {
    %c0_i32 = arith.constant 0 : i32
    %c0_i32_0 = arith.constant 0 : i32
    %c0_i32_1 = arith.constant 0 : i32
    return %c0_i32, %c0_i32_0 : i32, i32
  }
  func.func @transform_15(%arg0: i32) -> (i32, i32) {
    %c0_i32 = arith.constant 0 : i32
    %c0_i32_0 = arith.constant 0 : i32
    %c0_i32_1 = arith.constant 0 : i32
    return %c0_i32, %c0_i32_0 : i32, i32
  }
  func.func @transform_16(%arg0: i32) -> (i32, i32) {
    %c0_i32 = arith.constant 0 : i32
    %c0_i32_0 = arith.constant 0 : i32
    %c0_i32_1 = arith.constant 0 : i32
    return %c0_i32, %c0_i32_0 : i32, i32
  }
  func.func @transform_17(%arg0: i32) -> (i32, i32) {
    %c0_i32 = arith.constant 0 : i32
    %c0_i32_0 = arith.constant 0 : i32
    %c0_i32_1 = arith.constant 0 : i32
    return %c0_i32, %c0_i32_0 : i32, i32
  }
  func.func @transform_18(%arg0: i32) -> (i32, i32) {
    %c0_i32 = arith.constant 0 : i32
    %c0_i32_0 = arith.constant 0 : i32
    %c0_i32_1 = arith.constant 0 : i32
    return %c0_i32, %c0_i32_0 : i32, i32
  }
  func.func @transform_19(%arg0: i32) -> (i32, i32) {
    %c0_i32 = arith.constant 0 : i32
    %c0_i32_0 = arith.constant 0 : i32
    %c0_i32_1 = arith.constant 0 : i32
    return %c0_i32, %c0_i32_0 : i32, i32
  }
  func.func @transform_20(%arg0: i32) -> (i32, i32) {
    %c0_i32 = arith.constant 0 : i32
    %c0_i32_0 = arith.constant 0 : i32
    %c0_i32_1 = arith.constant 0 : i32
    return %c0_i32, %c0_i32_0 : i32, i32
  }
  func.func @transform_21(%arg0: i32) -> (i32, i32, i32) {
    %c0_i32 = arith.constant 0 : i32
    %c0_i32_0 = arith.constant 0 : i32
    %c0_i32_1 = arith.constant 0 : i32
    return %arg0, %c0_i32, %c0_i32_0 : i32, i32, i32
  }
  func.func @transform_22(%arg0: i32) -> (i32, i32, i32) {
    %c0_i32 = arith.constant 0 : i32
    %c0_i32_0 = arith.constant 0 : i32
    %c0_i32_1 = arith.constant 0 : i32
    return %arg0, %c0_i32, %c0_i32_0 : i32, i32, i32
  }
  func.func @transform_23(%arg0: i32) -> (i32, i32, i32) {
    %c0_i32 = arith.constant 0 : i32
    %c0_i32_0 = arith.constant 0 : i32
    %c0_i32_1 = arith.constant 0 : i32
    return %arg0, %c0_i32, %c0_i32_0 : i32, i32, i32
  }
  func.func @transform_24(%arg0: i32) -> (i32, i32, i32) {
    %c0_i32 = arith.constant 0 : i32
    %c0_i32_0 = arith.constant 0 : i32
    %c0_i32_1 = arith.constant 0 : i32
    return %arg0, %c0_i32, %c0_i32_0 : i32, i32, i32
  }
  func.func @transform_25(%arg0: i32) -> (i32, i32, i32) {
    %c0_i32 = arith.constant 0 : i32
    %c0_i32_0 = arith.constant 0 : i32
    %c0_i32_1 = arith.constant 0 : i32
    return %arg0, %c0_i32, %c0_i32_0 : i32, i32, i32
  }
  func.func @transform_26(%arg0: i32) -> (i32, i32, i32) {
    %c0_i32 = arith.constant 0 : i32
    %c0_i32_0 = arith.constant 0 : i32
    %c0_i32_1 = arith.constant 0 : i32
    return %arg0, %c0_i32, %c0_i32_0 : i32, i32, i32
  }
  func.func @transform_27(%arg0: i32) -> (i32, i32) {
    %c0_i32 = arith.constant 0 : i32
    %c0_i32_0 = arith.constant 0 : i32
    %c0_i32_1 = arith.constant 0 : i32
    return %c0_i32, %c0_i32_0 : i32, i32
  }
  func.func @transform_28(%arg0: i32) -> (i32, i32) {
    %c0_i32 = arith.constant 0 : i32
    %c0_i32_0 = arith.constant 0 : i32
    %c0_i32_1 = arith.constant 0 : i32
    return %c0_i32, %c0_i32_0 : i32, i32
  }
  func.func @transform_29(%arg0: i32) -> (i32, i32, i32) {
    %c0_i32 = arith.constant 0 : i32
    %c0_i32_0 = arith.constant 0 : i32
    %c0_i32_1 = arith.constant 0 : i32
    return %arg0, %c0_i32, %c0_i32_0 : i32, i32, i32
  }
}

</mosaic_0001>

<bundles_post_ra>
// kernel: coilicra_forward.2
= control target key start
LH: loop header
LB: loop body
LE: loop exit
PB: predicated region body
PF: predicated region fallthrough
CT: control target
= control target key end

     0   :  { %10 = vsyncpa [#allocation4], 0  ;;  %s1647_s0 = inlined_call_operand.vmem [shape: bf16[2,256,32], index: 0, kind: input, shape index: {}]   ;;  %s1648_s1 = inlined_call_operand.hbm [shape: bf16[32,128], index: 1, kind: input, shape index: {}]   ;;  %s1649_s2 = inlined_call_operand.hbm [shape: f32[1,128], index: 2, kind: input, shape index: {}]   ;;  %s1650_s3 = inlined_call_operand.hbm [shape: bf16[128,512], index: 3, kind: input, shape index: {}]   ;;  %s1651_s4 = inlined_call_operand.hbm [shape: f32[1,512], index: 4, kind: input, shape index: {}]   ;;  %s1652_s5 = inlined_call_operand.vmem [shape: f32[2,1,512], index: 5, kind: output, shape index: {}]  }
   0x1   :  { %11 = vsyncpa [#allocation6], 0 }
   0x2   :  { %12 = vsyncpa [#allocation9], 0  ;;  %s1459_s18 = smov 0   ;;  %s1461_s19 = smov 0  }
   0x3   :  { %s1463_s20 = smov 0   ;;  %s1465_s21 = smov 0  }
   0x4   :  { %s1467_s22 = smov 0  }
   0x5 LB: > { %s1418_s23 = smov [#allocation5]   ;;  %s1002_s25 = sadd.s32 4294967295, %s1416_s22   ;;  %s1416_s22 = sphi %s1467_s22, %s18_s22   ;;  %s1412_s21 = sphi %s1465_s21, %s1668_s21   ;;  %s1408_s20 = sphi %s1463_s20, %s1667_s20   ;;  %s1404_s19 = sphi %s1461_s19, %s1666_s19   ;;  %s1400_s18 = sphi %s1459_s18, %s1665_s18  }
   0x6   : > { %s199_s24 = sshll.u32 %s1418_s23, 4  ;;  %p1004_p0 = scmp.ge.s32.totalorder %s1416_s22, 1  ;;  %s200_s24 = int_to_ptr.vmem [resolvable:$true] %s199_s24 }
   0x7   : > { %p173_p1 = scmp.lt.s32.totalorder %s1416_s22, 5  ;;  %p1487_p2 = scmp.eq.s32.totalorder %s1002_s25, 0 }
   0x8   : > { %s27_s29 = sadd.s32 1, %s1408_s20  ;;  %s1254_s8 = scalar_lea.hbm %s1649_s2, 16 }
   0x9   : > { %s1657_s26 = scalar_select %p1487_p2, 1, 0 }
   0xa   : > { %p1491_p3 = pnand %p1004_p0, %p173_p1  ;;  %p1504_p6 = scmp.ge.s32.totalorder %s27_s29, 2 }
   0xb   : > { %p1255_p7 = scmp.ne.s32.totalorder %s1649_s2, %s1254_s8  ;;  %p1261_p11 = scmp.lt.u32.totalorder %s1254_s8, %s1649_s2 }
   0xc   : > { %s1658_s27 = scalar_select %p1491_p3, 1, 0 }
   0xd   : > { %p1124_p4 = pneg %p1491_p3 }
   0xe   : > { %s1660_s30 = scalar_select %p1504_p6, 1, 0 }
   0xf   : > { %p1499_p5 = pnand %p1487_p2, %p1124_p4 }
  0x11   : > { %p1516_p8 = pneg %p1499_p5 }
  0x13   : > { %p1257_p9 = pnand %p1516_p8, %p1255_p7 }
  0x15   : > { %p1258_p10 = pneg %p1257_p9 }
  0x17   : > { %p1263_p12 = pnand %p1261_p11, %p1258_p10 }
  0x19   : > { %1266 = shalt.err (!%p1263_p12)
}
  0x1a   : > { %s1267_s14 = scalar_lea.vmem %s200_s24, 16  ;;  %s1274_s15 = scalar_lea.vmem %s200_s24, 32 }
  0x1b   : > { %p1268_p13 = scmp.ne.s32.totalorder %s200_s24, %s1267_s14  ;;  %p1275_p4 = scmp.lt.s32.totalorder %s200_s24, %s200_s24 }
  0x1c   : > { %p1276_p2 = scmp.lt.s32.totalorder %s1274_s15, %s1267_s14 }
  0x1d   : > { %p1270_p0 = pnand %p1268_p13, %p1516_p8 }
  0x1e   : > { %p1277_p3 = por %p1276_p2, %p1275_p4 }
  0x1f   : > { %p1271_p1 = pneg %p1270_p0 }
  0x21   : > { %p1278_p6 = pnand %p1277_p3, %p1271_p1 }
  0x23   : > { %1281 = shalt.err (!%p1278_p6)
}
  0x24   : > { %1130 = dma.hbm_to_vmem [thread:$0]  (!%p1499_p5), %s1649_s2, 16, %s200_s24, [#allocation6]  }
  0x25   : > { %p1662_p7 = scmp.ne.s32.totalorder %s1660_s30, 0  ;;  %s30_s23 = sadd.s32 1, %s1412_s21 }
  0x26   : > { %s1419_s25 = smov [#allocation3]   ;;  %s1282_s9 = scalar_lea.hbm %s1648_s1, 256 }
  0x27   : > { %s1670_s29 = smov (%p1662_p7, %s27_s29), 0  ;;  %s1672_s23 = smov (!%p1662_p7, %s30_s23), %s1412_s21 }
  0x28   : > { %s185_s6 = sshll.u32 %s1419_s25, 4  ;;  %p32_p2 = scmp.ge.s32.totalorder %s1672_s23, 2  ;;  %s186_s6 = int_to_ptr.vmem [resolvable:$true] %s185_s6 }
  0x29   : > { %p1283_p3 = scmp.ne.s32.totalorder %s1648_s1, %s1282_s9  ;;  %p1289_p10 = scmp.lt.u32.totalorder %s1282_s9, %s1648_s1 }
  0x2a   : > { %s1674_s23 = smov (%p32_p2, %s1672_s23), 0 }
  0x2b   : > { %p1285_p6 = pnand %p1283_p3, %p1516_p8 }
  0x2d   : > { %p1286_p9 = pneg %p1285_p6 }
  0x2f   : > { %p1291_p11 = pnand %p1289_p10, %p1286_p9 }
  0x31   : > { %1294 = shalt.err (!%p1291_p11)
}
  0x32   : > { %s1295_s13 = scalar_lea.vmem %s186_s6, 256  ;;  %p1303_p1 = scmp.lt.s32.totalorder %s186_s6, %s186_s6 }
  0x33   : > { %p1296_p12 = scmp.ne.s32.totalorder %s186_s6, %s1295_s13  ;;  %p1304_p4 = scmp.lt.s32.totalorder %s1295_s13, %s1295_s13 }
  0x35   : > { %p1298_p13 = pnand %p1296_p12, %p1516_p8  ;;  %p1305_p7 = por %p1304_p4, %p1303_p1 }
  0x37   : > { %p1299_p0 = pneg %p1298_p13 }
  0x39   : > { %p1306_p2 = pnand %p1305_p7, %p1299_p0 }
  0x3b   : > { %1309 = shalt.err (!%p1306_p2)
}
  0x3c   : > { %s1420_s14 = smov 64   ;;  %s1421_s15 = smov 4  }
  0x3d   : > { %1127 = dma.hbm_to_vmem [thread:$0]  (!%p1499_p5), %s1648_s1, 256, %s186_s6, [#allocation4], %s1420_s14, %s1420_s14, %s1421_s15  }
  0x3e   : > { %s1422_s25 = smov [#allocation7]   ;;  %s1310_s10 = scalar_lea.hbm %s1650_s3, 4096 }
  0x3f   : > { %s209_s7 = sshll.u32 %s1422_s25, 4  ;;  %p1311_p3 = scmp.ne.s32.totalorder %s1650_s3, %s1310_s10  ;;  %s210_s7 = int_to_ptr.vmem [resolvable:$true] %s209_s7 }
  0x40   : > { %p1317_p10 = scmp.lt.u32.totalorder %s1310_s10, %s1650_s3 }
  0x41   : > { %p1313_p6 = pnand %p1311_p3, %p1516_p8 }
  0x43   : > { %p1314_p9 = pneg %p1313_p6 }
  0x45   : > { %p1319_p11 = pnand %p1317_p10, %p1314_p9 }
  0x47   : > { %1322 = shalt.err (!%p1319_p11)
}
  0x48   : > { %s1323_s6 = scalar_lea.vmem %s210_s7, 4096  ;;  %p1331_p1 = scmp.lt.s32.totalorder %s210_s7, %s210_s7 }
  0x49   : > { %p1324_p12 = scmp.ne.s32.totalorder %s210_s7, %s1323_s6  ;;  %p1332_p4 = scmp.lt.s32.totalorder %s1323_s6, %s1323_s6 }
  0x4b   : > { %p1326_p13 = pnand %p1324_p12, %p1516_p8  ;;  %p1333_p7 = por %p1332_p4, %p1331_p1 }
  0x4d   : > { %p1327_p0 = pneg %p1326_p13 }
  0x4f   : > { %p1334_p2 = pnand %p1333_p7, %p1327_p0 }
  0x51   : > { %1337 = shalt.err (!%p1334_p2)
}
  0x52   : > { %s1423_s14 = smov 256   ;;  %s1424_s15 = smov 16  }
  0x53   : > { %1133 = dma.hbm_to_vmem [thread:$0]  (!%p1499_p5), %s1650_s3, 4096, %s210_s7, [#allocation6], %s1423_s14, %s1423_s14, %s1424_s15  }
  0x54   : > { %s1425_s25 = smov [#allocation8]   ;;  %s1338_s12 = scalar_lea.hbm %s1651_s4, 64 }
  0x55   : > { %s223_s8 = sshll.u32 %s1425_s25, 4  ;;  %p1339_p3 = scmp.ne.s32.totalorder %s1651_s4, %s1338_s12  ;;  %s224_s8 = int_to_ptr.vmem [resolvable:$true] %s223_s8 }
  0x56   : > { %p1345_p10 = scmp.lt.u32.totalorder %s1338_s12, %s1651_s4 }
  0x57   : > { %p1341_p6 = pnand %p1339_p3, %p1516_p8 }
  0x59   : > { %p1342_p9 = pneg %p1341_p6 }
  0x5b   : > { %p1347_p11 = pnand %p1345_p10, %p1342_p9 }
  0x5d   : > { %1350 = shalt.err (!%p1347_p11)
}
  0x5e   : > { %s1351_s7 = scalar_lea.vmem %s224_s8, 64  ;;  %p1359_p1 = scmp.lt.s32.totalorder %s224_s8, %s224_s8 }
  0x5f   : > { %p1352_p12 = scmp.ne.s32.totalorder %s224_s8, %s1351_s7  ;;  %p1360_p4 = scmp.lt.s32.totalorder %s1351_s7, %s1351_s7 }
  0x61   : > { %p1354_p13 = pnand %p1352_p12, %p1516_p8  ;;  %p1361_p7 = por %p1360_p4, %p1359_p1 }
  0x63   : > { %p1355_p0 = pneg %p1354_p13 }
  0x65   : > { %p1362_p2 = pnand %p1361_p7, %p1355_p0 }
  0x67   : > { %1365 = shalt.err (!%p1362_p2)
}
  0x68   : > { %1136 = dma.hbm_to_vmem [thread:$0]  (!%p1499_p5), %s1651_s4, 64, %s224_s8, [#allocation9]  }
  0x69   : > { %p1663_p3 = scmp.ne.s32.totalorder %s1658_s27, 0 }
  0x6a   : > { %p1664_p6 = scmp.ne.s32.totalorder (!%p1663_p3), %s1657_s26, 0 }
  0x6b   : > { %249 = sbr.rel (%p1663_p3) target bundleno = 640 (0x280), region = 40 }
  0x72   : > { %1387 = dma.done.wait (%p1664_p6), [#allocation4], 256  }
  0x73   : > { %1389 = vsyncadd (%p1664_p6), [#allocation4], 4294967040 }
  0x74   : > { %1391 = dma.done.wait (%p1664_p6), [#allocation6], 4112  }
  0x75   : > { %1393 = vsyncadd (%p1664_p6), [#allocation6], 4294963184 }
  0x76   : > { %1395 = dma.done.wait (%p1664_p6), [#allocation9], 64  }
  0x77   : > { %1397 = vsyncadd (%p1664_p6), [#allocation9], 4294967232  ;;  %s1015_s27 = sshll.u32 %s1400_s18, 4  ;;  %p293_p5 = scmp.lt.s32.totalorder %s1404_s19, 1 }
  0x78   : > { %p295_p8 = scmp.lt.s32.totalorder %s1015_s27, 31  ;;  %p1019_p9 = scmp.ne.s32.totalorder %s1400_s18, 0 }
  0x79   : > { %s1676_s19 = smov (!%p293_p5, %s1404_s19), 1  ;;  %v1426_v0 = vmov (!%p1019_p9), 0.0  }
  0x7a   : > { %s1678_s27 = smov (!%p295_p8, %s1015_s27), 31  ;;  %s1016_s28 = sshll.u32 %s1676_s19, 5  ;;  %311 = vst [vmem:[#allocation2] sm:$0x1] (!%p1019_p9), %v1426_v0 }
  0x7b   : > { %s1018_s11 = sshll.u32 %s1676_s19, 2  ;;  %s298_s16 = sadd.s32 %s1016_s28, %s1678_s27 }
  0x7c   : > { %s1616_s8 = scalar_lea.vmem %s1652_s5, %s1018_s11  ;;  %s1017_s9 = sshll.u32 %s298_s16, 2 }
  0x7d   : > { %s300_s12 = scalar_lea.vmem %s1647_s0, %s1017_s9  ;;  %310 = sbr.rel (%p1019_p9) target bundleno = 132 (0x84), region = 60 }
  0x84 PF: > { %v1196_v1 = vld [vmem:[#allocation3] sm:$0xff]   ;;  %v1197_v2 = vld [vmem:[#allocation3 + $0x8] sm:$0xff]   ;;  %vm391_vm0 = vcmask 261120   ;;  %v1201_v9 = vld [vmem:[%s300_s12 + $0x18] sm:$0xff]   ;;  %p1039_p10 = scmp.ne.s32.totalorder %s1400_s18, 1 }
  0x85   : > { %1084 = vmatprep.subr.bf16.mxu0 %v1196_v1  ;;  %v1198_v3 = vld [vmem:[%s300_s12] sm:$0xff]   ;;  %1104 = vmatprep.subr.bf16.mxu1 %v1196_v1  ;;  %v1199_v4 = vld [vmem:[%s300_s12 + $0x8] sm:$0xff]   ;;  %v1200_v5 = vld [vmem:[%s300_s12 + $0x10] sm:$0xff]  }
  0x86   : > { %1085 = vmatpush3.bf16.msra.mxu0 %v1196_v1  ;;  %1106 = vmatpush3.bf16.msra.mxu1 %v1196_v1  ;;  %v1202_v6 = vld [vmem:[%s300_s12 + $0x20] sm:$0xff]   ;;  %v1203_v7 = vld [vmem:[%s300_s12 + $0x28] sm:$0xff]   ;;  %v1204_v8 = vld [vmem:[%s300_s12 + $0x30] sm:$0xff]  }
  0x87   : > { %1086 = vmatprep.subr.bf16.mxu0 %v1197_v2  ;;  %1088 = vmatprep.mubr.msk.bf16.mxu0 %vm391_vm0, %v1198_v3  ;;  %v1205_v10 = vld [vmem:[%s300_s12 + $0x38] sm:$0xff]   ;;  %v1020_v11 = vld [vmem:[#allocation5] ss:$0 sm:$0xff] }
  0x88   : > { %1105 = vmatprep.subr.bf16.mxu1 %v1197_v2  ;;  %1096 = vmatprep.mubr.msk.bf16.mxu1 %vm391_vm0, %v1202_v6 }
  0x8a   : > { %1087 = vmatpush3.bf16.msra.mxu0 %v1197_v2  ;;  %1107 = vmatpush3.bf16.msra.mxu1 %v1197_v2 }
  0x8d   : > { %1089 = vmatmul.mubr.msk.bf16.vlgmr.msra.gmra.mrb[0].mxu0 %vm391_vm0, %v1199_v4  ;;  %1097 = vmatmul.mubr.msk.bf16.vlgmr.msra.gmra.mrb[0].mxu1 %vm391_vm0, %v1203_v7 }
  0x8e   : > { %1092 = vmatprep.mubr.msk.bf16.mxu0 %vm391_vm0, %v1200_v5  ;;  %1100 = vmatprep.mubr.msk.bf16.mxu1 %vm391_vm0, %v1204_v8 }
  0x95   : > { %1093 = vmatmul.mubr.msk.bf16.gmra.mrb[4].mxu0 %vm391_vm0, %v1201_v9  ;;  %1101 = vmatmul.mubr.msk.bf16.gmra.mrb[4].mxu1 %vm391_vm0, %v1205_v10 }
 0x160   : > { %v1090_v12 = vpop.f32.mrb[0].mxu0  ;;  %v1098_v13 = vpop.f32.mrb[0].mxu1 }
 0x161   : > { %v450_v14 = vpop.f32.mrb[1].mxu0  ;;  %v482_v15 = vpop.f32.mrb[1].mxu1  ;;  %v459_v21 = vadd.f32 %v1090_v12, %v1020_v11  ;;  %v491_v53 = vadd.f32 %v1098_v13, %v1020_v11 }
 0x162   : > { %v451_v16 = vadd.f32 %v1020_v11, %v450_v14  ;;  %v1091_v17 = vpop.f32.mrb[2].mxu0  ;;  %v1099_v18 = vpop.f32.mrb[2].mxu1  ;;  %v483_v46 = vadd.f32 %v1020_v11, %v482_v15 }
 0x163   : > { %v453_v19 = vpop.f32.mrb[3].mxu0  ;;  %v485_v20 = vpop.f32.mrb[3].mxu1  ;;  %v462_v24 = vadd.f32 %v1091_v17, %v1020_v11  ;;  %v515_v26 = vmax.f32 %v459_v21, 0.0  ;;  %v494_v56 = vadd.f32 %v1099_v18, %v1020_v11  ;;  %v523_v59 = vmax.f32 %v491_v53, 0.0  ;;  %v529_v17 = vld [vmem:[#allocation2] sm:$0x1] }
 0x164   : > { %v454_v22 = vadd.f32 %v1020_v11, %v453_v19  ;;  %v513_v23 = vmax.f32 %v451_v16, 0.0  ;;  %v521_v51 = vmax.f32 %v483_v46, 0.0  ;;  %v486_v52 = vadd.f32 %v1020_v11, %v485_v20  ;;  %v1206_v20 = vld [vmem:[#allocation7 + $0x4] ss:$16 sps:$4 sm:$0xff] (!%p1039_p10)   ;;  %v1246_v46 = vld [vmem:[#allocation7 + $0xc0] ss:$16 sps:$4 sm:$0xff] (!%p1039_p10)  }
 0x165   : > { %v516_v32 = vmax.f32 %v462_v24, 0.0  ;;  %v524_v61 = vmax.f32 %v494_v56, 0.0  ;;  %v1427_v21 = vmov (!%p1039_p10), 0   ;;  %774 = vmatprep.subr.bf16.mxu0 (!%p1039_p10), %v1206_v20  ;;  %v1212_v24 = vld [vmem:[#allocation7 + $0x24] ss:$16 sps:$4 sm:$0xff] (!%p1039_p10)  }
 0x166   : > { %v514_v25 = vmax.f32 %v454_v22, 0.0  ;;  %v522_v57 = vmax.f32 %v486_v52, 0.0  ;;  %806 = vmatprep.mubr.bf16.mxu0 (!%p1039_p10), %v1427_v21  ;;  %847 = vmatprep.mubr.bf16.mxu1 (!%p1039_p10), %v1427_v21  ;;  %v1210_v22 = vld [vmem:[#allocation7] ss:$16 sps:$4 sm:$0xff] (!%p1039_p10)   ;;  %v1253_v53 = vld [vmem:[#allocation7 + $0xe8] ss:$16 sps:$4 sm:$0xff] (!%p1039_p10)  }
 0x167   : > { %775 = vmatpush1.bf16.msra.mxu0 (!%p1039_p10), %v1210_v22  ;;  %v1252_v52 = vld [vmem:[#allocation7 + $0xe0] ss:$16 sps:$4 sm:$0xff] (!%p1039_p10)  }
 0x168   : > { %v530_v27 = vadd.f32 %v514_v25, %v513_v23  ;;  %v1094_v28 = vpop.f32.mrb[4].mxu0  ;;  %v1102_v29 = vpop.f32.mrb[4].mxu1  ;;  %v1211_v23 = vld [vmem:[#allocation7 + $0x8] ss:$16 sps:$4 sm:$0xff] (!%p1039_p10)   ;;  %v1214_v25 = vld [vmem:[#allocation7 + $0x2c] ss:$16 sps:$4 sm:$0xff] (!%p1039_p10)   ;;  %776 = vmatprep.subr.bf16.mxu0 (!%p1039_p10), %v1212_v24 }
 0x169   : > { %v466_v30 = vpop.f32.mrb[5].mxu0  ;;  %v498_v31 = vpop.f32.mrb[5].mxu1  ;;  %v475_v39 = vadd.f32 %v1094_v28, %v1020_v11  ;;  %v507_v1 = vadd.f32 %v1102_v29, %v1020_v11  ;;  %v1218_v28 = vld [vmem:[#allocation7 + $0x44] ss:$16 sps:$4 sm:$0xff] (!%p1039_p10)   ;;  %v1220_v29 = vld [vmem:[#allocation7 + $0x4c] ss:$16 sps:$4 sm:$0xff] (!%p1039_p10)  }
 0x16a   : > { %v531_v33 = vadd.f32 %v530_v27, %v515_v26  ;;  %v467_v34 = vadd.f32 %v1020_v11, %v466_v30  ;;  %v1095_v35 = vpop.f32.mrb[6].mxu0  ;;  %v1103_v36 = vpop.f32.mrb[6].mxu1  ;;  %v499_v58 = vadd.f32 %v1020_v11, %v498_v31  ;;  %v1216_v26 = vld [vmem:[#allocation7 + $0x20] ss:$16 sps:$4 sm:$0xff] (!%p1039_p10)   ;;  %v1217_v27 = vld [vmem:[#allocation7 + $0x28] ss:$16 sps:$4 sm:$0xff] (!%p1039_p10)  }
 0x16b   : > { %v469_v37 = vpop.f32.mrb[7].mxu0  ;;  %v501_v38 = vpop.f32.mrb[7].mxu1  ;;  %v478_v44 = vadd.f32 %v1095_v35, %v1020_v11  ;;  %v519_v47 = vmax.f32 %v475_v39, 0.0  ;;  %v510_v4 = vadd.f32 %v1103_v36, %v1020_v11  ;;  %v527_v6 = vmax.f32 %v507_v1, 0.0  ;;  %v1222_v30 = vld [vmem:[#allocation7 + $0x40] ss:$16 sps:$4 sm:$0xff] (!%p1039_p10)   ;;  %777 = vmatpush1.bf16.msra.mxu0 (!%p1039_p10), %v1216_v26 }
 0x16c   : > { %v517_v40 = vmax.f32 %v467_v34, 0.0  ;;  %v532_v41 = vadd.f32 %v531_v33, %v516_v32  ;;  %v470_v42 = vadd.f32 %v1020_v11, %v469_v37  ;;  %v525_v63 = vmax.f32 %v499_v58, 0.0  ;;  %v1223_v31 = vld [vmem:[#allocation7 + $0x48] ss:$16 sps:$4 sm:$0xff] (!%p1039_p10)   ;;  %v1224_v32 = vld [vmem:[#allocation7 + $0x64] ss:$16 sps:$4 sm:$0xff] (!%p1039_p10)   ;;  %778 = vmatprep.subr.bf16.mxu0 (!%p1039_p10), %v1218_v28 }
 0x16d   : > { %v520_v49 = vmax.f32 %v478_v44, 0.0  ;;  %v502_v0 = vadd.f32 %v1020_v11, %v501_v38  ;;  %v528_v8 = vmax.f32 %v510_v4, 0.0  ;;  %v1208_v11 = vld [vmem:[#allocation7 + $0xc] ss:$16 sps:$4 sm:$0xff] (!%p1039_p10)   ;;  %v1228_v34 = vld [vmem:[#allocation7 + $0x60] ss:$16 sps:$4 sm:$0xff] (!%p1039_p10)  }
 0x16e   : > { %v533_v43 = vadd.f32 %v532_v41, %v517_v40  ;;  %v518_v45 = vmax.f32 %v470_v42, 0.0  ;;  %815 = vmatprep.subr.bf16.mxu1 (!%p1039_p10), %v1208_v11  ;;  %v1226_v33 = vld [vmem:[#allocation7 + $0x6c] ss:$16 sps:$4 sm:$0xff] (!%p1039_p10)   ;;  %v1229_v35 = vld [vmem:[#allocation7 + $0x68] ss:$16 sps:$4 sm:$0xff] (!%p1039_p10)  }
 0x16f   : > { %v526_v5 = vmax.f32 %v502_v0, 0.0  ;;  %816 = vmatpush1.bf16.msra.mxu1 (!%p1039_p10), %v1211_v23  ;;  %779 = vmatpush1.bf16.msra.mxu0 (!%p1039_p10), %v1222_v30  ;;  %v1230_v36 = vld [vmem:[#allocation7 + $0x84] ss:$16 sps:$4 sm:$0xff] (!%p1039_p10)   ;;  %v1232_v37 = vld [vmem:[#allocation7 + $0x8c] ss:$16 sps:$4 sm:$0xff] (!%p1039_p10)  }
 0x170   : > { %v534_v48 = vadd.f32 %v533_v43, %v518_v45  ;;  %817 = vmatprep.subr.bf16.mxu1 (!%p1039_p10), %v1214_v25  ;;  %780 = vmatprep.subr.bf16.mxu0 (!%p1039_p10), %v1224_v32  ;;  %v1234_v38 = vld [vmem:[#allocation7 + $0x80] ss:$16 sps:$4 sm:$0xff] (!%p1039_p10)   ;;  %v1235_v39 = vld [vmem:[#allocation7 + $0x88] ss:$16 sps:$4 sm:$0xff] (!%p1039_p10)   ;;  %v1236_v40 = vld [vmem:[#allocation7 + $0xa4] ss:$16 sps:$4 sm:$0xff] (!%p1039_p10)  }
 0x171   : > { %v1238_v41 = vld [vmem:[#allocation7 + $0xac] ss:$16 sps:$4 sm:$0xff] (!%p1039_p10)   ;;  %v1240_v42 = vld [vmem:[#allocation7 + $0xa0] ss:$16 sps:$4 sm:$0xff] (!%p1039_p10)   ;;  %v1241_v43 = vld [vmem:[#allocation7 + $0xa8] ss:$16 sps:$4 sm:$0xff] (!%p1039_p10)  }
 0x172   : > { %v535_v50 = vadd.f32 %v534_v48, %v519_v47  ;;  %v1242_v44 = vld [vmem:[#allocation7 + $0xc4] ss:$16 sps:$4 sm:$0xff] (!%p1039_p10)   ;;  %v1244_v45 = vld [vmem:[#allocation7 + $0xcc] ss:$16 sps:$4 sm:$0xff] (!%p1039_p10)   ;;  %v1247_v47 = vld [vmem:[#allocation7 + $0xc8] ss:$16 sps:$4 sm:$0xff] (!%p1039_p10)  }
 0x173   : > { %818 = vmatpush1.bf16.msra.mxu1 (!%p1039_p10), %v1217_v27  ;;  %781 = vmatpush1.bf16.msra.mxu0 (!%p1039_p10), %v1228_v34 }
 0x174   : > { %v536_v54 = vadd.f32 %v535_v50, %v520_v49  ;;  %819 = vmatprep.subr.bf16.mxu1 (!%p1039_p10), %v1220_v29  ;;  %782 = vmatprep.subr.bf16.mxu0 (!%p1039_p10), %v1230_v36  ;;  %v1248_v49 = vld [vmem:[#allocation7 + $0xe4] ss:$16 sps:$4 sm:$0xff] (!%p1039_p10)   ;;  %v1250_v50 = vld [vmem:[#allocation7 + $0xec] ss:$16 sps:$4 sm:$0xff] (!%p1039_p10)  }
 0x176   : > { %v537_v55 = vadd.f32 %v536_v54, %v521_v51 }
 0x177   : > { %820 = vmatpush1.bf16.msra.mxu1 (!%p1039_p10), %v1223_v31  ;;  %783 = vmatpush1.bf16.msra.mxu0 (!%p1039_p10), %v1234_v38 }
 0x178   : > { %v538_v60 = vadd.f32 %v537_v55, %v522_v57  ;;  %821 = vmatprep.subr.bf16.mxu1 (!%p1039_p10), %v1226_v33  ;;  %784 = vmatprep.subr.bf16.mxu0 (!%p1039_p10), %v1236_v40  ;;  %v754_v55 = vlaneseq (!%p1039_p10) }
 0x17a   : > { %v539_v62 = vadd.f32 %v538_v60, %v523_v59  ;;  %v755_v56 = vshrl.u32 (!%p1039_p10), %v754_v55, 7  ;;  %v591_v59 = vld [vmem:[#allocation8] sm:$0xf] (!%p1039_p10)  ;;  %vm887_vm1 = vcmp.lt.s32.totalorder (!%p1039_p10), %v754_v55, 512 }
 0x17b   : > { %822 = vmatpush1.bf16.msra.mxu1 (!%p1039_p10), %v1229_v35  ;;  %785 = vmatpush1.bf16.msra.mxu0 (!%p1039_p10), %v1240_v42 }
 0x17c   : > { %v540_v2 = vadd.f32 %v539_v62, %v524_v61  ;;  %823 = vmatprep.subr.bf16.mxu1 (!%p1039_p10), %v1232_v37  ;;  %786 = vmatprep.subr.bf16.mxu0 (!%p1039_p10), %v1242_v44  ;;  %v756_v57 = vsub.s32 (!%p1039_p10), 0, %v755_v56  ;;  %v764_v58 = vsub.s32 (!%p1039_p10), 2, %v755_v56  ;;  %v760_v60 = vsub.s32 (!%p1039_p10), 1, %v755_v56 }
 0x17d   : > { %v1428_v61 = vmov (!%p1039_p10), 1966171168  }
 0x17e   : > { %v541_v3 = vadd.f32 %v540_v2, %v525_v63  ;;  %v863_v62 = vunpack.c.l.s4 (!%p1039_p10), %v1428_v61  ;;  %v768_v63 = vsub.s32 (!%p1039_p10), 3, %v755_v56  ;;  %v757_v0 = vrot.slane (!%p1039_p10), %v591_v59, %v756_v57 }
 0x17f   : > { %824 = vmatpush1.bf16.msra.mxu1 (!%p1039_p10), %v1235_v39  ;;  %787 = vmatpush1.bf16.msra.mxu0 (!%p1039_p10), %v1246_v46  ;;  %v765_v1 = vrot.slane (!%p1039_p10), %v591_v59, %v764_v58  ;;  %v761_v2 = vrot.slane (!%p1039_p10), %v591_v59, %v760_v60 }
 0x180   : > { %v542_v7 = vadd.f32 %v541_v3, %v526_v5  ;;  %825 = vmatprep.subr.bf16.mxu1 (!%p1039_p10), %v1238_v41  ;;  %788 = vmatprep.subr.bf16.mxu0 (!%p1039_p10), %v1248_v49  ;;  %v864_v3 = vunpack.c.0.s8 (!%p1039_p10), %v863_v62  ;;  %v769_v4 = vrot.slane (!%p1039_p10), %v591_v59, %v768_v63 }
 0x182   : > { %v543_v9 = vadd.f32 %v542_v7, %v527_v6 }
 0x183   : > { %826 = vmatpush1.bf16.msra.mxu1 (!%p1039_p10), %v1241_v43  ;;  %789 = vmatpush1.bf16.msra.mxu0 (!%p1039_p10), %v1252_v52 }
 0x184   : > { %v544_v10 = vadd.f32 %v543_v9, %v528_v8  ;;  %827 = vmatprep.subr.bf16.mxu1 (!%p1039_p10), %v1244_v45 }
 0x186   : > { %v545_v12 = vrot.slane %v544_v10, 4 }
 0x187   : > { %828 = vmatpush1.bf16.msra.mxu1 (!%p1039_p10), %v1247_v47 }
 0x188   : > { %v546_v13 = vadd.f32 %v545_v12, %v544_v10  ;;  %829 = vmatprep.subr.bf16.mxu1 (!%p1039_p10), %v1250_v50 }
 0x18a   : > { %v547_v14 = vrot.slane %v546_v13, 2 }
 0x18b   : > { %830 = vmatpush1.bf16.msra.mxu1 (!%p1039_p10), %v1253_v53 }
 0x18c   : > { %v548_v15 = vadd.f32 %v547_v14, %v546_v13  ;;  %v867_v13 = vsub.s32 (!%p1039_p10), %v864_v3, %v755_v56 }
 0x18e   : > { %v549_v16 = vrot.slane %v548_v15, 1  ;;  %556 = sbr.rel (%p1039_p10) target bundleno = 640 (0x280), region = 64 }
 0x190   : > { %v550_v18 = vadd.f32 %v549_v16, %v548_v15 }
 0x192   : > { %v551_v19 = vadd.f32 %v550_v18, %v529_v17 }
 0x194   : > { %552 = vst [vmem:[#allocation2] sm:$0x1] %v551_v19 }
 0x19b   : > { %v557_v48 = vld [vmem:[#allocation2] sm:$0x1] }
 0x19c   : > { %v558_v51 = vmul.f32 0.00390625, %v557_v48 }
 0x19e   : > { %v592_v54 = vpack.c.bf16 %v558_v51, %v558_v51 }
 0x1a0   : > { %807 = vmatmul.mubr.bf16.vlgmr.msra.gmra.mrb[0].mxu0 %v592_v54  ;;  %848 = vmatmul.mubr.bf16.vlgmr.msra.gmra.mrb[0].mxu1 %v592_v54 }
 0x273   : > { %v808_v5 = vpop.f32.mrb[0].mxu0  ;;  %v849_v6 = vpop.f32.mrb[0].mxu1 }
 0x274   : > { %v809_v7 = vadd.f32 %v808_v5, %v757_v0  ;;  %v850_v8 = vadd.f32 %v849_v6, %v765_v1  ;;  %v810_v9 = vpop.f32.mrb[1].mxu0  ;;  %v851_v10 = vpop.f32.mrb[1].mxu1 }
 0x275   : > { %v811_v12 = vadd.f32 %v810_v9, %v761_v2  ;;  %v852_v14 = vadd.f32 %v851_v10, %v769_v4  ;;  %v812_v15 = vpop.f32.mrb[2].mxu0  ;;  %v853_v16 = vpop.f32.mrb[2].mxu1 }
 0x276   : > { %v813_v17 = vpop.f32.mrb[3].mxu0  ;;  %v854_v18 = vpop.f32.mrb[3].mxu1 }
 0x277   : > { %v860_v19 = vcombine.low %v809_v7, %v811_v12  ;;  %v861_v20 = vcombine.low %v850_v8, %v852_v14 }
 0x279   : > { %v868_v11 = vrot.slane %v860_v19, %v867_v13  ;;  %v875_v21 = vrot.slane %v861_v20, %v867_v13 }
 0x27b   : > { %v876_v22 = vcombine.low %v868_v11, %v875_v21 }
 0x27d   : > { %v883_v23 = vrot.slane %v876_v22, %v867_v13 }
 0x27f   : > { %889 = vst.msk [vmem:[%s1616_s8] sm:$0xf] %vm887_vm1, %v883_v23 }
 0x280 PF: > { %s18_s22 = sadd.s32 1, %s1416_s22   ;;  %s1665_s18 = smov %s1408_s20 }
 0x281   : > { %p15_p11 = scmp.ge.s32.totalorder %s18_s22, 6   ;;  %s1666_s19 = smov %s1412_s21 }
 0x282   : > { %s1667_s20 = smov %s1670_s29  ;;  %s1668_s21 = smov %s1674_s23 }
 0x283   :  { %17 = sbr.rel (!%p15_p11) target bundleno = 5 (0x5), region = 95 }
 0x28a   :  { %909 = vsyncpa [#allocation4], 1 }
 0x28b   :  { %911 = vsyncpa [#allocation4 + $0x1], 1 }
 0x28c   :  { %912 = vsyncpa [#allocation6], 1 }
 0x28d   :  { %913 = vsyncpa [#allocation9], 1 }

// kernel: coilicra_forward.3
= control target key start
LH: loop header
LB: loop body
LE: loop exit
PB: predicated region body
PF: predicated region fallthrough
CT: control target
= control target key end

     0   :  { %s11867_s6 = smov 1   ;;  %s11868_s10 = smov 2   ;;  %s13162_s0 = inlined_call_operand.smem [shape: u32[30], index: -1, kind: input, shape index: {}] }
   0x1   :  { %s11937_s5 = sld [smem:[%s13162_s0]]   ;;  %s11869_s14 = smov 3  }
   0x2   :  { %s11942_s9 = sld [smem:[%s13162_s0 + %s11867_s6]]   ;;  %s11870_s18 = smov 4  }
   0x3   :  { %s11947_s13 = sld [smem:[%s13162_s0 + %s11868_s10]]   ;;  %s11871_s22 = smov 5  }
   0x4   :  { %s11952_s17 = sld [smem:[%s13162_s0 + %s11869_s14]]   ;;  %s11872_s26 = smov 6  }
   0x5   :  { %s11957_s21 = sld [smem:[%s13162_s0 + %s11870_s18]]   ;;  %s11873_s30 = smov 7  }
   0x6   :  { %s11962_s25 = sld [smem:[%s13162_s0 + %s11871_s22]]   ;;  %s11874_s4 = smov 8  }
   0x7   :  { %13205 = sst [smem:[#allocation43_spill]] %s11937_s5  ;;  %s11875_s10 = smov 9  }
   0x8   :  { %13206 = sst [smem:[#allocation44_spill]] %s11942_s9  ;;  %s11876_s15 = smov 10  }
   0x9   :  { %s11967_s29 = sld [smem:[%s13162_s0 + %s11872_s26]]   ;;  %s11877_s20 = smov 11  }
   0xa   :  { %s11972_s3 = sld [smem:[%s13162_s0 + %s11873_s30]]   ;;  %s11878_s26 = smov 12  }
   0xb   :  { %s11977_s8 = sld [smem:[%s13162_s0 + %s11874_s4]]   ;;  %s11879_s1 = smov 13  }
   0xc   :  { %s11982_s14 = sld [smem:[%s13162_s0 + %s11875_s10]]   ;;  %s11880_s7 = smov 14  }
   0xd   :  { %s11987_s19 = sld [smem:[%s13162_s0 + %s11876_s15]]   ;;  %s11881_s15 = smov 15  }
   0xe   :  { %s11992_s24 = sld [smem:[%s13162_s0 + %s11877_s20]]   ;;  %s11882_s22 = smov 16  }
   0xf   :  { %s11997_s30 = sld [smem:[%s13162_s0 + %s11878_s26]]   ;;  %s11883_s28 = smov 17  }
  0x10   :  { %13207 = sst [smem:[#allocation45_spill]] %s11972_s3  ;;  %s11884_s10 = smov 18  }
  0x11   :  { %13208 = sst [smem:[#allocation46_spill]] %s11977_s8  ;;  %s11889_s16 = smov 24  }
  0x12   :  { %s12002_s6 = sld [smem:[%s13162_s0 + %s11879_s1]]  }
  0x13   :  { %s8629_s12 = sld [smem:[%s13162_s0 + %s11880_s7]]  }
  0x14   :  { %13209 = sst [smem:[#allocation47_spill]] %s11992_s24 }
  0x15   :  { %s12010_s20 = sld [smem:[%s13162_s0 + %s11881_s15]]   ;;  %s11885_s15 = smov 19  }
  0x16   :  { %s12015_s27 = sld [smem:[%s13162_s0 + %s11882_s22]]   ;;  %s11886_s22 = smov 21  }
  0x17   :  { %s12020_s4 = sld [smem:[%s13162_s0 + %s11883_s28]]   ;;  %s11887_s28 = smov 22  }
  0x18   :  { %13210 = sst [smem:[#allocation48_spill]] %s12002_s6 }
  0x19   :  { %s12025_s6 = sld [smem:[%s13162_s0 + %s11884_s10]]   ;;  %v65_v0 = vstv %s8629_s12  ;;  %s11888_s10 = smov 23  }
  0x1a   :  { %s12030_s5 = sld [smem:[%s13162_s0 + %s11885_s15]]   ;;  %66 = vst [vmem:[#allocation3] sm:$0x1] %v65_v0  ;;  %s11890_s12 = smov 25  }
  0x1b   :  { %13211 = sst [smem:[#allocation49_spill]] %s12010_s20 }
  0x1c   :  { %s12035_s20 = sld [smem:[%s13162_s0 + %s11886_s22]]  }
  0x1d   :  { %13212 = sst [smem:[#allocation50_spill]] %s12020_s4  ;;  %s11895_s4 = smov 20  }
  0x1e   :  { %s12040_s7 = sld [smem:[%s13162_s0 + %s11887_s28]]   ;;  %s11891_s28 = smov 26  }
  0x1f   :  { %13213 = sst [smem:[#allocation51_spill]] %s12025_s6  ;;  %s11892_s6 = smov 27  }
  0x20   :  { %13214 = sst [smem:[#allocation52_spill]] %s12030_s5  ;;  %s11893_s5 = smov 28  }
  0x21   :  { %s12045_s15 = sld [smem:[%s13162_s0 + %s11888_s10]]  }
  0x22   :  { %s12050_s22 = sld [smem:[%s13162_s0 + %s11889_s16]]  }
  0x23   :  { %s12055_s1 = sld [smem:[%s13162_s0 + %s11890_s12]]   ;;  %s11894_s12 = smov 29  }
  0x24   :  { %13215 = sst [smem:[#allocation53_spill]] %s12040_s7 }
  0x25   :  { %s12060_s24 = sld [smem:[%s13162_s0 + %s11891_s28]]  }
  0x27   :  { %13216 = sst [smem:[#allocation54_spill]] %s12045_s15 }
  0x28   :  { %13217 = sst [smem:[#allocation55_spill]] %s12050_s22 }
  0x29   :  { %13218 = sst [smem:[#allocation56_spill]] %s12055_s1 }
  0x2a   :  { %s12065_s15 = sld [smem:[%s13162_s0 + %s11892_s6]]  }
  0x2b   :  { %13219 = sst [smem:[#allocation57_spill]] %s12060_s24 }
  0x2c   :  { %s12070_s22 = sld [smem:[%s13162_s0 + %s11893_s5]]  }
  0x2d   :  { %s12075_s1 = sld [smem:[%s13162_s0 + %s11894_s12]]  }
  0x2e   :  { %s8635_s24 = sld [smem:[%s13162_s0 + %s11895_s4]]  }
  0x30   :  { %13220 = sst [smem:[#allocation58_spill]] %s12065_s15 }
  0x32   :  { %13221 = sst [smem:[#allocation59_spill]] %s12070_s22 }
  0x33   :  { %13222 = sst [smem:[#allocation60_spill]] %s12075_s1 }
  0x34   :  { %v67_v1 = vstv %s8635_s24 }
  0x35   :  { %68 = vst [vmem:[#allocation4] sm:$0x1] %v67_v1 }
  0x36   :  { %69 = vsyncpa [#allocation6], 0 }
  0x37   :  { %70 = vsyncpa [#allocation8], 0 }
  0x38   :  { %71 = vsyncpa [#allocation11], 0 }
  0x39   :  { %72 = vsyncpa [#allocation14], 0 }
  0x3a   :  { %73 = vsyncpa [#allocation17], 0 }
  0x3b   :  { %74 = vsyncpa [#allocation20], 0 }
  0x3c   :  { %75 = vsyncpa [#allocation23], 0 }
  0x3d   :  { %76 = vsyncpa [#allocation26], 0 }
  0x3e   :  { %77 = vsyncpa [#allocation29], 0  ;;  %s12080_s6 = smov 0   ;;  %s12082_s10 = smov 0  }
  0x3f   :  { %s12084_s11 = smov 0   ;;  %s12086_s5 = smov 0  }
  0x40 LB: > { %s13223_s3 = sld [smem:[#allocation45_spill]]  ;;  %s13224_s8 = sld [smem:[#allocation46_spill]]  ;;  %s11865_s5 = sphi %s12086_s5, %s13290_s5   ;;  %s11861_s11 = sphi %s12084_s11, %s13294_s11   ;;  %s11857_s10 = sphi %s12082_s10, %s13293_s10   ;;  %s11853_s6 = sphi %s12080_s6, %s13291_s6  }
  0x41   : > { %s13225_s7 = sld [smem:[#allocation53_spill]]  ;;  %s13226_s9 = sld [smem:[#allocation44_spill]] }
  0x42   : > { %13227 = sst [smem:[#allocation61_spill]] %s11857_s10  ;;  %s11896_s0 = smov [#allocation5]  }
  0x43   : > { %s769_s24 = sshll.u32 %s11896_s0, 4  ;;  %s12101_s16 = sadd.s32 4294967295, %s11865_s5   ;;  %s770_s24 = int_to_ptr.vmem [resolvable:$true] %s769_s24 }
  0x44   : > { %p8647_p0 = scmp.ge.s32.totalorder %s11865_s5, 1  ;;  %p13170_p1 = scmp.eq.s32.totalorder %s12101_s16, 0 }
  0x45   : > { %p753_p2 = scmp.lt.s32.totalorder %s11865_s5, 4  ;;  %s12120_s23 = sadd.s32 1, %s11865_s5  }
  0x46   : > { %13230 = sst [smem:[#allocation62_spill]] %s12120_s23  ;;  %s531_s26 = sadd.s32 1, %s11861_s11 }
  0x47   : > { %p12107_p4 = pnand %p8647_p0, %p753_p2  ;;  %s528_s4 = ssub.s32 %s11865_s5, %s12120_s23 }
  0x48   : > { %s11257_s28 = scalar_lea.hbm %s13226_s9, 32 }
  0x49   : > { %s13228_s18 = scalar_select %p12107_p4, 1, 0 }
  0x4a   : > { %p9843_p5 = pneg %p12107_p4  ;;  %p11258_p7 = scmp.ne.s32.totalorder %s13226_s9, %s11257_s28 }
  0x4b   : > { %p11264_p11 = scmp.lt.u32.totalorder %s11257_s28, %s13226_s9 }
  0x4c   : > { %p12115_p6 = pnand %p9843_p5, %p13170_p1 }
  0x4e   : > { %s13229_s12 = scalar_select %p12115_p6, 1, 0 }
  0x4f   : > { %p12129_p8 = pneg %p12115_p6 }
  0x51   : > { %s13231_s2 = scalar_select %p12129_p8, 1, 0 }
  0x52   : > { %p11260_p9 = pnand %p12129_p8, %p11258_p7 }
  0x54   : > { %p11261_p10 = pneg %p11260_p9 }
  0x56   : > { %p11266_p12 = pnand %p11264_p11, %p11261_p10 }
  0x58   : > { %11269 = shalt.err (!%p11266_p12)
}
  0x59   : > { %s11270_s0 = scalar_lea.vmem %s770_s24, 32  ;;  %p11278_p5 = scmp.lt.s32.totalorder %s770_s24, %s770_s24 }
  0x5a   : > { %p11271_p13 = scmp.ne.s32.totalorder %s770_s24, %s11270_s0  ;;  %p11279_p3 = scmp.lt.s32.totalorder %s11270_s0, %s11270_s0 }
  0x5c   : > { %p11273_p0 = pnand %p11271_p13, %p12129_p8  ;;  %p11280_p1 = por %p11279_p3, %p11278_p5 }
  0x5e   : > { %p11274_p2 = pneg %p11273_p0 }
  0x60   : > { %p11281_p4 = pnand %p11280_p1, %p11274_p2 }
  0x62   : > { %11284 = shalt.err (!%p11281_p4)
}
  0x63   : > { %9846 = dma.hbm_to_vmem [thread:$0]  (!%p12115_p6), %s13226_s9, 32, %s770_s24, [#allocation6]  }
  0x64   : > { %p529_p3 = scmp.eq.s32.totalorder %s528_s4, 0  ;;  %p538_p1 = scmp.ne.s32.totalorder %s11861_s11, %s11857_s10 }
  0x65   : > { %p539_p4 = scmp.eq.s32.totalorder %s11865_s5, 0  ;;  %p544_p7 = scmp.ne.s32.totalorder %s11857_s10, %s11853_s6 }
  0x66   : > { %s12147_s28 = scalar_select %p529_p3, %s11861_s11, %s531_s26  }
  0x67   : > { %p540_p9 = por %p539_p4, %p538_p1  ;;  %p13233_p10 = scmp.eq.s32.totalorder %s12101_s16, 0 }
  0x68   : > { %13232 = sst [smem:[#allocation63_spill]] %s12147_s28  ;;  %p9918_p12 = scmp.lt.s32.totalorder %s11865_s5, 3 }
  0x69   : > { %p12151_p11 = por %p13233_p10, %p544_p7  ;;  %s973_s23 = sand.u32 1, %s11865_s5  }
  0x6a   : > { %s13175_s22 = sand.u32 1, %s11861_s11   ;;  %s9561_s24 = sshll.u32 %s11865_s5, 15 }
  0x6b   : > { %s13234_s0 = scalar_select %p12151_p11, 1, 0 }
  0x6c   : > { %s8665_s15 = sshll.u32 %s13175_s22, 11  ;;  %s12162_s4 = scalar_lea.hbm %s12035_s20, %s9561_s24 }
  0x6d   : > { %13235 = sst [smem:[#allocation64_spill]] %s13234_s0  ;;  %s977_s6 = scalar_lea.vmem [#allocation30], %s8665_s15 }
  0x6e   : > { %s985_s26 = sshll.u32 %s977_s6, 4  ;;  %p12164_p13 = pnand %p9918_p12, %p540_p9  ;;  %s12168_s26 = int_to_ptr.vmem [resolvable:$true] %s985_s26 }
  0x6f   : > { %s11897_s28 = smov [#allocation7]   ;;  %s12172_s22 = scalar_lea.sflag [#allocation6], %s973_s23 }
  0x70   : > { %s13236_s9 = scalar_select %p12164_p13, 1, 0 }
  0x71   : > { %s12170_s1 = sshll.u32 %s11897_s28, 4  ;;  %s11285_s24 = scalar_lea.hbm %s12162_s4, 32768  ;;  %s780_s1 = int_to_ptr.vmem [resolvable:$true] %s12170_s1 }
  0x72   : > { %p11286_p0 = scmp.ne.s32.totalorder %s12162_s4, %s11285_s24  ;;  %p12178_p2 = pneg %p12164_p13 }
  0x73   : > { %s11290_s15 = scalar_lea.hbm %s12035_s20, 98304  ;;  %p11291_p1 = scmp.lt.u32.totalorder %s12162_s4, %s12035_s20 }
  0x74   : > { %s13237_s0 = scalar_select %p12178_p2, 1, 0 }
  0x75   : > { %p11288_p5 = pnand %p12178_p2, %p11286_p0  ;;  %p11292_p4 = scmp.lt.u32.totalorder %s11290_s15, %s11285_s24 }
  0x76   : > { %p11294_p9 = scmp.lt.u32.totalorder %s11285_s24, %s12162_s4 }
  0x77   : > { %p11289_p3 = pneg %p11288_p5  ;;  %p11293_p7 = por %p11292_p4, %p11291_p1 }
  0x79   : > { %p11295_p10 = por %p11294_p9, %p11293_p7 }
  0x7b   : > { %p11296_p12 = pnand %p11295_p10, %p11289_p3 }
  0x7d   : > { %11299 = shalt.err (!%p11296_p12)
}
  0x7e   : > { %s11300_s23 = scalar_lea.vmem %s12168_s26, 32768  ;;  %s11898_s28 = smov [#allocation30]  }
  0x7f   : > { %p11301_p11 = scmp.ne.s32.totalorder %s12168_s26, %s11300_s23  ;;  %s11305_s6 = sshll.u32 %s11898_s28, 4  ;;  %s11306_s6 = int_to_ptr.vmem [resolvable:$false] %s11305_s6 }
  0x80   : > { %s11307_s10 = scalar_lea.vmem %s11306_s6, 65536  ;;  %p11308_p0 = scmp.lt.s32.totalorder %s12168_s26, %s11306_s6 }
  0x81   : > { %p11303_p6 = pnand %p11301_p11, %p12178_p2  ;;  %p11309_p5 = scmp.lt.s32.totalorder %s11307_s10, %s11300_s23 }
  0x83   : > { %p11304_p8 = pneg %p11303_p6  ;;  %p11310_p1 = por %p11309_p5, %p11308_p0 }
  0x85   : > { %p11311_p4 = pnand %p11310_p1, %p11304_p8 }
  0x87   : > { %11314 = shalt.err (!%p11311_p4)
}
  0x88   : > { %s13186_s24 = smov 128   ;;  %s13188_s15 = smov 8  }
  0x89   : > { %9895 = dma.hbm_to_vmem [thread:$0]  (!%p12164_p13), %s12162_s4, 32768, %s12168_s26, %s12172_s22, %s13186_s24, %s13186_s24, %s13188_s15  }
  0x8a   : > { %s11315_s10 = scalar_lea.hbm %s11947_s13, 128  ;;  %p13238_p8 = scmp.ne.s32.totalorder %s13231_s2, 0 }
  0x8b   : > { %p11316_p6 = scmp.ne.s32.totalorder %s11947_s13, %s11315_s10  ;;  %p11322_p7 = scmp.lt.u32.totalorder %s11315_s10, %s11947_s13 }
  0x8d   : > { %p11318_p11 = pnand %p11316_p6, %p13238_p8 }
  0x8f   : > { %p11319_p3 = pneg %p11318_p11 }
  0x91   : > { %p11324_p9 = pnand %p11322_p7, %p11319_p3 }
  0x93   : > { %11327 = shalt.err (!%p11324_p9)
}
  0x94   : > { %s11328_s23 = scalar_lea.vmem %s780_s1, 128  ;;  %p11336_p5 = scmp.lt.s32.totalorder %s780_s1, %s780_s1 }
  0x95   : > { %p11329_p10 = scmp.ne.s32.totalorder %s780_s1, %s11328_s23  ;;  %p11337_p1 = scmp.lt.s32.totalorder %s11328_s23, %s11328_s23 }
  0x97   : > { %p11331_p12 = pnand %p11329_p10, %p13238_p8  ;;  %p11338_p4 = por %p11337_p1, %p11336_p5 }
  0x99   : > { %p11332_p0 = pneg %p11331_p12 }
  0x9b   : > { %p11339_p2 = pnand %p11338_p4, %p11332_p0 }
  0x9d   : > { %11342 = shalt.err (!%p11339_p2)
}
  0x9e   : > { %s11901_s4 = smov 64   ;;  %s11902_s26 = smov 4  }
  0x9f   : > { %p13239_p6 = scmp.ne.s32.totalorder %s13229_s12, 0  ;;  %s11903_s28 = smov [#allocation10]  }
  0xa0   : > { %s803_s6 = sshll.u32 %s11903_s28, 4  ;;  %s11904_s10 = smov [#allocation13]   ;;  %s804_s6 = int_to_ptr.vmem [resolvable:$true] %s803_s6 }
  0xa1   : > { %9849 = dma.hbm_to_vmem [thread:$0]  (!%p13239_p6), %s11947_s13, 128, %s780_s1, [#allocation8], %s11901_s4, %s11901_s4, %s11902_s26  }
  0xa2   : > { %s827_s24 = sshll.u32 %s11904_s10, 4  ;;  %s11343_s15 = scalar_lea.hbm %s11957_s21, 1024  ;;  %s828_s24 = int_to_ptr.vmem [resolvable:$true] %s827_s24 }
  0xa3   : > { %p11344_p11 = scmp.ne.s32.totalorder %s11957_s21, %s11343_s15  ;;  %p11350_p7 = scmp.lt.u32.totalorder %s11343_s15, %s11957_s21 }
  0xa5   : > { %p11346_p3 = pnand %p11344_p11, %p13238_p8 }
  0xa7   : > { %p11347_p2 = pneg %p11346_p3 }
  0xa9   : > { %p11352_p9 = pnand %p11350_p7, %p11347_p2 }
  0xab   : > { %11355 = shalt.err (!%p11352_p9)
}
  0xac   : > { %s11356_s23 = scalar_lea.vmem %s804_s6, 1024  ;;  %p11364_p5 = scmp.lt.s32.totalorder %s804_s6, %s804_s6 }
  0xad   : > { %p11357_p10 = scmp.ne.s32.totalorder %s804_s6, %s11356_s23  ;;  %p11365_p1 = scmp.lt.s32.totalorder %s11356_s23, %s11356_s23 }
  0xaf   : > { %p11359_p12 = pnand %p11357_p10, %p13238_p8  ;;  %p11366_p4 = por %p11365_p1, %p11364_p5 }
  0xb1   : > { %p11360_p0 = pneg %p11359_p12 }
  0xb3   : > { %p11367_p13 = pnand %p11366_p4, %p11360_p0 }
  0xb5   : > { %11370 = shalt.err (!%p11367_p13)
}
  0xb6   : > { %9855 = dma.hbm_to_vmem [thread:$0]  (!%p13239_p6), %s11957_s21, 1024, %s804_s6, [#allocation11], %s11901_s4, %s11901_s4, %s11902_s26  }
  0xb7   : > { %s11371_s1 = scalar_lea.hbm %s11967_s29, 16384 }
  0xb8   : > { %p11372_p11 = scmp.ne.s32.totalorder %s11967_s29, %s11371_s1  ;;  %p11378_p7 = scmp.lt.u32.totalorder %s11371_s1, %s11967_s29 }
  0xba   : > { %p11374_p3 = pnand %p11372_p11, %p13238_p8 }
  0xbc   : > { %p11375_p2 = pneg %p11374_p3 }
  0xbe   : > { %p11380_p9 = pnand %p11378_p7, %p11375_p2 }
  0xc0   : > { %11383 = shalt.err (!%p11380_p9)
}
  0xc1   : > { %s11384_s15 = scalar_lea.vmem %s828_s24, 16384  ;;  %p11392_p0 = scmp.lt.s32.totalorder %s828_s24, %s828_s24 }
  0xc2   : > { %p11385_p13 = scmp.ne.s32.totalorder %s828_s24, %s11384_s15  ;;  %p11393_p5 = scmp.lt.s32.totalorder %s11384_s15, %s11384_s15 }
  0xc4   : > { %p11387_p10 = pnand %p11385_p13, %p13238_p8  ;;  %p11394_p1 = por %p11393_p5, %p11392_p0 }
  0xc6   : > { %p11388_p12 = pneg %p11387_p10 }
  0xc8   : > { %p11395_p4 = pnand %p11394_p1, %p11388_p12 }
  0xca   : > { %11398 = shalt.err (!%p11395_p4)
}
  0xcb   : > { %s13192_s4 = smov 256   ;;  %s13195_s26 = smov 16  }
  0xcc   : > { %9861 = dma.hbm_to_vmem [thread:$0]  (!%p13239_p6), %s11967_s29, 16384, %s828_s24, [#allocation14], %s13192_s4, %s13192_s4, %s13195_s26  }
  0xcd   : > { %s11907_s28 = smov [#allocation16]   ;;  %s11908_s10 = smov [#allocation19]  }
  0xce   : > { %s854_s6 = sshll.u32 %s11907_s28, 4  ;;  %s878_s23 = sshll.u32 %s11908_s10, 4  ;;  %s855_s6 = int_to_ptr.vmem [resolvable:$true] %s854_s6  ;;  %s879_s23 = int_to_ptr.vmem [resolvable:$true] %s878_s23 }
  0xcf   : > { %s11399_s1 = scalar_lea.hbm %s13224_s8, 64 }
  0xd0   : > { %p11400_p11 = scmp.ne.s32.totalorder %s13224_s8, %s11399_s1  ;;  %p11406_p7 = scmp.lt.u32.totalorder %s11399_s1, %s13224_s8 }
  0xd2   : > { %p11402_p3 = pnand %p11400_p11, %p13238_p8 }
  0xd4   : > { %p11403_p2 = pneg %p11402_p3 }
  0xd6   : > { %p11408_p9 = pnand %p11406_p7, %p11403_p2 }
  0xd8   : > { %11411 = shalt.err (!%p11408_p9)
}
  0xd9   : > { %s11412_s15 = scalar_lea.vmem %s855_s6, 64  ;;  %p11420_p0 = scmp.lt.s32.totalorder %s855_s6, %s855_s6 }
  0xda   : > { %p11413_p13 = scmp.ne.s32.totalorder %s855_s6, %s11412_s15  ;;  %p11421_p5 = scmp.lt.s32.totalorder %s11412_s15, %s11412_s15 }
  0xdc   : > { %p11415_p10 = pnand %p11413_p13, %p13238_p8  ;;  %p11422_p1 = por %p11421_p5, %p11420_p0 }
  0xde   : > { %p11416_p12 = pneg %p11415_p10 }
  0xe0   : > { %p11423_p4 = pnand %p11422_p1, %p11416_p12 }
  0xe2   : > { %11426 = shalt.err (!%p11423_p4)
}
  0xe3   : > { %9867 = dma.hbm_to_vmem [thread:$0]  (!%p13239_p6), %s13224_s8, 64, %s855_s6, [#allocation17]  }
  0xe4   : > { %s11427_s24 = scalar_lea.hbm %s11987_s19, 32 }
  0xe5   : > { %p11428_p11 = scmp.ne.s32.totalorder %s11987_s19, %s11427_s24  ;;  %p11434_p7 = scmp.lt.u32.totalorder %s11427_s24, %s11987_s19 }
  0xe7   : > { %p11430_p3 = pnand %p11428_p11, %p13238_p8 }
  0xe9   : > { %p11431_p2 = pneg %p11430_p3 }
  0xeb   : > { %p11436_p9 = pnand %p11434_p7, %p11431_p2 }
  0xed   : > { %11439 = shalt.err (!%p11436_p9)
}
  0xee   : > { %s11440_s28 = scalar_lea.vmem %s879_s23, 32  ;;  %p11448_p0 = scmp.lt.s32.totalorder %s879_s23, %s879_s23 }
  0xef   : > { %p11441_p13 = scmp.ne.s32.totalorder %s879_s23, %s11440_s28  ;;  %p11449_p5 = scmp.lt.s32.totalorder %s11440_s28, %s11440_s28 }
  0xf1   : > { %p11443_p10 = pnand %p11441_p13, %p13238_p8  ;;  %p11450_p1 = por %p11449_p5, %p11448_p0 }
  0xf3   : > { %p11444_p12 = pneg %p11443_p10 }
  0xf5   : > { %p11451_p4 = pnand %p11450_p1, %p11444_p12 }
  0xf7   : > { %11454 = shalt.err (!%p11451_p4)
}
  0xf8   : > { %9873 = dma.hbm_to_vmem [thread:$0]  (!%p13239_p6), %s11987_s19, 32, %s879_s23, [#allocation20]  }
  0xf9   : > { %s11909_s6 = smov [#allocation22]   ;;  %s11910_s1 = smov [#allocation25]  }
  0xfa   : > { %s902_s10 = sshll.u32 %s11909_s6, 4  ;;  %s932_s15 = sshll.u32 %s11910_s1, 4  ;;  %s903_s10 = int_to_ptr.vmem [resolvable:$true] %s902_s10  ;;  %s933_s15 = int_to_ptr.vmem [resolvable:$true] %s932_s15 }
  0xfb   : > { %s11455_s24 = scalar_lea.hbm %s11997_s30, 32 }
  0xfc   : > { %p11456_p11 = scmp.ne.s32.totalorder %s11997_s30, %s11455_s24  ;;  %p11462_p7 = scmp.lt.u32.totalorder %s11455_s24, %s11997_s30 }
  0xfe   : > { %p11458_p3 = pnand %p11456_p11, %p13238_p8 }
 0x100   : > { %p11459_p2 = pneg %p11458_p3 }
 0x102   : > { %p11464_p9 = pnand %p11462_p7, %p11459_p2 }
 0x104   : > { %11467 = shalt.err (!%p11464_p9)
}
 0x105   : > { %s11468_s28 = scalar_lea.vmem %s903_s10, 32  ;;  %p11476_p0 = scmp.lt.s32.totalorder %s903_s10, %s903_s10 }
 0x106   : > { %p11469_p13 = scmp.ne.s32.totalorder %s903_s10, %s11468_s28  ;;  %p11477_p5 = scmp.lt.s32.totalorder %s11468_s28, %s11468_s28 }
 0x108   : > { %p11471_p10 = pnand %p11469_p13, %p13238_p8  ;;  %p11478_p1 = por %p11477_p5, %p11476_p0 }
 0x10a   : > { %p11472_p12 = pneg %p11471_p10 }
 0x10c   : > { %p11479_p4 = pnand %p11478_p1, %p11472_p12 }
 0x10e   : > { %11482 = shalt.err (!%p11479_p4)
}
 0x10f   : > { %9879 = dma.hbm_to_vmem [thread:$0]  (!%p13239_p6), %s11997_s30, 32, %s903_s10, [#allocation23]  }
 0x110   : > { %s13240_s23 = sand.u32 1, %s11861_s11   ;;  %s11483_s1 = scalar_lea.hbm %s12015_s27, 32 }
 0x111   : > { %s12267_s6 = sshll.u32 %s13240_s23, 3  ;;  %p11484_p11 = scmp.ne.s32.totalorder %s12015_s27, %s11483_s1 }
 0x112   : > { %p11490_p7 = scmp.lt.u32.totalorder %s11483_s1, %s12015_s27 }
 0x113   : > { %p11486_p3 = pnand %p11484_p11, %p13238_p8 }
 0x115   : > { %p11487_p2 = pneg %p11486_p3 }
 0x117   : > { %p11492_p9 = pnand %p11490_p7, %p11487_p2 }
 0x119   : > { %11495 = shalt.err (!%p11492_p9)
}
 0x11a   : > { %s11496_s24 = scalar_lea.vmem %s933_s15, 32  ;;  %p11504_p0 = scmp.lt.s32.totalorder %s933_s15, %s933_s15 }
 0x11b   : > { %p11497_p13 = scmp.ne.s32.totalorder %s933_s15, %s11496_s24  ;;  %p11505_p5 = scmp.lt.s32.totalorder %s11496_s24, %s11496_s24 }
 0x11d   : > { %p11499_p10 = pnand %p11497_p13, %p13238_p8  ;;  %p11506_p1 = por %p11505_p5, %p11504_p0 }
 0x11f   : > { %p11500_p12 = pneg %p11499_p10 }
 0x121   : > { %p11507_p4 = pnand %p11506_p1, %p11500_p12 }
 0x123   : > { %11510 = shalt.err (!%p11507_p4)
}
 0x124   : > { %9885 = dma.hbm_to_vmem [thread:$0]  (!%p13239_p6), %s12015_s27, 32, %s933_s15, [#allocation26]  }
 0x125   : > { %s13194_s10 = sshll.u32 %s11865_s5, 7  ;;  %s999_s23 = scalar_lea.vmem [#allocation31], %s12267_s6 }
 0x126   : > { %s12283_s28 = scalar_lea.hbm %s13225_s7, %s13194_s10  ;;  %s1007_s1 = sshll.u32 %s999_s23, 4  ;;  %s12286_s1 = int_to_ptr.vmem [resolvable:$true] %s1007_s1 }
 0x127   : > { %s11511_s24 = scalar_lea.hbm %s12283_s28, 128  ;;  %p13241_p3 = scmp.ne.s32.totalorder %s13237_s0, 0 }
 0x128   : > { %p11512_p11 = scmp.ne.s32.totalorder %s12283_s28, %s11511_s24  ;;  %s11516_s4 = scalar_lea.hbm %s13225_s7, 384 }
 0x129   : > { %p11517_p9 = scmp.lt.u32.totalorder %s12283_s28, %s13225_s7  ;;  %p11518_p13 = scmp.lt.u32.totalorder %s11516_s4, %s11511_s24 }
 0x12a   : > { %p11514_p2 = pnand %p11512_p11, %p13241_p3  ;;  %p11520_p12 = scmp.lt.u32.totalorder %s11511_s24, %s12283_s28 }
 0x12b   : > { %p11519_p10 = por %p11518_p13, %p11517_p9 }
 0x12c   : > { %p11515_p7 = pneg %p11514_p2 }
 0x12d   : > { %p11521_p0 = por %p11520_p12, %p11519_p10 }
 0x12f   : > { %p11522_p5 = pnand %p11521_p0, %p11515_p7 }
 0x131   : > { %11525 = shalt.err (!%p11522_p5)
}
 0x132   : > { %s11526_s15 = scalar_lea.vmem %s12286_s1, 128  ;;  %s11911_s23 = smov [#allocation31]  }
 0x133   : > { %p11527_p1 = scmp.ne.s32.totalorder %s12286_s1, %s11526_s15  ;;  %s11531_s10 = sshll.u32 %s11911_s23, 4  ;;  %s11532_s10 = int_to_ptr.vmem [resolvable:$false] %s11531_s10 }
 0x134   : > { %s11533_s26 = scalar_lea.vmem %s11532_s10, 256  ;;  %p11534_p11 = scmp.lt.s32.totalorder %s12286_s1, %s11532_s10 }
 0x135   : > { %p11529_p4 = pnand %p11527_p1, %p13241_p3  ;;  %p11535_p2 = scmp.lt.s32.totalorder %s11533_s26, %s11526_s15 }
 0x137   : > { %p11530_p6 = pneg %p11529_p4  ;;  %p11536_p9 = por %p11535_p2, %p11534_p11 }
 0x139   : > { %p11537_p13 = pnand %p11536_p9, %p11530_p6 }
 0x13b   : > { %11540 = shalt.err (!%p11537_p13)
}
 0x13c   : > { %s13199_s4 = smov 32   ;;  %s13200_s24 = smov 2  }
 0x13d   : > { %p13242_p7 = scmp.ne.s32.totalorder %s13236_s9, 0  ;;  %s11914_s10 = smov [#allocation9]  }
 0x13e   : > { %s793_s26 = sshll.u32 %s11914_s10, 4  ;;  %s11915_s15 = smov [#allocation12]   ;;  %s794_s26 = int_to_ptr.vmem [resolvable:$true] %s793_s26 }
 0x13f   : > { %9898 = dma.hbm_to_vmem [thread:$0]  (!%p13242_p7), %s12283_s28, 128, %s12286_s1, %s12172_s22, %s13199_s4, %s13199_s4, %s13200_s24  }
 0x140   : > { %s817_s23 = sshll.u32 %s11915_s15, 4  ;;  %s11541_s7 = scalar_lea.hbm %s11952_s17, 16  ;;  %s818_s23 = int_to_ptr.vmem [resolvable:$true] %s817_s23 }
 0x141   : > { %p11542_p6 = scmp.ne.s32.totalorder %s11952_s17, %s11541_s7  ;;  %p11548_p0 = scmp.lt.u32.totalorder %s11541_s7, %s11952_s17 }
 0x143   : > { %p11544_p10 = pnand %p11542_p6, %p13238_p8 }
 0x145   : > { %p11545_p12 = pneg %p11544_p10 }
 0x147   : > { %p11550_p5 = pnand %p11548_p0, %p11545_p12 }
 0x149   : > { %11553 = shalt.err (!%p11550_p5)
}
 0x14a   : > { %s11554_s8 = scalar_lea.vmem %s794_s26, 16  ;;  %s11561_s28 = scalar_lea.vmem %s794_s26, 32 }
 0x14b   : > { %p11555_p1 = scmp.ne.s32.totalorder %s794_s26, %s11554_s8  ;;  %p11562_p2 = scmp.lt.s32.totalorder %s794_s26, %s794_s26 }
 0x14c   : > { %p11563_p9 = scmp.lt.s32.totalorder %s11561_s28, %s11554_s8 }
 0x14d   : > { %p11557_p4 = pnand %p11555_p1, %p13238_p8 }
 0x14e   : > { %p11564_p13 = por %p11563_p9, %p11562_p2 }
 0x14f   : > { %p11558_p11 = pneg %p11557_p4 }
 0x151   : > { %p11565_p7 = pnand %p11564_p13, %p11558_p11 }
 0x153   : > { %11568 = shalt.err (!%p11565_p7)
}
 0x154   : > { %p13243_p3 = scmp.ne.s32.totalorder %s13229_s12, 0  ;;  %s11569_s7 = scalar_lea.hbm %s11962_s25, 16 }
 0x155   : > { %p11570_p6 = scmp.ne.s32.totalorder %s11962_s25, %s11569_s7  ;;  %p11576_p0 = scmp.lt.u32.totalorder %s11569_s7, %s11962_s25 }
 0x156   : > { %9852 = dma.hbm_to_vmem [thread:$0]  (!%p13243_p3), %s11952_s17, 16, %s794_s26, [#allocation8]  }
 0x157   : > { %p11572_p10 = pnand %p11570_p6, %p13238_p8 }
 0x159   : > { %p11573_p12 = pneg %p11572_p10 }
 0x15b   : > { %p11578_p5 = pnand %p11576_p0, %p11573_p12 }
 0x15d   : > { %11581 = shalt.err (!%p11578_p5)
}
 0x15e   : > { %s11582_s8 = scalar_lea.vmem %s818_s23, 16  ;;  %s11589_s1 = scalar_lea.vmem %s818_s23, 32 }
 0x15f   : > { %p11583_p7 = scmp.ne.s32.totalorder %s818_s23, %s11582_s8  ;;  %p11590_p11 = scmp.lt.s32.totalorder %s818_s23, %s818_s23 }
 0x160   : > { %p11591_p2 = scmp.lt.s32.totalorder %s11589_s1, %s11582_s8 }
 0x161   : > { %p11585_p1 = pnand %p11583_p7, %p13238_p8 }
 0x162   : > { %p11592_p9 = por %p11591_p2, %p11590_p11 }
 0x163   : > { %p11586_p4 = pneg %p11585_p1 }
 0x165   : > { %p11593_p13 = pnand %p11592_p9, %p11586_p4 }
 0x167   : > { %11596 = shalt.err (!%p11593_p13)
}
 0x168   : > { %9858 = dma.hbm_to_vmem [thread:$0]  (!%p13243_p3), %s11962_s25, 16, %s818_s23, [#allocation11]  }
 0x169   : > { %s11916_s10 = smov [#allocation15]   ;;  %s11917_s15 = smov [#allocation18]  }
 0x16a   : > { %s840_s26 = sshll.u32 %s11916_s10, 4  ;;  %s864_s28 = sshll.u32 %s11917_s15, 4  ;;  %s841_s26 = int_to_ptr.vmem [resolvable:$true] %s840_s26  ;;  %s865_s28 = int_to_ptr.vmem [resolvable:$true] %s864_s28 }
 0x16b   : > { %s11597_s7 = scalar_lea.hbm %s13223_s3, 4096 }
 0x16c   : > { %p11598_p6 = scmp.ne.s32.totalorder %s13223_s3, %s11597_s7  ;;  %p11604_p0 = scmp.lt.u32.totalorder %s11597_s7, %s13223_s3 }
 0x16e   : > { %p11600_p10 = pnand %p11598_p6, %p13238_p8 }
 0x170   : > { %p11601_p12 = pneg %p11600_p10 }
 0x172   : > { %p11606_p5 = pnand %p11604_p0, %p11601_p12 }
 0x174   : > { %11609 = shalt.err (!%p11606_p5)
}
 0x175   : > { %s11610_s8 = scalar_lea.vmem %s841_s26, 4096  ;;  %p11618_p11 = scmp.lt.s32.totalorder %s841_s26, %s841_s26 }
 0x176   : > { %p11611_p7 = scmp.ne.s32.totalorder %s841_s26, %s11610_s8  ;;  %p11619_p2 = scmp.lt.s32.totalorder %s11610_s8, %s11610_s8 }
 0x178   : > { %p11613_p1 = pnand %p11611_p7, %p13238_p8  ;;  %p11620_p9 = por %p11619_p2, %p11618_p11 }
 0x17a   : > { %p11614_p4 = pneg %p11613_p1 }
 0x17c   : > { %p11621_p13 = pnand %p11620_p9, %p11614_p4 }
 0x17e   : > { %11624 = shalt.err (!%p11621_p13)
}
 0x17f   : > { %s13244_s23 = smov 16   ;;  %s13245_s1 = smov 256  }
 0x180   : > { %9864 = dma.hbm_to_vmem [thread:$0]  (!%p13243_p3), %s13223_s3, 4096, %s841_s26, [#allocation14], %s13245_s1, %s13245_s1, %s13244_s23  }
 0x181   : > { %s11625_s10 = scalar_lea.hbm %s11982_s14, 8192 }
 0x182   : > { %p11626_p6 = scmp.ne.s32.totalorder %s11982_s14, %s11625_s10  ;;  %p11632_p0 = scmp.lt.u32.totalorder %s11625_s10, %s11982_s14 }
 0x184   : > { %p11628_p10 = pnand %p11626_p6, %p13238_p8 }
 0x186   : > { %p11629_p12 = pneg %p11628_p10 }
 0x188   : > { %p11634_p5 = pnand %p11632_p0, %p11629_p12 }
 0x18a   : > { %11637 = shalt.err (!%p11634_p5)
}
 0x18b   : > { %s11638_s15 = scalar_lea.vmem %s865_s28, 8192  ;;  %p11646_p11 = scmp.lt.s32.totalorder %s865_s28, %s865_s28 }
 0x18c   : > { %p11639_p7 = scmp.ne.s32.totalorder %s865_s28, %s11638_s15  ;;  %p11647_p2 = scmp.lt.s32.totalorder %s11638_s15, %s11638_s15 }
 0x18e   : > { %p11641_p1 = pnand %p11639_p7, %p13238_p8  ;;  %p11648_p9 = por %p11647_p2, %p11646_p11 }
 0x190   : > { %p11642_p4 = pneg %p11641_p1 }
 0x192   : > { %p11649_p13 = pnand %p11648_p9, %p11642_p4 }
 0x194   : > { %11652 = shalt.err (!%p11649_p13)
}
 0x195   : > { %s13246_s26 = smov 8   ;;  %s13247_s7 = smov 128  }
 0x196   : > { %s13248_s8 = sld [smem:[#allocation47_spill]]  ;;  %s11918_s23 = smov [#allocation21]  }
 0x197   : > { %9870 = dma.hbm_to_vmem [thread:$0]  (!%p13243_p3), %s11982_s14, 8192, %s865_s28, [#allocation17], %s13247_s7, %s13247_s7, %s13246_s26  }
 0x198   : > { %s888_s1 = sshll.u32 %s11918_s23, 4  ;;  %s11919_s10 = smov [#allocation24]   ;;  %s889_s1 = int_to_ptr.vmem [resolvable:$true] %s888_s1 }
 0x199   : > { %s918_s4 = sshll.u32 %s11919_s10, 4  ;;  %s919_s4 = int_to_ptr.vmem [resolvable:$true] %s918_s4 }
 0x19c   : > { %s11653_s15 = scalar_lea.hbm %s13248_s8, 4096 }
 0x19d   : > { %p11654_p6 = scmp.ne.s32.totalorder %s13248_s8, %s11653_s15  ;;  %p11660_p0 = scmp.lt.u32.totalorder %s11653_s15, %s13248_s8 }
 0x19f   : > { %p11656_p10 = pnand %p11654_p6, %p13238_p8 }
 0x1a1   : > { %p11657_p12 = pneg %p11656_p10 }
 0x1a3   : > { %p11662_p5 = pnand %p11660_p0, %p11657_p12 }
 0x1a5   : > { %11665 = shalt.err (!%p11662_p5)
}
 0x1a6   : > { %s11666_s24 = scalar_lea.vmem %s889_s1, 4096  ;;  %p11674_p11 = scmp.lt.s32.totalorder %s889_s1, %s889_s1 }
 0x1a7   : > { %p11667_p7 = scmp.ne.s32.totalorder %s889_s1, %s11666_s24  ;;  %p11675_p2 = scmp.lt.s32.totalorder %s11666_s24, %s11666_s24 }
 0x1a9   : > { %p11669_p1 = pnand %p11667_p7, %p13238_p8  ;;  %p11676_p9 = por %p11675_p2, %p11674_p11 }
 0x1ab   : > { %p11670_p4 = pneg %p11669_p1 }
 0x1ad   : > { %p11677_p13 = pnand %p11676_p9, %p11670_p4 }
 0x1af   : > { %11680 = shalt.err (!%p11677_p13)
}
 0x1b0   : > { %s13249_s28 = sld [smem:[#allocation49_spill]] }
 0x1b1   : > { %9876 = dma.hbm_to_vmem [thread:$0]  (!%p13243_p3), %s13248_s8, 4096, %s889_s1, [#allocation20], %s13247_s7, %s13247_s7, %s13246_s26  }
 0x1b6   : > { %s11681_s23 = scalar_lea.hbm %s13249_s28, 8192 }
 0x1b7   : > { %p11682_p6 = scmp.ne.s32.totalorder %s13249_s28, %s11681_s23  ;;  %p11688_p0 = scmp.lt.u32.totalorder %s11681_s23, %s13249_s28 }
 0x1b9   : > { %p11684_p10 = pnand %p11682_p6, %p13238_p8 }
 0x1bb   : > { %p11685_p12 = pneg %p11684_p10 }
 0x1bd   : > { %p11690_p5 = pnand %p11688_p0, %p11685_p12 }
 0x1bf   : > { %11693 = shalt.err (!%p11690_p5)
}
 0x1c0   : > { %s11694_s24 = scalar_lea.vmem %s919_s4, 8192  ;;  %p11702_p11 = scmp.lt.s32.totalorder %s919_s4, %s919_s4 }
 0x1c1   : > { %p11695_p7 = scmp.ne.s32.totalorder %s919_s4, %s11694_s24  ;;  %p11703_p2 = scmp.lt.s32.totalorder %s11694_s24, %s11694_s24 }
 0x1c3   : > { %p11697_p1 = pnand %p11695_p7, %p13238_p8  ;;  %p11704_p9 = por %p11703_p2, %p11702_p11 }
 0x1c5   : > { %p11698_p4 = pneg %p11697_p1 }
 0x1c7   : > { %p11705_p13 = pnand %p11704_p9, %p11698_p4 }
 0x1c9   : > { %11708 = shalt.err (!%p11705_p13)
}
 0x1ca   : > { %s13250_s1 = sld [smem:[#allocation50_spill]]  ;;  %s11920_s10 = smov [#allocation27]  }
 0x1cb   : > { %9882 = dma.hbm_to_vmem [thread:$0]  (!%p13243_p3), %s13249_s28, 8192, %s919_s4, [#allocation23], %s13247_s7, %s13247_s7, %s13246_s26  }
 0x1cc   : > { %s942_s15 = sshll.u32 %s11920_s10, 4  ;;  %s11921_s23 = smov [#allocation28]   ;;  %s943_s15 = int_to_ptr.vmem [resolvable:$true] %s942_s15 }
 0x1cd   : > { %s956_s3 = sshll.u32 %s11921_s23, 4  ;;  %s957_s3 = int_to_ptr.vmem [resolvable:$true] %s956_s3 }
 0x1d0   : > { %s11709_s24 = scalar_lea.hbm %s13250_s1, 4096 }
 0x1d1   : > { %p11710_p6 = scmp.ne.s32.totalorder %s13250_s1, %s11709_s24  ;;  %p11716_p0 = scmp.lt.u32.totalorder %s11709_s24, %s13250_s1 }
 0x1d3   : > { %p11712_p10 = pnand %p11710_p6, %p13238_p8 }
 0x1d5   : > { %p11713_p12 = pneg %p11712_p10 }
 0x1d7   : > { %p11718_p5 = pnand %p11716_p0, %p11713_p12 }
 0x1d9   : > { %11721 = shalt.err (!%p11718_p5)
}
 0x1da   : > { %s11722_s8 = scalar_lea.vmem %s943_s15, 4096  ;;  %p11730_p11 = scmp.lt.s32.totalorder %s943_s15, %s943_s15 }
 0x1db   : > { %p11723_p7 = scmp.ne.s32.totalorder %s943_s15, %s11722_s8  ;;  %p11731_p2 = scmp.lt.s32.totalorder %s11722_s8, %s11722_s8 }
 0x1dd   : > { %p11725_p1 = pnand %p11723_p7, %p13238_p8  ;;  %p11732_p9 = por %p11731_p2, %p11730_p11 }
 0x1df   : > { %p11726_p4 = pneg %p11725_p1 }
 0x1e1   : > { %p11733_p13 = pnand %p11732_p9, %p11726_p4 }
 0x1e3   : > { %11736 = shalt.err (!%p11733_p13)
}
 0x1e4   : > { %s13251_s4 = sld [smem:[#allocation51_spill]] }
 0x1e5   : > { %9888 = dma.hbm_to_vmem [thread:$0]  (!%p13243_p3), %s13250_s1, 4096, %s943_s15, [#allocation26], %s13247_s7, %s13247_s7, %s13246_s26  }
 0x1ea   : > { %s11737_s10 = scalar_lea.hbm %s13251_s4, 32 }
 0x1eb   : > { %p11738_p6 = scmp.ne.s32.totalorder %s13251_s4, %s11737_s10  ;;  %p11744_p0 = scmp.lt.u32.totalorder %s11737_s10, %s13251_s4 }
 0x1ed   : > { %p11740_p10 = pnand %p11738_p6, %p13238_p8 }
 0x1ef   : > { %p11741_p12 = pneg %p11740_p10 }
 0x1f1   : > { %p11746_p5 = pnand %p11744_p0, %p11741_p12 }
 0x1f3   : > { %11749 = shalt.err (!%p11746_p5)
}
 0x1f4   : > { %s11750_s8 = scalar_lea.vmem %s957_s3, 32  ;;  %p11758_p11 = scmp.lt.s32.totalorder %s957_s3, %s957_s3 }
 0x1f5   : > { %p11751_p7 = scmp.ne.s32.totalorder %s957_s3, %s11750_s8  ;;  %p11759_p2 = scmp.lt.s32.totalorder %s11750_s8, %s11750_s8 }
 0x1f7   : > { %p11753_p1 = pnand %p11751_p7, %p13238_p8  ;;  %p11760_p9 = por %p11759_p2, %p11758_p11 }
 0x1f9   : > { %p11754_p4 = pneg %p11753_p1 }
 0x1fb   : > { %p11761_p13 = pnand %p11760_p9, %p11754_p4 }
 0x1fd   : > { %11764 = shalt.err (!%p11761_p13)
}
 0x1fe   : > { %s13252_s26 = sld [smem:[#allocation55_spill]]  ;;  %s13253_s7 = sshll.u32 %s11865_s5, 7 }
 0x1ff   : > { %9891 = dma.hbm_to_vmem [thread:$0]  (!%p13243_p3), %s13251_s4, 32, %s957_s3, [#allocation29]  }
 0x200   : > { %s1031_s2 = scalar_lea.vmem [#allocation32], %s12267_s6  ;;  %p13254_p6 = scmp.ne.s32.totalorder %s13237_s0, 0 }
 0x201   : > { %s1039_s23 = sshll.u32 %s1031_s2, 4  ;;  %s12410_s23 = int_to_ptr.vmem [resolvable:$true] %s1039_s23 }
 0x204   : > { %s12407_s15 = scalar_lea.hbm %s13252_s26, %s13253_s7  ;;  %s11770_s24 = scalar_lea.hbm %s13252_s26, 384 }
 0x205   : > { %s11765_s12 = scalar_lea.hbm %s12407_s15, 128  ;;  %p11771_p0 = scmp.lt.u32.totalorder %s12407_s15, %s13252_s26 }
 0x206   : > { %p11766_p8 = scmp.ne.s32.totalorder %s12407_s15, %s11765_s12  ;;  %p11772_p5 = scmp.lt.u32.totalorder %s11770_s24, %s11765_s12 }
 0x207   : > { %p11774_p7 = scmp.lt.u32.totalorder %s11765_s12, %s12407_s15 }
 0x208   : > { %p11768_p10 = pnand %p11766_p8, %p13254_p6  ;;  %p11773_p3 = por %p11772_p5, %p11771_p0 }
 0x20a   : > { %p11769_p12 = pneg %p11768_p10  ;;  %p11775_p1 = por %p11774_p7, %p11773_p3 }
 0x20c   : > { %p11776_p4 = pnand %p11775_p1, %p11769_p12 }
 0x20e   : > { %11779 = shalt.err (!%p11776_p4)
}
 0x20f   : > { %s11780_s3 = scalar_lea.vmem %s12410_s23, 128  ;;  %s11922_s5 = smov [#allocation32]  }
 0x210   : > { %p11781_p11 = scmp.ne.s32.totalorder %s12410_s23, %s11780_s3  ;;  %s11785_s6 = sshll.u32 %s11922_s5, 4  ;;  %s11786_s6 = int_to_ptr.vmem [resolvable:$false] %s11785_s6 }
 0x211   : > { %s11787_s10 = scalar_lea.vmem %s11786_s6, 256  ;;  %p11788_p13 = scmp.lt.s32.totalorder %s12410_s23, %s11786_s6 }
 0x212   : > { %p11783_p2 = pnand %p11781_p11, %p13254_p6  ;;  %p11789_p8 = scmp.lt.s32.totalorder %s11787_s10, %s11780_s3 }
 0x214   : > { %p11784_p9 = pneg %p11783_p2  ;;  %p11790_p10 = por %p11789_p8, %p11788_p13 }
 0x216   : > { %p11791_p0 = pnand %p11790_p10, %p11784_p9 }
 0x218   : > { %11794 = shalt.err (!%p11791_p0)
}
 0x219   : > { %p13255_p12 = scmp.ne.s32.totalorder %s13236_s9, 0  ;;  %s13256_s8 = smov 2  }
 0x21a   : > { %s13257_s7 = smov 32   ;;  %p13258_p6 = scmp.ne.s32.totalorder %s13228_s18, 0 }
 0x21b   : > { %9901 = dma.hbm_to_vmem [thread:$0]  (!%p13255_p12), %s12407_s15, 128, %s12410_s23, %s12172_s22, %s13257_s7, %s13257_s7, %s13256_s8  }
 0x21c   : > { %1069 = sbr.rel (%p13258_p6) target bundleno = 3467 (0xd8b), region = 128  ;;  %p13259_p5 = scmp.eq.s32.totalorder (!%p13258_p6), %s12101_s16, 0 }
 0x223   : > { %11812 = dma.done.wait (%p13259_p5), [#allocation6], 32   ;;  %p13260_p3 = pmov %p13259_p5 }
 0x225   : > { %11814 = vsyncadd (%p13260_p3), [#allocation6], 4294967264  ;;  %p13261_p7 = pmov %p13260_p3 }
 0x226   : > { %p13262_p1 = pmov %p13260_p3 }
 0x227   : > { %11816 = dma.done.wait (%p13261_p7), [#allocation8], 144  }
 0x228   : > { %11818 = vsyncadd (%p13262_p1), [#allocation8], 4294967152  ;;  %p13263_p4 = pmov %p13262_p1 }
 0x229   : > { %p13264_p11 = pmov %p13262_p1 }
 0x22a   : > { %11820 = dma.done.wait (%p13263_p4), [#allocation11], 1040  }
 0x22b   : > { %11822 = vsyncadd (%p13264_p11), [#allocation11], 4294966256  ;;  %p13265_p2 = pmov %p13262_p1 }
 0x22c   : > { %p13266_p9 = pmov %p13262_p1 }
 0x22d   : > { %11824 = dma.done.wait (%p13265_p2), [#allocation14], 20480  }
 0x22e   : > { %11826 = vsyncadd (%p13266_p9), [#allocation14], 4294946816  ;;  %p13267_p13 = pmov %p13262_p1 }
 0x22f   : > { %p13268_p8 = pmov %p13262_p1 }
 0x230   : > { %11828 = dma.done.wait (%p13267_p13), [#allocation17], 8256  }
 0x231   : > { %11830 = vsyncadd (%p13268_p8), [#allocation17], 4294959040  ;;  %p13269_p10 = pmov %p13262_p1 }
 0x232   : > { %p13270_p0 = pmov %p13262_p1 }
 0x233   : > { %11832 = dma.done.wait (%p13269_p10), [#allocation20], 4128  }
 0x234   : > { %11834 = vsyncadd (%p13270_p0), [#allocation20], 4294963168  ;;  %p13271_p12 = pmov %p13270_p0 }
 0x235   : > { %p13272_p6 = pmov %p13270_p0 }
 0x236   : > { %11836 = dma.done.wait (%p13271_p12), [#allocation23], 8224  }
 0x237   : > { %11838 = vsyncadd (%p13272_p6), [#allocation23], 4294959072  ;;  %p13273_p5 = pmov %p13270_p0 }
 0x238   : > { %p13274_p3 = pmov %p13270_p0 }
 0x239   : > { %11840 = dma.done.wait (%p13273_p5), [#allocation26], 4128  }
 0x23a   : > { %11842 = vsyncadd (%p13274_p3), [#allocation26], 4294963168  ;;  %p13275_p7 = pmov %p13270_p0 }
 0x23b   : > { %p13276_p1 = pmov %p13270_p0 }
 0x23c   : > { %11844 = dma.done.wait (%p13275_p7), [#allocation29], 32  }
 0x23d   : > { %11846 = vsyncadd (%p13276_p1), [#allocation29], 4294967264  ;;  %s13277_s9 = sld [smem:[#allocation61_spill]]  ;;  %s13278_s22 = sld [smem:[#allocation64_spill]] }
 0x23e   : > { %s1135_s18 = sand.u32 1, %s12101_s16  }
 0x23f   : > { %s1136_s2 = scalar_lea.sflag [#allocation6], %s1135_s18 }
 0x243   : > { %s1137_s0 = sand.u32 1, %s13277_s9   ;;  %p13279_p4 = scmp.ne.s32.totalorder %s13278_s22, 0 }
 0x244   : > { %s8694_s15 = sshll.u32 %s1137_s0, 11 }
 0x245   : > { %s12473_s23 = scalar_lea.vmem [#allocation30], %s8694_s15 }
 0x246   : > { %11848 = dma.done.wait (%p13279_p4), %s1136_s2, 33024  }
 0x247   : > { %11850 = vsyncadd (%p13279_p4), %s1136_s2, 4294934272  ;;  %s13280_s12 = sld [smem:[#allocation54_spill]]  ;;  %s13281_s24 = sld [smem:[#allocation56_spill]] }
 0x248   : > { %s13282_s3 = sld [smem:[#allocation57_spill]]  ;;  %s13283_s5 = sld [smem:[#allocation60_spill]] }
 0x249   : > { %s8695_s6 = sshll.u32 %s1137_s0, 3  ;;  %s8697_s10 = sshll.u32 %s12101_s16, 2 }
 0x24a   : > { %p1261_p11 = scmp.lt.s32.totalorder %s8697_s10, 11  ;;  %s12492_s2 = scalar_lea.vmem [#allocation31], %s8695_s6 }
 0x24b   : > { %s12494_s4 = scalar_lea.vmem [#allocation32], %s8695_s6  ;;  %p13284_p2 = scmp.ne.s32.totalorder %s12101_s16, 0 }
 0x24c   : > { %s13296_s10 = smov (!%p1261_p11, %s8697_s10), 11  ;;  %vm1312_vm0 = vcmask (!%p13284_p2), 1043456   ;;  %v11923_v2 = vmov (!%p13284_p2), 0.0   ;;  %v10026_v3 = vld [vmem:[#allocation7] sm:$0x1f] (!%p13284_p2)   ;;  %vm1313_vm1 = vcmask (!%p13284_p2), 1044480   ;;  %v1606_v63 = vlaneseq (!%p13284_p2) }
 0x24d   : > { %s9566_s8 = sshll.u32 %s13296_s10, 8  ;;  %s9567_s7 = sshll.u32 %s13296_s10, 7  ;;  %9711 = vmatprep.subr.bf16.mxu0 (!%p13284_p2), %v11923_v2  ;;  %9717 = vmatprep.subr.bf16.mxu1 (!%p13284_p2), %v11923_v2  ;;  %v11924_v4 = vmov (!%p13284_p2), 65535   ;;  %vm11925_vm2 = vmmov (!%p13284_p2), 0   ;;  %v1292_v6 = vld [vmem:[#allocation5] sm:$0x3] (!%p13284_p2) }
 0x24e   : > { %s12481_s9 = scalar_lea.vmem %s13280_s12, %s9566_s8  ;;  %s12484_s18 = scalar_lea.vmem %s13281_s24, %s9567_s7  ;;  %v1314_v5 = vsel (!%p13284_p2), %vm1312_vm0, 4294967295, %v11924_v4  ;;  %9713 = vmatprep.mubr.msk.bf16.mxu0 (!%p13284_p2), %vm11925_vm2, %v11923_v2  ;;  %v10027_v7 = vld [vmem:[#allocation10] sm:$0xff] (!%p13284_p2)   ;;  %9733 = vmatprep.mubr.msk.bf16.mxu1 (!%p13284_p2), %vm11925_vm2, %v11923_v2  ;;  %v10028_v9 = vld [vmem:[#allocation10 + $0x8] sm:$0xff] (!%p13284_p2)   ;;  %v1296_v11 = vpack.c.bf16 (!%p13284_p2), %v1292_v6, %v1292_v6  ;;  %vm1308_vm3 = vcmask (!%p13284_p2), 72704   ;;  %v10029_v12 = vld [vmem:[#allocation10 + $0x10] sm:$0xff] (!%p13284_p2)   ;;  %v11926_v59 = vmov (!%p13284_p2), 0  }
 0x24f   : > { %s12487_s15 = scalar_lea.vmem %s13282_s3, %s13296_s10  ;;  %s8705_s1 = sshll.u32 %s13296_s10, 1  ;;  %v1315_v8 = vsel (!%p13284_p2), %vm1313_vm1, %v1314_v5, 0  ;;  %9718 = vmatpush3.bf16.msra.mxu1 (!%p13284_p2), %v10027_v7  ;;  %v10030_v13 = vld [vmem:[#allocation10 + $0x18] sm:$0xff] (!%p13284_p2)   ;;  %v10031_v14 = vld [vmem:[#allocation10 + $0x20] sm:$0xff] (!%p13284_p2)   ;;  %v10032_v15 = vld [vmem:[#allocation10 + $0x28] sm:$0xff] (!%p13284_p2)   ;;  %v12498_v1 = vshrl.u32 (!%p13284_p2), %v1606_v63, 7 }
 0x250   : > { %s12490_s22 = scalar_lea.vmem %s13283_s5, %s8705_s1  ;;  %1290 = sbr.rel (%p13284_p2) target bundleno = 2515 (0x9d3), region = 208  ;;  %v1317_v10 = vand.u32 (!%p13284_p2), %v10026_v3, %v1315_v8  ;;  %9719 = vmatprep.subr.bf16.mxu1 (!%p13284_p2), %v11923_v2  ;;  %v10033_v16 = vld [vmem:[#allocation10 + $0x30] sm:$0xff] (!%p13284_p2)   ;;  %v10034_v17 = vld [vmem:[#allocation10 + $0x38] sm:$0xff] (!%p13284_p2)   ;;  %v11927_v61 = vmov (!%p13284_p2), 1983009808   ;;  %vm3671_vm4 = vcmask (!%p13284_p2), 1024  }
 0x251   : > { %v10035_v18 = vld [vmem:[#allocation15] ss:$16 sps:$4 sm:$0xff] (!%p13284_p2)   ;;  %v10037_v19 = vld [vmem:[#allocation15 + $0x4] ss:$16 sps:$4 sm:$0xff] (!%p13284_p2)   ;;  %v10040_v20 = vld [vmem:[#allocation15 + $0xc] ss:$16 sps:$4 sm:$0xff] (!%p13284_p2)   ;;  %v1604_v62 = vunpack.c.l.s4 (!%p13284_p2), %v11927_v61 }
 0x252   : > { %9712 = vmatpush3.bf16.msra.mxu0 (!%p13284_p2), %v1317_v10  ;;  %v10043_v21 = vld [vmem:[#allocation15 + $0x24] ss:$16 sps:$4 sm:$0xff] (!%p13284_p2)   ;;  %v10041_v22 = vld [vmem:[#allocation15 + $0x20] ss:$16 sps:$4 sm:$0xff] (!%p13284_p2)   ;;  %v8707_v33 = vld [vmem:[#allocation9] ss:$0 sm:$0xff] (!%p13284_p2) }
 0x253   : > { %9720 = vmatpush3.bf16.msra.mxu1 (!%p13284_p2), %v10028_v9  ;;  %1820 = vmatprep.subr.bf16.mxu0 (!%p13284_p2), %v10037_v19  ;;  %v10049_v23 = vld [vmem:[#allocation15 + $0x44] ss:$16 sps:$4 sm:$0xff] (!%p13284_p2)   ;;  %v10047_v24 = vld [vmem:[#allocation15 + $0x40] ss:$16 sps:$4 sm:$0xff] (!%p13284_p2)   ;;  %v10038_v40 = vld [vmem:[#allocation15 + $0x8] ss:$16 sps:$4 sm:$0xff] (!%p13284_p2)   ;;  %v1605_v0 = vunpack.c.0.s8 (!%p13284_p2), %v1604_v62 }
 0x254   : > { %9721 = vmatprep.subr.bf16.mxu1 (!%p13284_p2), %v11923_v2  ;;  %v10055_v25 = vld [vmem:[#allocation15 + $0x64] ss:$16 sps:$4 sm:$0xff] (!%p13284_p2)   ;;  %v10053_v26 = vld [vmem:[#allocation15 + $0x60] ss:$16 sps:$4 sm:$0xff] (!%p13284_p2)   ;;  %v10046_v42 = vld [vmem:[#allocation15 + $0x2c] ss:$16 sps:$4 sm:$0xff] (!%p13284_p2)  }
 0x255   : > { %9714 = vmatmul.mubr.msk.bf16.vlgmr.msra.gmra.mrb[0].mxu0 (!%p13284_p2), %vm1308_vm3, %v1296_v11  ;;  %v10061_v27 = vld [vmem:[#allocation15 + $0x84] ss:$16 sps:$4 sm:$0xff] (!%p13284_p2)   ;;  %v10059_v28 = vld [vmem:[#allocation15 + $0x80] ss:$16 sps:$4 sm:$0xff] (!%p13284_p2)   ;;  %v10044_v43 = vld [vmem:[#allocation15 + $0x28] ss:$16 sps:$4 sm:$0xff] (!%p13284_p2)   ;;  %v12502_v3 = vsub.s32 (!%p13284_p2), %v1605_v0, %v12498_v1 }
 0x256   : > { %1821 = vmatpush1.bf16.msra.mxu0 (!%p13284_p2), %v10035_v18  ;;  %v10067_v29 = vld [vmem:[#allocation15 + $0xa4] ss:$16 sps:$4 sm:$0xff] (!%p13284_p2)   ;;  %v10065_v30 = vld [vmem:[#allocation15 + $0xa0] ss:$16 sps:$4 sm:$0xff] (!%p13284_p2)   ;;  %v10052_v44 = vld [vmem:[#allocation15 + $0x4c] ss:$16 sps:$4 sm:$0xff] (!%p13284_p2)   ;;  %1852 = vmatprep.mubr.bf16.mxu0 (!%p13284_p2), %v11926_v59 }
 0x257   : > { %9722 = vmatpush3.bf16.msra.mxu1 %v10029_v12  ;;  %1822 = vmatprep.subr.bf16.mxu0 %v10043_v21  ;;  %v10073_v31 = vld [vmem:[#allocation15 + $0xc4] ss:$16 sps:$4 sm:$0xff]   ;;  %v10071_v32 = vld [vmem:[#allocation15 + $0xc0] ss:$16 sps:$4 sm:$0xff]   ;;  %v10050_v45 = vld [vmem:[#allocation15 + $0x48] ss:$16 sps:$4 sm:$0xff]  }
 0x258   : > { %9723 = vmatprep.subr.bf16.mxu1 %v11923_v2  ;;  %v10058_v46 = vld [vmem:[#allocation15 + $0x6c] ss:$16 sps:$4 sm:$0xff]   ;;  %v10056_v47 = vld [vmem:[#allocation15 + $0x68] ss:$16 sps:$4 sm:$0xff]   ;;  %v10079_v54 = vld [vmem:[#allocation15 + $0xe4] ss:$16 sps:$4 sm:$0xff]  }
 0x259   : > { %v10064_v48 = vld [vmem:[#allocation15 + $0x8c] ss:$16 sps:$4 sm:$0xff]   ;;  %v10062_v49 = vld [vmem:[#allocation15 + $0x88] ss:$16 sps:$4 sm:$0xff]   ;;  %v10077_v55 = vld [vmem:[#allocation15 + $0xe0] ss:$16 sps:$4 sm:$0xff]  }
 0x25a   : > { %1823 = vmatpush1.bf16.msra.mxu0 %v10041_v22  ;;  %v10070_v50 = vld [vmem:[#allocation15 + $0xac] ss:$16 sps:$4 sm:$0xff]   ;;  %v10068_v51 = vld [vmem:[#allocation15 + $0xa8] ss:$16 sps:$4 sm:$0xff]   ;;  %s13285_s16 = sld [smem:[#allocation43_spill]]  ;;  %s13286_s1 = sld [smem:[#allocation48_spill]] }
 0x25b   : > { %9724 = vmatpush3.bf16.msra.mxu1 %v10030_v13  ;;  %1824 = vmatprep.subr.bf16.mxu0 %v10049_v23  ;;  %v10076_v52 = vld [vmem:[#allocation15 + $0xcc] ss:$16 sps:$4 sm:$0xff]   ;;  %v10074_v53 = vld [vmem:[#allocation15 + $0xc8] ss:$16 sps:$4 sm:$0xff]   ;;  %v10085_v58 = vld [vmem:[#allocation13 + $0x4] ss:$16 sps:$4 sm:$0xff]  }
 0x25c   : > { %9725 = vmatprep.subr.bf16.mxu1 %v11923_v2  ;;  %v10082_v56 = vld [vmem:[#allocation15 + $0xec] ss:$16 sps:$4 sm:$0xff]   ;;  %v10080_v57 = vld [vmem:[#allocation15 + $0xe8] ss:$16 sps:$4 sm:$0xff]   ;;  %v10088_v60 = vld [vmem:[#allocation13 + $0x204] ss:$16 sps:$4 sm:$0xff]  }
 0x25d   : > { %v8710_v5 = vld [vmem:[#allocation12] ss:$0 sm:$0xff]  ;;  %v10091_v19 = vld [vmem:[#allocation13 + $0x24] ss:$16 sps:$4 sm:$0xff]   ;;  %v10089_v23 = vld [vmem:[#allocation13 + $0x20] ss:$16 sps:$4 sm:$0xff]  }
 0x25e   : > { %1825 = vmatpush1.bf16.msra.mxu0 %v10047_v24  ;;  %v10092_v24 = vld [vmem:[#allocation13 + $0x220] ss:$16 sps:$4 sm:$0xff]   ;;  %v10151_v61 = vld [vmem:[#allocation13 + $0x164] ss:$16 sps:$4 sm:$0xff]   ;;  %s13287_s0 = sld [smem:[#allocation52_spill]]  ;;  %s13288_s12 = sld [smem:[#allocation58_spill]] }
 0x25f   : > { %9726 = vmatpush3.bf16.msra.mxu1 %v10031_v14  ;;  %1826 = vmatprep.subr.bf16.mxu0 %v10055_v25  ;;  %v10097_v25 = vld [vmem:[#allocation13 + $0x44] ss:$16 sps:$4 sm:$0xff]   ;;  %v10149_v63 = vld [vmem:[#allocation13 + $0x160] ss:$16 sps:$4 sm:$0xff]   ;;  %s13289_s24 = sld [smem:[#allocation59_spill]] }
 0x260   : > { %9727 = vmatprep.subr.bf16.mxu1 %v11923_v2  ;;  %v10154_v62 = vld [vmem:[#allocation13 + $0x364] ss:$16 sps:$4 sm:$0xff]   ;;  %v10152_v0 = vld [vmem:[#allocation13 + $0x360] ss:$16 sps:$4 sm:$0xff]  }
 0x262   : > { %1827 = vmatpush1.bf16.msra.mxu0 %v10053_v26  ;;  %v10100_v26 = vld [vmem:[#allocation13 + $0x244] ss:$16 sps:$4 sm:$0xff]  }
 0x263   : > { %9728 = vmatpush3.bf16.msra.mxu1 %v10032_v15  ;;  %1828 = vmatprep.subr.bf16.mxu0 %v10061_v27  ;;  %v10095_v27 = vld [vmem:[#allocation13 + $0x40] ss:$16 sps:$4 sm:$0xff]  }
 0x264   : > { %9729 = vmatprep.subr.bf16.mxu1 %v11923_v2 }
 0x266   : > { %1829 = vmatpush1.bf16.msra.mxu0 %v10059_v28  ;;  %v10098_v28 = vld [vmem:[#allocation13 + $0x240] ss:$16 sps:$4 sm:$0xff]  }
 0x267   : > { %9730 = vmatpush3.bf16.msra.mxu1 %v10033_v16  ;;  %1830 = vmatprep.subr.bf16.mxu0 %v10067_v29  ;;  %v10083_v16 = vld [vmem:[#allocation13] ss:$16 sps:$4 sm:$0xff]   ;;  %v10103_v29 = vld [vmem:[#allocation13 + $0x64] ss:$16 sps:$4 sm:$0xff]  }
 0x268   : > { %9731 = vmatprep.subr.bf16.mxu1 %v11923_v2  ;;  %v1291_v2 = vld [vmem:[%s13285_s16] sm:$0xff] }
 0x269   : > { %v1602_v4 = vcombine.high %v1291_v2, %v1291_v2  ;;  %v12505_v6 = vrot.slane %v1291_v2, %v12502_v3  ;;  %v10157_v2 = vld [vmem:[#allocation13 + $0x184] ss:$16 sps:$4 sm:$0xff]  }
 0x26a   : > { %1831 = vmatpush1.bf16.msra.mxu0 %v10065_v30  ;;  %v10106_v30 = vld [vmem:[#allocation13 + $0x264] ss:$16 sps:$4 sm:$0xff]  }
 0x26b   : > { %9732 = vmatpush3.bf16.msra.mxu1 %v10034_v17  ;;  %1832 = vmatprep.subr.bf16.mxu0 %v10073_v31  ;;  %v12508_v7 = vrot.slane %v1602_v4, %v12502_v3  ;;  %v1617_v12 = vcombine.high %v12505_v6, %v12505_v6  ;;  %v10086_v17 = vld [vmem:[#allocation13 + $0x200] ss:$16 sps:$4 sm:$0xff]   ;;  %v10160_v4 = vld [vmem:[#allocation13 + $0x384] ss:$16 sps:$4 sm:$0xff]  }
 0x26c   : > { %1861 = vmatprep.subr.bf16.mxu1 %v10040_v20  ;;  %v10094_v20 = vld [vmem:[#allocation13 + $0x224] ss:$16 sps:$4 sm:$0xff]   ;;  %v10101_v31 = vld [vmem:[#allocation13 + $0x60] ss:$16 sps:$4 sm:$0xff]  }
 0x26d   : > { %v1618_v13 = vcombine.high %v12508_v7, %v12508_v7  ;;  %v12514_v21 = vpack.c.bf16 %v1617_v12, %v1617_v12  ;;  %v10164_v12 = vld [vmem:[#allocation13 + $0x3a0] ss:$16 sps:$4 sm:$0xff]  }
 0x26e   : > { %1833 = vmatpush1.bf16.msra.mxu0 %v10071_v32  ;;  %v10104_v32 = vld [vmem:[#allocation13 + $0x260] ss:$16 sps:$4 sm:$0xff]  }
 0x26f   : > { %1834 = vmatprep.subr.bf16.mxu0 %v10079_v54  ;;  %v12516_v22 = vpack.c.bf16 %v1618_v13, %v1618_v13  ;;  %v10142_v54 = vld [vmem:[#allocation13 + $0x324] ss:$16 sps:$4 sm:$0xff]  }
 0x270   : > { %v10169_v13 = vld [vmem:[#allocation13 + $0x1c4] ss:$16 sps:$4 sm:$0xff]  }
 0x272   : > { %1835 = vmatpush1.bf16.msra.mxu0 %v10077_v55  ;;  %v10137_v55 = vld [vmem:[#allocation13 + $0x120] ss:$16 sps:$4 sm:$0xff]  }
 0x273   : > { %2542 = vmatprep.subr.bf16.mxu0 %v10085_v58  ;;  %v10148_v58 = vld [vmem:[#allocation13 + $0x344] ss:$16 sps:$4 sm:$0xff]  }
 0x328   : > { %v1353_v34 = vpop.f32.mrb[0].mxu0 }
 0x329   : > { %v1354_v35 = vadd.f32 %v8707_v33, %v1353_v34  ;;  %v9715_v36 = vpop.f32.mrb[1].mxu0  ;;  %v10109_v33 = vld [vmem:[#allocation13 + $0x84] ss:$16 sps:$4 sm:$0xff]  }
 0x32a   : > { %v1356_v37 = vpop.f32.mrb[2].mxu0  ;;  %v10112_v34 = vld [vmem:[#allocation13 + $0x284] ss:$16 sps:$4 sm:$0xff]   ;;  %v10110_v36 = vld [vmem:[#allocation13 + $0x280] ss:$16 sps:$4 sm:$0xff]  }
 0x32b   : > { %v1359_v38 = vmax.f32 %v1354_v35, 0.0  ;;  %v9716_v39 = vpop.f32.mrb[3].mxu0  ;;  %v10107_v35 = vld [vmem:[#allocation13 + $0x80] ss:$16 sps:$4 sm:$0xff]   ;;  %v10115_v37 = vld [vmem:[#allocation13 + $0xa4] ss:$16 sps:$4 sm:$0xff]  }
 0x32c   : > { %v10113_v39 = vld [vmem:[#allocation13 + $0xa0] ss:$16 sps:$4 sm:$0xff]  }
 0x32d   : > { %v1377_v41 = vpack.c.bf16 %v1359_v38, %v1359_v38  ;;  %v10118_v38 = vld [vmem:[#allocation13 + $0x2a4] ss:$16 sps:$4 sm:$0xff]  }
 0x32f   : > { %9734 = vmatmul.mubr.bf16.vlgmr.msra.gmra.mrb[0].mxu1 %v1377_v41  ;;  %v10121_v41 = vld [vmem:[#allocation13 + $0xc4] ss:$16 sps:$4 sm:$0xff]  }
 0x330   : > { %1862 = vmatpush1.bf16.msra.mxu1 %v10038_v40  ;;  %1893 = vmatprep.mubr.bf16.mxu1 %v11926_v59  ;;  %v10116_v40 = vld [vmem:[#allocation13 + $0x2a0] ss:$16 sps:$4 sm:$0xff]  }
 0x331   : > { %1863 = vmatprep.subr.bf16.mxu1 %v10046_v42  ;;  %v10124_v42 = vld [vmem:[#allocation13 + $0x2c4] ss:$16 sps:$4 sm:$0xff]   ;;  %v10143_v59 = vld [vmem:[#allocation13 + $0x140] ss:$16 sps:$4 sm:$0xff]  }
 0x334   : > { %1864 = vmatpush1.bf16.msra.mxu1 %v10044_v43  ;;  %v10119_v43 = vld [vmem:[#allocation13 + $0xc0] ss:$16 sps:$4 sm:$0xff]  }
 0x335   : > { %1865 = vmatprep.subr.bf16.mxu1 %v10052_v44  ;;  %v10122_v44 = vld [vmem:[#allocation13 + $0x2c0] ss:$16 sps:$4 sm:$0xff]  }
 0x338   : > { %1866 = vmatpush1.bf16.msra.mxu1 %v10050_v45  ;;  %v10127_v45 = vld [vmem:[#allocation13 + $0xe4] ss:$16 sps:$4 sm:$0xff]  }
 0x339   : > { %1867 = vmatprep.subr.bf16.mxu1 %v10058_v46  ;;  %v10130_v46 = vld [vmem:[#allocation13 + $0x2e4] ss:$16 sps:$4 sm:$0xff]  }
 0x33c   : > { %1868 = vmatpush1.bf16.msra.mxu1 %v10056_v47  ;;  %v10125_v47 = vld [vmem:[#allocation13 + $0xe0] ss:$16 sps:$4 sm:$0xff]  }
 0x33d   : > { %1869 = vmatprep.subr.bf16.mxu1 %v10064_v48  ;;  %v10128_v48 = vld [vmem:[#allocation13 + $0x2e0] ss:$16 sps:$4 sm:$0xff]  }
 0x340   : > { %1870 = vmatpush1.bf16.msra.mxu1 %v10062_v49  ;;  %v10133_v49 = vld [vmem:[#allocation13 + $0x104] ss:$16 sps:$4 sm:$0xff]  }
 0x341   : > { %1871 = vmatprep.subr.bf16.mxu1 %v10070_v50  ;;  %v10136_v50 = vld [vmem:[#allocation13 + $0x304] ss:$16 sps:$4 sm:$0xff]  }
 0x344   : > { %1872 = vmatpush1.bf16.msra.mxu1 %v10068_v51  ;;  %v10131_v51 = vld [vmem:[#allocation13 + $0x100] ss:$16 sps:$4 sm:$0xff]  }
 0x345   : > { %1873 = vmatprep.subr.bf16.mxu1 %v10076_v52  ;;  %v10134_v52 = vld [vmem:[#allocation13 + $0x300] ss:$16 sps:$4 sm:$0xff]  }
 0x348   : > { %1874 = vmatpush1.bf16.msra.mxu1 %v10074_v53  ;;  %v10139_v53 = vld [vmem:[#allocation13 + $0x124] ss:$16 sps:$4 sm:$0xff]  }
 0x349   : > { %1875 = vmatprep.subr.bf16.mxu1 %v10082_v56  ;;  %v10140_v56 = vld [vmem:[#allocation13 + $0x320] ss:$16 sps:$4 sm:$0xff]  }
 0x34c   : > { %1876 = vmatpush1.bf16.msra.mxu1 %v10080_v57  ;;  %v10145_v57 = vld [vmem:[#allocation13 + $0x144] ss:$16 sps:$4 sm:$0xff]  }
 0x34d   : > { %2583 = vmatprep.subr.bf16.mxu1 %v10088_v60  ;;  %v10146_v60 = vld [vmem:[#allocation13 + $0x340] ss:$16 sps:$4 sm:$0xff]  }
 0x402   : > { %v1466_v8 = vpop.f32.mrb[0].mxu1 }
 0x403   : > { %v1467_v9 = vadd.f32 %v8710_v5, %v1466_v8  ;;  %v9735_v10 = vpop.f32.mrb[1].mxu1  ;;  %v10155_v5 = vld [vmem:[#allocation13 + $0x180] ss:$16 sps:$4 sm:$0xff]  }
 0x404   : > { %v1469_v11 = vpop.f32.mrb[2].mxu1  ;;  %v10158_v8 = vld [vmem:[#allocation13 + $0x380] ss:$16 sps:$4 sm:$0xff]   ;;  %v10166_v10 = vld [vmem:[#allocation13 + $0x3a4] ss:$16 sps:$4 sm:$0xff]  }
 0x405   : > { %v1472_v14 = vmax.f32 %v1467_v9, 0.0  ;;  %v9736_v15 = vpop.f32.mrb[3].mxu1  ;;  %v10163_v9 = vld [vmem:[#allocation13 + $0x1a4] ss:$16 sps:$4 sm:$0xff]   ;;  %v10161_v11 = vld [vmem:[#allocation13 + $0x1a0] ss:$16 sps:$4 sm:$0xff]  }
 0x406   : > { %v10167_v15 = vld [vmem:[#allocation13 + $0x1c0] ss:$16 sps:$4 sm:$0xff]  }
 0x407   : > { %v1659_v18 = vpack.c.bf16 %v1472_v14, %v1472_v14  ;;  %v10172_v14 = vld [vmem:[#allocation13 + $0x3c4] ss:$16 sps:$4 sm:$0xff]  }
 0x409   : > { %1853 = vmatmul.mubr.bf16.vlgmr.msra.gmra.mrb[4].mxu0 %v1659_v18  ;;  %1894 = vmatmul.mubr.bf16.vlgmr.msra.gmra.mrb[4].mxu1 %v1659_v18  ;;  %v10178_v18 = vld [vmem:[#allocation13 + $0x3e4] ss:$16 sps:$4 sm:$0xff]  }
 0x40a   : > { %2543 = vmatpush1.bf16.msra.mxu0 %v10083_v16  ;;  %2584 = vmatpush1.bf16.msra.mxu1 %v10086_v17  ;;  %v10170_v16 = vld [vmem:[#allocation13 + $0x3c0] ss:$16 sps:$4 sm:$0xff]   ;;  %v10175_v17 = vld [vmem:[#allocation13 + $0x1e4] ss:$16 sps:$4 sm:$0xff]  }
 0x40b   : > { %2544 = vmatprep.subr.bf16.mxu0 %v10091_v19  ;;  %2585 = vmatprep.subr.bf16.mxu1 %v10094_v20  ;;  %v10173_v19 = vld [vmem:[#allocation13 + $0x1e0] ss:$16 sps:$4 sm:$0xff]  }
 0x40c   : > { %2574 = vmatprep.mubr.bf16.mxu0 %v12514_v21  ;;  %2615 = vmatprep.mubr.bf16.mxu1 %v12516_v22  ;;  %v10176_v20 = vld [vmem:[#allocation13 + $0x3e0] ss:$16 sps:$4 sm:$0xff]  }
 0x40e   : > { %2545 = vmatpush1.bf16.msra.mxu0 %v10089_v23  ;;  %2586 = vmatpush1.bf16.msra.mxu1 %v10092_v24  ;;  %v10181_v23 = vld [vmem:[#allocation13 + $0xc] ss:$16 sps:$4 sm:$0xff]  }
 0x40f   : > { %2546 = vmatprep.subr.bf16.mxu0 %v10097_v25  ;;  %2587 = vmatprep.subr.bf16.mxu1 %v10100_v26  ;;  %v10185_v24 = vld [vmem:[#allocation13 + $0x20c] ss:$16 sps:$4 sm:$0xff]   ;;  %v12522_v25 = vpack.c.bf16 %v12505_v6, %v12505_v6  ;;  %v12526_v26 = vpack.c.bf16 %v12508_v7, %v12508_v7  ;;  %v10186_v6 = vld [vmem:[#allocation13 + $0x28] ss:$16 sps:$4 sm:$0xff]  }
 0x410   : > { %v10194_v7 = vld [vmem:[#allocation13 + $0x4c] ss:$16 sps:$4 sm:$0xff]  }
 0x412   : > { %2547 = vmatpush1.bf16.msra.mxu0 %v10095_v27  ;;  %2588 = vmatpush1.bf16.msra.mxu1 %v10098_v28  ;;  %v10179_v27 = vld [vmem:[#allocation13 + $0x8] ss:$16 sps:$4 sm:$0xff]  }
 0x413   : > { %2548 = vmatprep.subr.bf16.mxu0 %v10103_v29  ;;  %2589 = vmatprep.subr.bf16.mxu1 %v10106_v30  ;;  %v10183_v28 = vld [vmem:[#allocation13 + $0x208] ss:$16 sps:$4 sm:$0xff]   ;;  %v10188_v29 = vld [vmem:[#allocation13 + $0x2c] ss:$16 sps:$4 sm:$0xff]  }
 0x414   : > { %v10191_v30 = vld [vmem:[#allocation13 + $0x22c] ss:$16 sps:$4 sm:$0xff]  }
 0x416   : > { %2549 = vmatpush1.bf16.msra.mxu0 %v10101_v31  ;;  %2590 = vmatpush1.bf16.msra.mxu1 %v10104_v32  ;;  %v10189_v31 = vld [vmem:[#allocation13 + $0x228] ss:$16 sps:$4 sm:$0xff]   ;;  %v10197_v32 = vld [vmem:[#allocation13 + $0x24c] ss:$16 sps:$4 sm:$0xff]  }
 0x417   : > { %2550 = vmatprep.subr.bf16.mxu0 %v10109_v33  ;;  %2591 = vmatprep.subr.bf16.mxu1 %v10112_v34  ;;  %v10192_v33 = vld [vmem:[#allocation13 + $0x48] ss:$16 sps:$4 sm:$0xff]  }
 0x418   : > { %v10195_v34 = vld [vmem:[#allocation13 + $0x248] ss:$16 sps:$4 sm:$0xff]  }
 0x41a   : > { %2551 = vmatpush1.bf16.msra.mxu0 %v10107_v35  ;;  %2592 = vmatpush1.bf16.msra.mxu1 %v10110_v36  ;;  %v10200_v35 = vld [vmem:[#allocation13 + $0x6c] ss:$16 sps:$4 sm:$0xff]  }
 0x41b   : > { %2552 = vmatprep.subr.bf16.mxu0 %v10115_v37  ;;  %2593 = vmatprep.subr.bf16.mxu1 %v10118_v38  ;;  %v10203_v36 = vld [vmem:[#allocation13 + $0x26c] ss:$16 sps:$4 sm:$0xff]   ;;  %v10198_v37 = vld [vmem:[#allocation13 + $0x68] ss:$16 sps:$4 sm:$0xff]  }
 0x41c   : > { %v10201_v38 = vld [vmem:[#allocation13 + $0x268] ss:$16 sps:$4 sm:$0xff]  }
 0x41e   : > { %2553 = vmatpush1.bf16.msra.mxu0 %v10113_v39  ;;  %2594 = vmatpush1.bf16.msra.mxu1 %v10116_v40  ;;  %v10206_v39 = vld [vmem:[#allocation13 + $0x8c] ss:$16 sps:$4 sm:$0xff]  }
 0x41f   : > { %2554 = vmatprep.subr.bf16.mxu0 %v10121_v41  ;;  %2595 = vmatprep.subr.bf16.mxu1 %v10124_v42  ;;  %v10209_v40 = vld [vmem:[#allocation13 + $0x28c] ss:$16 sps:$4 sm:$0xff]   ;;  %v10204_v41 = vld [vmem:[#allocation13 + $0x88] ss:$16 sps:$4 sm:$0xff]  }
 0x420   : > { %v10207_v42 = vld [vmem:[#allocation13 + $0x288] ss:$16 sps:$4 sm:$0xff]  }
 0x422   : > { %2555 = vmatpush1.bf16.msra.mxu0 %v10119_v43  ;;  %2596 = vmatpush1.bf16.msra.mxu1 %v10122_v44  ;;  %v10212_v43 = vld [vmem:[#allocation13 + $0xac] ss:$16 sps:$4 sm:$0xff]  }
 0x423   : > { %2556 = vmatprep.subr.bf16.mxu0 %v10127_v45  ;;  %2597 = vmatprep.subr.bf16.mxu1 %v10130_v46  ;;  %v10215_v44 = vld [vmem:[#allocation13 + $0x2ac] ss:$16 sps:$4 sm:$0xff]   ;;  %v10210_v45 = vld [vmem:[#allocation13 + $0xa8] ss:$16 sps:$4 sm:$0xff]  }
 0x424   : > { %v10213_v46 = vld [vmem:[#allocation13 + $0x2a8] ss:$16 sps:$4 sm:$0xff]  }
 0x426   : > { %2557 = vmatpush1.bf16.msra.mxu0 %v10125_v47  ;;  %2598 = vmatpush1.bf16.msra.mxu1 %v10128_v48  ;;  %v10218_v47 = vld [vmem:[#allocation13 + $0xcc] ss:$16 sps:$4 sm:$0xff]  }
 0x427   : > { %2558 = vmatprep.subr.bf16.mxu0 %v10133_v49  ;;  %2599 = vmatprep.subr.bf16.mxu1 %v10136_v50  ;;  %v10221_v48 = vld [vmem:[#allocation13 + $0x2cc] ss:$16 sps:$4 sm:$0xff]   ;;  %v10216_v49 = vld [vmem:[#allocation13 + $0xc8] ss:$16 sps:$4 sm:$0xff]  }
 0x428   : > { %v10219_v50 = vld [vmem:[#allocation13 + $0x2c8] ss:$16 sps:$4 sm:$0xff]  }
 0x42a   : > { %2559 = vmatpush1.bf16.msra.mxu0 %v10131_v51  ;;  %2600 = vmatpush1.bf16.msra.mxu1 %v10134_v52  ;;  %v10224_v51 = vld [vmem:[#allocation13 + $0xec] ss:$16 sps:$4 sm:$0xff]  }
 0x42b   : > { %2560 = vmatprep.subr.bf16.mxu0 %v10139_v53  ;;  %2601 = vmatprep.subr.bf16.mxu1 %v10142_v54  ;;  %v10227_v52 = vld [vmem:[#allocation13 + $0x2ec] ss:$16 sps:$4 sm:$0xff]   ;;  %v10222_v53 = vld [vmem:[#allocation13 + $0xe8] ss:$16 sps:$4 sm:$0xff]  }
 0x42c   : > { %v10225_v54 = vld [vmem:[#allocation13 + $0x2e8] ss:$16 sps:$4 sm:$0xff]  }
 0x42e   : > { %2561 = vmatpush1.bf16.msra.mxu0 %v10137_v55  ;;  %2602 = vmatpush1.bf16.msra.mxu1 %v10140_v56  ;;  %v10230_v55 = vld [vmem:[#allocation13 + $0x10c] ss:$16 sps:$4 sm:$0xff]  }
 0x42f   : > { %2562 = vmatprep.subr.bf16.mxu0 %v10145_v57  ;;  %2603 = vmatprep.subr.bf16.mxu1 %v10148_v58  ;;  %v10233_v56 = vld [vmem:[#allocation13 + $0x30c] ss:$16 sps:$4 sm:$0xff]   ;;  %v10228_v57 = vld [vmem:[#allocation13 + $0x108] ss:$16 sps:$4 sm:$0xff]  }
 0x430   : > { %v10231_v58 = vld [vmem:[#allocation13 + $0x308] ss:$16 sps:$4 sm:$0xff]  }
 0x432   : > { %2563 = vmatpush1.bf16.msra.mxu0 %v10143_v59  ;;  %2604 = vmatpush1.bf16.msra.mxu1 %v10146_v60  ;;  %v10236_v59 = vld [vmem:[#allocation13 + $0x12c] ss:$16 sps:$4 sm:$0xff]  }
 0x433   : > { %2564 = vmatprep.subr.bf16.mxu0 %v10151_v61  ;;  %2605 = vmatprep.subr.bf16.mxu1 %v10154_v62  ;;  %v10239_v60 = vld [vmem:[#allocation13 + $0x32c] ss:$16 sps:$4 sm:$0xff]   ;;  %v10234_v61 = vld [vmem:[#allocation13 + $0x128] ss:$16 sps:$4 sm:$0xff]  }
 0x434   : > { %v10237_v62 = vld [vmem:[#allocation13 + $0x328] ss:$16 sps:$4 sm:$0xff]  }
 0x436   : > { %2565 = vmatpush1.bf16.msra.mxu0 %v10149_v63  ;;  %2606 = vmatpush1.bf16.msra.mxu1 %v10152_v0  ;;  %v10242_v63 = vld [vmem:[#allocation13 + $0x14c] ss:$16 sps:$4 sm:$0xff]  }
 0x437   : > { %2566 = vmatprep.subr.bf16.mxu0 %v10157_v2  ;;  %2607 = vmatprep.subr.bf16.mxu1 %v10160_v4  ;;  %v10245_v0 = vld [vmem:[#allocation13 + $0x34c] ss:$16 sps:$4 sm:$0xff]   ;;  %v10240_v2 = vld [vmem:[#allocation13 + $0x148] ss:$16 sps:$4 sm:$0xff]  }
 0x438   : > { %v10243_v4 = vld [vmem:[#allocation13 + $0x348] ss:$16 sps:$4 sm:$0xff]  }
 0x43a   : > { %2567 = vmatpush1.bf16.msra.mxu0 %v10155_v5  ;;  %2608 = vmatpush1.bf16.msra.mxu1 %v10158_v8  ;;  %v10248_v5 = vld [vmem:[#allocation13 + $0x16c] ss:$16 sps:$4 sm:$0xff]  }
 0x43b   : > { %2568 = vmatprep.subr.bf16.mxu0 %v10163_v9  ;;  %2609 = vmatprep.subr.bf16.mxu1 %v10166_v10  ;;  %v10251_v8 = vld [vmem:[#allocation13 + $0x36c] ss:$16 sps:$4 sm:$0xff]   ;;  %v10246_v9 = vld [vmem:[#allocation13 + $0x168] ss:$16 sps:$4 sm:$0xff]  }
 0x43c   : > { %v10249_v10 = vld [vmem:[#allocation13 + $0x368] ss:$16 sps:$4 sm:$0xff]  }
 0x43e   : > { %2569 = vmatpush1.bf16.msra.mxu0 %v10161_v11  ;;  %2610 = vmatpush1.bf16.msra.mxu1 %v10164_v12  ;;  %v10254_v11 = vld [vmem:[#allocation13 + $0x18c] ss:$16 sps:$4 sm:$0xff]  }
 0x43f   : > { %2570 = vmatprep.subr.bf16.mxu0 %v10169_v13  ;;  %2611 = vmatprep.subr.bf16.mxu1 %v10172_v14  ;;  %v10257_v12 = vld [vmem:[#allocation13 + $0x38c] ss:$16 sps:$4 sm:$0xff]   ;;  %v10252_v13 = vld [vmem:[#allocation13 + $0x188] ss:$16 sps:$4 sm:$0xff]  }
 0x440   : > { %v10255_v14 = vld [vmem:[#allocation13 + $0x388] ss:$16 sps:$4 sm:$0xff]  }
 0x442   : > { %2571 = vmatpush1.bf16.msra.mxu0 %v10167_v15  ;;  %2612 = vmatpush1.bf16.msra.mxu1 %v10170_v16  ;;  %v10260_v15 = vld [vmem:[#allocation13 + $0x1ac] ss:$16 sps:$4 sm:$0xff]  }
 0x443   : > { %2572 = vmatprep.subr.bf16.mxu0 %v10175_v17  ;;  %2613 = vmatprep.subr.bf16.mxu1 %v10178_v18  ;;  %v10263_v16 = vld [vmem:[#allocation13 + $0x3ac] ss:$16 sps:$4 sm:$0xff]   ;;  %v10258_v17 = vld [vmem:[#allocation13 + $0x1a8] ss:$16 sps:$4 sm:$0xff]  }
 0x444   : > { %v10261_v18 = vld [vmem:[#allocation13 + $0x3a8] ss:$16 sps:$4 sm:$0xff]  }
 0x446   : > { %2573 = vmatpush1.bf16.msra.mxu0 %v10173_v19  ;;  %2614 = vmatpush1.bf16.msra.mxu1 %v10176_v20  ;;  %v10266_v19 = vld [vmem:[#allocation13 + $0x1cc] ss:$16 sps:$4 sm:$0xff]  }
 0x447   : > { %2624 = vmatprep.subr.bf16.mxu0 %v10181_v23  ;;  %2665 = vmatprep.subr.bf16.mxu1 %v10185_v24  ;;  %v10269_v20 = vld [vmem:[#allocation13 + $0x3cc] ss:$16 sps:$4 sm:$0xff]   ;;  %v10264_v23 = vld [vmem:[#allocation13 + $0x1c8] ss:$16 sps:$4 sm:$0xff]  }
 0x448   : > { %v10267_v24 = vld [vmem:[#allocation13 + $0x3c8] ss:$16 sps:$4 sm:$0xff]  }
 0x449   : > { %2575 = vmatmul.mubr.bf16.vlgmr.msra.gmra.mrb[8].mxu0 %v12522_v25  ;;  %2616 = vmatmul.mubr.bf16.vlgmr.msra.gmra.mrb[8].mxu1 %v12526_v26 }
 0x44a   : > { %2625 = vmatpush1.bf16.msra.mxu0 %v10179_v27  ;;  %2666 = vmatpush1.bf16.msra.mxu1 %v10183_v28  ;;  %v10272_v27 = vld [vmem:[#allocation13 + $0x1ec] ss:$16 sps:$4 sm:$0xff]  }
 0x44b   : > { %2626 = vmatprep.subr.bf16.mxu0 %v10188_v29  ;;  %2667 = vmatprep.subr.bf16.mxu1 %v10191_v30  ;;  %v10275_v28 = vld [vmem:[#allocation13 + $0x3ec] ss:$16 sps:$4 sm:$0xff]   ;;  %v10270_v29 = vld [vmem:[#allocation13 + $0x1e8] ss:$16 sps:$4 sm:$0xff]  }
 0x44c   : > { %2656 = vmatprep.mubr.bf16.mxu0 %v12514_v21  ;;  %2697 = vmatprep.mubr.bf16.mxu1 %v12516_v22  ;;  %v10273_v30 = vld [vmem:[#allocation13 + $0x3e8] ss:$16 sps:$4 sm:$0xff]  }
 0x44e   : > { %2627 = vmatpush1.bf16.msra.mxu0 %v10186_v6  ;;  %2668 = vmatpush1.bf16.msra.mxu1 %v10189_v31  ;;  %v10278_v6 = vld [vmem:[#allocation18 + $0x4] ss:$8 sps:$4 sm:$0xff]   ;;  %v10276_v31 = vld [vmem:[#allocation18] ss:$8 sps:$4 sm:$0xff]  }
 0x44f   : > { %2628 = vmatprep.subr.bf16.mxu0 %v10194_v7  ;;  %2669 = vmatprep.subr.bf16.mxu1 %v10197_v32  ;;  %v10281_v7 = vld [vmem:[#allocation18 + $0x14] ss:$8 sps:$4 sm:$0xff]   ;;  %v10279_v32 = vld [vmem:[#allocation18 + $0x10] ss:$8 sps:$4 sm:$0xff]  }
 0x452   : > { %2629 = vmatpush1.bf16.msra.mxu0 %v10192_v33  ;;  %2670 = vmatpush1.bf16.msra.mxu1 %v10195_v34  ;;  %v10284_v33 = vld [vmem:[#allocation18 + $0x24] ss:$8 sps:$4 sm:$0xff]   ;;  %v10282_v34 = vld [vmem:[#allocation18 + $0x20] ss:$8 sps:$4 sm:$0xff]  }
 0x453   : > { %2630 = vmatprep.subr.bf16.mxu0 %v10200_v35  ;;  %2671 = vmatprep.subr.bf16.mxu1 %v10203_v36  ;;  %v10287_v35 = vld [vmem:[#allocation18 + $0x34] ss:$8 sps:$4 sm:$0xff]   ;;  %v10285_v36 = vld [vmem:[#allocation18 + $0x30] ss:$8 sps:$4 sm:$0xff]  }
 0x456   : > { %2631 = vmatpush1.bf16.msra.mxu0 %v10198_v37  ;;  %2672 = vmatpush1.bf16.msra.mxu1 %v10201_v38  ;;  %v10290_v37 = vld [vmem:[#allocation18 + $0x44] ss:$8 sps:$4 sm:$0xff]   ;;  %v10288_v38 = vld [vmem:[#allocation18 + $0x40] ss:$8 sps:$4 sm:$0xff]  }
 0x457   : > { %2632 = vmatprep.subr.bf16.mxu0 %v10206_v39  ;;  %2673 = vmatprep.subr.bf16.mxu1 %v10209_v40  ;;  %v10293_v39 = vld [vmem:[#allocation18 + $0x54] ss:$8 sps:$4 sm:$0xff]   ;;  %v10291_v40 = vld [vmem:[#allocation18 + $0x50] ss:$8 sps:$4 sm:$0xff]  }
 0x45a   : > { %2633 = vmatpush1.bf16.msra.mxu0 %v10204_v41  ;;  %2674 = vmatpush1.bf16.msra.mxu1 %v10207_v42  ;;  %v10296_v41 = vld [vmem:[#allocation18 + $0x64] ss:$8 sps:$4 sm:$0xff]   ;;  %v10299_v42 = vld [vmem:[#allocation18 + $0x74] ss:$8 sps:$4 sm:$0xff]  }
 0x45b   : > { %2634 = vmatprep.subr.bf16.mxu0 %v10212_v43  ;;  %2675 = vmatprep.subr.bf16.mxu1 %v10215_v44  ;;  %v10297_v43 = vld [vmem:[#allocation18 + $0x70] ss:$8 sps:$4 sm:$0xff]   ;;  %v10302_v44 = vld [vmem:[#allocation18 + $0x84] ss:$8 sps:$4 sm:$0xff]  }
 0x45e   : > { %2635 = vmatpush1.bf16.msra.mxu0 %v10210_v45  ;;  %2676 = vmatpush1.bf16.msra.mxu1 %v10213_v46  ;;  %v10300_v45 = vld [vmem:[#allocation18 + $0x80] ss:$8 sps:$4 sm:$0xff]   ;;  %v10305_v46 = vld [vmem:[#allocation18 + $0x94] ss:$8 sps:$4 sm:$0xff]  }
 0x45f   : > { %2636 = vmatprep.subr.bf16.mxu0 %v10218_v47  ;;  %2677 = vmatprep.subr.bf16.mxu1 %v10221_v48  ;;  %v10303_v47 = vld [vmem:[#allocation18 + $0x90] ss:$8 sps:$4 sm:$0xff]   ;;  %v10308_v48 = vld [vmem:[#allocation18 + $0xa4] ss:$8 sps:$4 sm:$0xff]  }
 0x462   : > { %2637 = vmatpush1.bf16.msra.mxu0 %v10216_v49  ;;  %2678 = vmatpush1.bf16.msra.mxu1 %v10219_v50  ;;  %v10306_v49 = vld [vmem:[#allocation18 + $0xa0] ss:$8 sps:$4 sm:$0xff]   ;;  %v10311_v50 = vld [vmem:[#allocation18 + $0xb4] ss:$8 sps:$4 sm:$0xff]  }
 0x463   : > { %2638 = vmatprep.subr.bf16.mxu0 %v10224_v51  ;;  %2679 = vmatprep.subr.bf16.mxu1 %v10227_v52  ;;  %v10309_v51 = vld [vmem:[#allocation18 + $0xb0] ss:$8 sps:$4 sm:$0xff]   ;;  %v10314_v52 = vld [vmem:[#allocation18 + $0xc4] ss:$8 sps:$4 sm:$0xff]  }
 0x466   : > { %2639 = vmatpush1.bf16.msra.mxu0 %v10222_v53  ;;  %2680 = vmatpush1.bf16.msra.mxu1 %v10225_v54  ;;  %v10312_v53 = vld [vmem:[#allocation18 + $0xc0] ss:$8 sps:$4 sm:$0xff]   ;;  %v10317_v54 = vld [vmem:[#allocation18 + $0xd4] ss:$8 sps:$4 sm:$0xff]  }
 0x467   : > { %2640 = vmatprep.subr.bf16.mxu0 %v10230_v55  ;;  %2681 = vmatprep.subr.bf16.mxu1 %v10233_v56  ;;  %v10315_v55 = vld [vmem:[#allocation18 + $0xd0] ss:$8 sps:$4 sm:$0xff]   ;;  %v10320_v56 = vld [vmem:[#allocation18 + $0xe4] ss:$8 sps:$4 sm:$0xff]  }
 0x46a   : > { %2641 = vmatpush1.bf16.msra.mxu0 %v10228_v57  ;;  %2682 = vmatpush1.bf16.msra.mxu1 %v10231_v58  ;;  %v10318_v57 = vld [vmem:[#allocation18 + $0xe0] ss:$8 sps:$4 sm:$0xff]   ;;  %v10323_v58 = vld [vmem:[#allocation18 + $0xf4] ss:$8 sps:$4 sm:$0xff]  }
 0x46b   : > { %2642 = vmatprep.subr.bf16.mxu0 %v10236_v59  ;;  %2683 = vmatprep.subr.bf16.mxu1 %v10239_v60  ;;  %v10321_v59 = vld [vmem:[#allocation18 + $0xf0] ss:$8 sps:$4 sm:$0xff]   ;;  %v10326_v60 = vld [vmem:[#allocation18 + $0x104] ss:$8 sps:$4 sm:$0xff]  }
 0x46e   : > { %2643 = vmatpush1.bf16.msra.mxu0 %v10234_v61  ;;  %2684 = vmatpush1.bf16.msra.mxu1 %v10237_v62  ;;  %v10324_v61 = vld [vmem:[#allocation18 + $0x100] ss:$8 sps:$4 sm:$0xff]   ;;  %v10329_v62 = vld [vmem:[#allocation18 + $0x114] ss:$8 sps:$4 sm:$0xff]  }
 0x46f   : > { %2644 = vmatprep.subr.bf16.mxu0 %v10242_v63  ;;  %2685 = vmatprep.subr.bf16.mxu1 %v10245_v0  ;;  %v10327_v63 = vld [vmem:[#allocation18 + $0x110] ss:$8 sps:$4 sm:$0xff]   ;;  %v10332_v0 = vld [vmem:[#allocation18 + $0x124] ss:$8 sps:$4 sm:$0xff]  }
 0x472   : > { %2645 = vmatpush1.bf16.msra.mxu0 %v10240_v2  ;;  %2686 = vmatpush1.bf16.msra.mxu1 %v10243_v4  ;;  %v10330_v2 = vld [vmem:[#allocation18 + $0x120] ss:$8 sps:$4 sm:$0xff]   ;;  %v10335_v4 = vld [vmem:[#allocation18 + $0x134] ss:$8 sps:$4 sm:$0xff]  }
 0x473   : > { %2646 = vmatprep.subr.bf16.mxu0 %v10248_v5  ;;  %2687 = vmatprep.subr.bf16.mxu1 %v10251_v8  ;;  %v10333_v5 = vld [vmem:[#allocation18 + $0x130] ss:$8 sps:$4 sm:$0xff]   ;;  %v10338_v8 = vld [vmem:[#allocation18 + $0x144] ss:$8 sps:$4 sm:$0xff]  }
 0x476   : > { %2647 = vmatpush1.bf16.msra.mxu0 %v10246_v9  ;;  %2688 = vmatpush1.bf16.msra.mxu1 %v10249_v10  ;;  %v10336_v9 = vld [vmem:[#allocation18 + $0x140] ss:$8 sps:$4 sm:$0xff]   ;;  %v10341_v10 = vld [vmem:[#allocation18 + $0x154] ss:$8 sps:$4 sm:$0xff]  }
 0x477   : > { %2648 = vmatprep.subr.bf16.mxu0 %v10254_v11  ;;  %2689 = vmatprep.subr.bf16.mxu1 %v10257_v12  ;;  %v10344_v11 = vld [vmem:[#allocation18 + $0x164] ss:$8 sps:$4 sm:$0xff]  }
 0x47a   : > { %2649 = vmatpush1.bf16.msra.mxu0 %v10252_v13  ;;  %2690 = vmatpush1.bf16.msra.mxu1 %v10255_v14 }
 0x47b   : > { %2650 = vmatprep.subr.bf16.mxu0 %v10260_v15  ;;  %2691 = vmatprep.subr.bf16.mxu1 %v10263_v16 }
 0x47e   : > { %2651 = vmatpush1.bf16.msra.mxu0 %v10258_v17  ;;  %2692 = vmatpush1.bf16.msra.mxu1 %v10261_v18  ;;  %v10342_v17 = vld [vmem:[#allocation18 + $0x160] ss:$8 sps:$4 sm:$0xff]  }
 0x47f   : > { %2652 = vmatprep.subr.bf16.mxu0 %v10266_v19  ;;  %2693 = vmatprep.subr.bf16.mxu1 %v10269_v20  ;;  %v10347_v20 = vld [vmem:[#allocation18 + $0x174] ss:$8 sps:$4 sm:$0xff]  }
 0x482   : > { %2653 = vmatpush1.bf16.msra.mxu0 %v10264_v23  ;;  %2694 = vmatpush1.bf16.msra.mxu1 %v10267_v24  ;;  %v10345_v23 = vld [vmem:[#allocation18 + $0x170] ss:$8 sps:$4 sm:$0xff]   ;;  %v10350_v24 = vld [vmem:[#allocation18 + $0x184] ss:$8 sps:$4 sm:$0xff]  }
 0x483   : > { %2654 = vmatprep.subr.bf16.mxu0 %v10272_v27  ;;  %2695 = vmatprep.subr.bf16.mxu1 %v10275_v28  ;;  %v10348_v27 = vld [vmem:[#allocation18 + $0x180] ss:$8 sps:$4 sm:$0xff]   ;;  %v10353_v28 = vld [vmem:[#allocation18 + $0x194] ss:$8 sps:$4 sm:$0xff]  }
 0x486   : > { %2655 = vmatpush1.bf16.msra.mxu0 %v10270_v29  ;;  %2696 = vmatpush1.bf16.msra.mxu1 %v10273_v30  ;;  %v10351_v29 = vld [vmem:[#allocation18 + $0x190] ss:$8 sps:$4 sm:$0xff]   ;;  %v10356_v30 = vld [vmem:[#allocation18 + $0x1a4] ss:$8 sps:$4 sm:$0xff]  }
 0x487   : > { %3155 = vmatprep.subr.bf16.mxu0 %v10278_v6  ;;  %v10372_v6 = vld [vmem:[#allocation21] ss:$8 sps:$4 sm:$0xff]  }
 0x489   : > { %2657 = vmatmul.mubr.bf16.vlgmr.msra.gmra.mrb[12].mxu0 %v12522_v25  ;;  %2698 = vmatmul.mubr.bf16.vlgmr.msra.gmra.mrb[12].mxu1 %v12526_v26 }
 0x48a   : > { %3156 = vmatpush1.bf16.msra.mxu0 %v10276_v31  ;;  %3187 = vmatprep.mubr.bf16.mxu0 %v12514_v21  ;;  %v10294_v21 = vld [vmem:[#allocation18 + $0x60] ss:$8 sps:$4 sm:$0xff]  }
 0x48b   : > { %3157 = vmatprep.subr.bf16.mxu0 %v10281_v7  ;;  %v10374_v31 = vld [vmem:[#allocation21 + $0x4] ss:$8 sps:$4 sm:$0xff]   ;;  %v10377_v7 = vld [vmem:[#allocation21 + $0x14] ss:$8 sps:$4 sm:$0xff]  }
 0x48c   : > { %3445 = vmatprep.subr.bf16.mxu1 %v10374_v31  ;;  %v2718_v31 = vsub.s32 2, %v12498_v1 }
 0x48d   : > { %3446 = vmatpush1.bf16.msra.mxu1 %v10372_v6 }
 0x48e   : > { %3158 = vmatpush1.bf16.msra.mxu0 %v10279_v32  ;;  %v10354_v32 = vld [vmem:[#allocation18 + $0x1a0] ss:$8 sps:$4 sm:$0xff]   ;;  %3447 = vmatprep.subr.bf16.mxu1 %v10377_v7  ;;  %v2722_v7 = vsub.s32 3, %v12498_v1 }
 0x48f   : > { %3159 = vmatprep.subr.bf16.mxu0 %v10284_v33  ;;  %v10359_v33 = vld [vmem:[#allocation18 + $0x1b4] ss:$8 sps:$4 sm:$0xff]  }
 0x492   : > { %3160 = vmatpush1.bf16.msra.mxu0 %v10282_v34  ;;  %v10375_v34 = vld [vmem:[#allocation21 + $0x10] ss:$8 sps:$4 sm:$0xff]  }
 0x493   : > { %3161 = vmatprep.subr.bf16.mxu0 %v10287_v35  ;;  %v10380_v35 = vld [vmem:[#allocation21 + $0x24] ss:$8 sps:$4 sm:$0xff]   ;;  %3448 = vmatpush1.bf16.msra.mxu1 %v10375_v34 }
 0x494   : > { %3449 = vmatprep.subr.bf16.mxu1 %v10380_v35  ;;  %v10414_v35 = vld [vmem:[#allocation21 + $0xe0] ss:$8 sps:$4 sm:$0xff]  }
 0x496   : > { %3162 = vmatpush1.bf16.msra.mxu0 %v10285_v36  ;;  %v10357_v36 = vld [vmem:[#allocation18 + $0x1b0] ss:$8 sps:$4 sm:$0xff]  }
 0x497   : > { %3163 = vmatprep.subr.bf16.mxu0 %v10290_v37  ;;  %v10362_v37 = vld [vmem:[#allocation18 + $0x1c4] ss:$8 sps:$4 sm:$0xff]  }
 0x49a   : > { %3164 = vmatpush1.bf16.msra.mxu0 %v10288_v38  ;;  %v10378_v38 = vld [vmem:[#allocation21 + $0x20] ss:$8 sps:$4 sm:$0xff]  }
 0x49b   : > { %3165 = vmatprep.subr.bf16.mxu0 %v10293_v39  ;;  %v10383_v39 = vld [vmem:[#allocation21 + $0x34] ss:$8 sps:$4 sm:$0xff]   ;;  %3450 = vmatpush1.bf16.msra.mxu1 %v10378_v38 }
 0x49c   : > { %3451 = vmatprep.subr.bf16.mxu1 %v10383_v39 }
 0x49e   : > { %3166 = vmatpush1.bf16.msra.mxu0 %v10291_v40  ;;  %v10360_v40 = vld [vmem:[#allocation18 + $0x1c0] ss:$8 sps:$4 sm:$0xff]  }
 0x49f   : > { %3167 = vmatprep.subr.bf16.mxu0 %v10296_v41  ;;  %v10365_v41 = vld [vmem:[#allocation18 + $0x1d4] ss:$8 sps:$4 sm:$0xff]  }
 0x4a2   : > { %3168 = vmatpush1.bf16.msra.mxu0 %v10294_v21  ;;  %v10381_v21 = vld [vmem:[#allocation21 + $0x30] ss:$8 sps:$4 sm:$0xff]  }
 0x4a3   : > { %3169 = vmatprep.subr.bf16.mxu0 %v10299_v42  ;;  %v10386_v42 = vld [vmem:[#allocation21 + $0x44] ss:$8 sps:$4 sm:$0xff]   ;;  %3452 = vmatpush1.bf16.msra.mxu1 %v10381_v21 }
 0x4a4   : > { %3453 = vmatprep.subr.bf16.mxu1 %v10386_v42 }
 0x4a6   : > { %3170 = vmatpush1.bf16.msra.mxu0 %v10297_v43  ;;  %v10363_v43 = vld [vmem:[#allocation18 + $0x1d0] ss:$8 sps:$4 sm:$0xff]  }
 0x4a7   : > { %3171 = vmatprep.subr.bf16.mxu0 %v10302_v44  ;;  %v10368_v44 = vld [vmem:[#allocation18 + $0x1e4] ss:$8 sps:$4 sm:$0xff]  }
 0x4aa   : > { %3172 = vmatpush1.bf16.msra.mxu0 %v10300_v45  ;;  %v10384_v45 = vld [vmem:[#allocation21 + $0x40] ss:$8 sps:$4 sm:$0xff]  }
 0x4ab   : > { %3173 = vmatprep.subr.bf16.mxu0 %v10305_v46  ;;  %v10389_v46 = vld [vmem:[#allocation21 + $0x54] ss:$8 sps:$4 sm:$0xff]   ;;  %3454 = vmatpush1.bf16.msra.mxu1 %v10384_v45 }
 0x4ac   : > { %3455 = vmatprep.subr.bf16.mxu1 %v10389_v46 }
 0x4ae   : > { %3174 = vmatpush1.bf16.msra.mxu0 %v10303_v47  ;;  %v10366_v47 = vld [vmem:[#allocation18 + $0x1e0] ss:$8 sps:$4 sm:$0xff]  }
 0x4af   : > { %3175 = vmatprep.subr.bf16.mxu0 %v10308_v48  ;;  %v10371_v48 = vld [vmem:[#allocation18 + $0x1f4] ss:$8 sps:$4 sm:$0xff]  }
 0x4b2   : > { %3176 = vmatpush1.bf16.msra.mxu0 %v10306_v49  ;;  %v10387_v49 = vld [vmem:[#allocation21 + $0x50] ss:$8 sps:$4 sm:$0xff]  }
 0x4b3   : > { %3177 = vmatprep.subr.bf16.mxu0 %v10311_v50  ;;  %v10392_v50 = vld [vmem:[#allocation21 + $0x64] ss:$8 sps:$4 sm:$0xff]   ;;  %3456 = vmatpush1.bf16.msra.mxu1 %v10387_v49 }
 0x4b4   : > { %3457 = vmatprep.subr.bf16.mxu1 %v10392_v50 }
 0x4b6   : > { %3178 = vmatpush1.bf16.msra.mxu0 %v10309_v51  ;;  %v10369_v51 = vld [vmem:[#allocation18 + $0x1f0] ss:$8 sps:$4 sm:$0xff]  }
 0x4b7   : > { %3179 = vmatprep.subr.bf16.mxu0 %v10314_v52  ;;  %v10390_v52 = vld [vmem:[#allocation21 + $0x60] ss:$8 sps:$4 sm:$0xff]  }
 0x4b8   : > { %3458 = vmatpush1.bf16.msra.mxu1 %v10390_v52 }
 0x4ba   : > { %3180 = vmatpush1.bf16.msra.mxu0 %v10312_v53  ;;  %v10395_v53 = vld [vmem:[#allocation21 + $0x74] ss:$8 sps:$4 sm:$0xff]  }
 0x4bb   : > { %3181 = vmatprep.subr.bf16.mxu0 %v10317_v54  ;;  %v10393_v54 = vld [vmem:[#allocation21 + $0x70] ss:$8 sps:$4 sm:$0xff]   ;;  %3459 = vmatprep.subr.bf16.mxu1 %v10395_v53 }
 0x4bc   : > { %3460 = vmatpush1.bf16.msra.mxu1 %v10393_v54 }
 0x4be   : > { %3182 = vmatpush1.bf16.msra.mxu0 %v10315_v55  ;;  %v10398_v55 = vld [vmem:[#allocation21 + $0x84] ss:$8 sps:$4 sm:$0xff]  }
 0x4bf   : > { %3183 = vmatprep.subr.bf16.mxu0 %v10320_v56  ;;  %v10396_v56 = vld [vmem:[#allocation21 + $0x80] ss:$8 sps:$4 sm:$0xff]   ;;  %3461 = vmatprep.subr.bf16.mxu1 %v10398_v55  ;;  %v2823_v55 = vld [vmem:[#allocation19] sm:$0x3] }
 0x4c0   : > { %3462 = vmatpush1.bf16.msra.mxu1 %v10396_v56 }
 0x4c2   : > { %3184 = vmatpush1.bf16.msra.mxu0 %v10318_v57  ;;  %v10401_v57 = vld [vmem:[#allocation21 + $0x94] ss:$8 sps:$4 sm:$0xff]  }
 0x4c3   : > { %3185 = vmatprep.subr.bf16.mxu0 %v10323_v58  ;;  %v10399_v58 = vld [vmem:[#allocation21 + $0x90] ss:$8 sps:$4 sm:$0xff]   ;;  %3463 = vmatprep.subr.bf16.mxu1 %v10401_v57 }
 0x4c4   : > { %3464 = vmatpush1.bf16.msra.mxu1 %v10399_v58 }
 0x4c6   : > { %3186 = vmatpush1.bf16.msra.mxu0 %v10321_v59  ;;  %v10404_v59 = vld [vmem:[#allocation21 + $0xa4] ss:$8 sps:$4 sm:$0xff]  }
 0x4c7   : > { %3196 = vmatprep.subr.bf16.mxu0 %v10326_v60  ;;  %v10402_v60 = vld [vmem:[#allocation21 + $0xa0] ss:$8 sps:$4 sm:$0xff]   ;;  %3465 = vmatprep.subr.bf16.mxu1 %v10404_v59 }
 0x4c8   : > { %3466 = vmatpush1.bf16.msra.mxu1 %v10402_v60 }
 0x4c9   : > { %3188 = vmatmul.mubr.bf16.vlgmr.msra.gmra.mrb[16].mxu0 %v12522_v25  ;;  %v10339_v25 = vld [vmem:[#allocation18 + $0x150] ss:$8 sps:$4 sm:$0xff]  }
 0x4ca   : > { %3197 = vmatpush1.bf16.msra.mxu0 %v10324_v61  ;;  %3228 = vmatprep.mubr.bf16.mxu0 %v12516_v22  ;;  %v10407_v61 = vld [vmem:[#allocation21 + $0xb4] ss:$8 sps:$4 sm:$0xff]  }
 0x4cb   : > { %3198 = vmatprep.subr.bf16.mxu0 %v10329_v62  ;;  %v10405_v62 = vld [vmem:[#allocation21 + $0xb0] ss:$8 sps:$4 sm:$0xff]   ;;  %3467 = vmatprep.subr.bf16.mxu1 %v10407_v61 }
 0x4cc   : > { %3468 = vmatpush1.bf16.msra.mxu1 %v10405_v62 }
 0x4ce   : > { %3199 = vmatpush1.bf16.msra.mxu0 %v10327_v63  ;;  %v10410_v63 = vld [vmem:[#allocation21 + $0xc4] ss:$8 sps:$4 sm:$0xff]  }
 0x4cf   : > { %3200 = vmatprep.subr.bf16.mxu0 %v10332_v0  ;;  %v12547_v0 = vsub.s32 0, %v12498_v1  ;;  %3469 = vmatprep.subr.bf16.mxu1 %v10410_v63 }
 0x4d1   : > { %v2828_v56 = vrot.slane %v2823_v55, %v12547_v0 }
 0x4d2   : > { %3201 = vmatpush1.bf16.msra.mxu0 %v10330_v2  ;;  %v12550_v2 = vsub.s32 1, %v12498_v1  ;;  %v10419_v1 = vld [vmem:[#allocation21 + $0xf4] ss:$8 sps:$4 sm:$0xff]  }
 0x4d3   : > { %3202 = vmatprep.subr.bf16.mxu0 %v10335_v4  ;;  %v10408_v4 = vld [vmem:[#allocation21 + $0xc0] ss:$8 sps:$4 sm:$0xff]  }
 0x4d4   : > { %3470 = vmatpush1.bf16.msra.mxu1 %v10408_v4  ;;  %v2832_v57 = vrot.slane %v2823_v55, %v12550_v2  ;;  %v10460_v55 = vld [vmem:[#allocation24 + $0x80] ss:$8 sps:$4 sm:$0xff]  }
 0x4d6   : > { %3203 = vmatpush1.bf16.msra.mxu0 %v10333_v5 }
 0x4d7   : > { %3204 = vmatprep.subr.bf16.mxu0 %v10338_v8 }
 0x4da   : > { %3205 = vmatpush1.bf16.msra.mxu0 %v10336_v9  ;;  %v10413_v9 = vld [vmem:[#allocation21 + $0xd4] ss:$8 sps:$4 sm:$0xff]  }
 0x4db   : > { %3206 = vmatprep.subr.bf16.mxu0 %v10341_v10  ;;  %3471 = vmatprep.subr.bf16.mxu1 %v10413_v9  ;;  %v10422_v9 = vld [vmem:[%s13286_s1 + $0x48] sm:$0xff]  }
 0x4dc   : > { %v12537_v12 = vpop.f32.mrb[4].mxu0  ;;  %v12539_v22 = vpop.f32.mrb[4].mxu1 }
 0x4dd   : > { %v12541_v13 = vpop.f32.mrb[5].mxu0  ;;  %v12543_v14 = vpop.f32.mrb[5].mxu1 }
 0x4de   : > { %3207 = vmatpush1.bf16.msra.mxu0 %v10339_v25  ;;  %v1858_v15 = vpop.f32.mrb[6].mxu0  ;;  %v1899_v16 = vpop.f32.mrb[6].mxu1 }
 0x4df   : > { %v1859_v18 = vpop.f32.mrb[7].mxu0  ;;  %v1900_v19 = vpop.f32.mrb[7].mxu1  ;;  %3208 = vmatprep.subr.bf16.mxu0 %v10344_v11 }
 0x4e2   : > { %3209 = vmatpush1.bf16.msra.mxu0 %v10342_v17 }
 0x4e3   : > { %3210 = vmatprep.subr.bf16.mxu0 %v10347_v20 }
 0x4e6   : > { %3211 = vmatpush1.bf16.msra.mxu0 %v10345_v23 }
 0x4e7   : > { %3212 = vmatprep.subr.bf16.mxu0 %v10350_v24 }
 0x4ea   : > { %3213 = vmatpush1.bf16.msra.mxu0 %v10348_v27  ;;  %v10411_v27 = vld [vmem:[#allocation21 + $0xd0] ss:$8 sps:$4 sm:$0xff]  }
 0x4eb   : > { %3214 = vmatprep.subr.bf16.mxu0 %v10353_v28  ;;  %3472 = vmatpush1.bf16.msra.mxu1 %v10411_v27  ;;  %v10434_v27 = vld [vmem:[%s13286_s1 + $0x78] sm:$0xff]  }
 0x4ee   : > { %3215 = vmatpush1.bf16.msra.mxu0 %v10351_v29 }
 0x4ef   : > { %3216 = vmatprep.subr.bf16.mxu0 %v10356_v30 }
 0x4f2   : > { %3217 = vmatpush1.bf16.msra.mxu0 %v10354_v32  ;;  %v10416_v32 = vld [vmem:[#allocation21 + $0xe4] ss:$8 sps:$4 sm:$0xff]  }
 0x4f3   : > { %3218 = vmatprep.subr.bf16.mxu0 %v10359_v33  ;;  %3473 = vmatprep.subr.bf16.mxu1 %v10416_v32 }
 0x4f4   : > { %3474 = vmatpush1.bf16.msra.mxu1 %v10414_v35 }
 0x4f5   : > { %3475 = vmatprep.subr.bf16.mxu1 %v10419_v1  ;;  %v10442_v1 = vld [vmem:[#allocation24 + $0x20] ss:$8 sps:$4 sm:$0xff]  }
 0x4f6   : > { %3219 = vmatpush1.bf16.msra.mxu0 %v10357_v36 }
 0x4f7   : > { %3220 = vmatprep.subr.bf16.mxu0 %v10362_v37 }
 0x4fa   : > { %3221 = vmatpush1.bf16.msra.mxu0 %v10360_v40 }
 0x4fb   : > { %3222 = vmatprep.subr.bf16.mxu0 %v10365_v41 }
 0x4fe   : > { %3223 = vmatpush1.bf16.msra.mxu0 %v10363_v43 }
 0x4ff   : > { %3224 = vmatprep.subr.bf16.mxu0 %v10368_v44 }
 0x502   : > { %3225 = vmatpush1.bf16.msra.mxu0 %v10366_v47  ;;  %v10417_v47 = vld [vmem:[#allocation21 + $0xf0] ss:$8 sps:$4 sm:$0xff]  }
 0x503   : > { %3226 = vmatprep.subr.bf16.mxu0 %v10371_v48  ;;  %3476 = vmatpush1.bf16.msra.mxu1 %v10417_v47  ;;  %v10450_v47 = vld [vmem:[#allocation24 + $0x44] ss:$8 sps:$4 sm:$0xff]  }
 0x506   : > { %3227 = vmatpush1.bf16.msra.mxu0 %v10369_v51 }
 0x509   : > { %3229 = vmatmul.mubr.bf16.vlgmr.msra.gmra.mrb[16].mxu0 %v12526_v26  ;;  %v2706_v26 = vld [vmem:[#allocation16] sm:$0xf] }
 0x50a   : > { %v2711_v11 = vrot.slane %v2706_v26, %v12547_v0  ;;  %v2715_v18 = vrot.slane %v2706_v26, %v12550_v2  ;;  %v2719_v38 = vrot.slane %v2706_v26, %v2718_v31  ;;  %v2723_v21 = vrot.slane %v2706_v26, %v2722_v7 }
 0x51c   : > { %v2576_v5 = vpop.f32.mrb[8].mxu0  ;;  %v2617_v8 = vpop.f32.mrb[8].mxu1 }
 0x51d   : > { %v2577_v10 = vadd.f32 %v2576_v5, %v12537_v12  ;;  %v2578_v25 = vpop.f32.mrb[9].mxu0  ;;  %v2619_v15 = vpop.f32.mrb[9].mxu1  ;;  %v10421_v5 = vld [vmem:[%s13286_s1] sm:$0xff]  }
 0x51e   : > { %v2579_v16 = vadd.f32 %v2578_v25, %v12541_v13  ;;  %v2580_v17 = vpop.f32.mrb[10].mxu0  ;;  %v2621_v19 = vpop.f32.mrb[10].mxu1  ;;  %v10424_v25 = vld [vmem:[%s13286_s1 + $0x50] sm:$0xff]  }
 0x51f   : > { %v2618_v20 = vadd.f32 %v2617_v8, %v2577_v10  ;;  %v2581_v23 = vpop.f32.mrb[11].mxu0  ;;  %v2622_v24 = vpop.f32.mrb[11].mxu1  ;;  %v10423_v10 = vld [vmem:[%s13286_s1 + $0x8] sm:$0xff]   ;;  %v10428_v17 = vld [vmem:[%s13286_s1 + $0x60] sm:$0xff]  }
 0x520   : > { %v2620_v28 = vadd.f32 %v2619_v15, %v2579_v16  ;;  %v10426_v15 = vld [vmem:[%s13286_s1 + $0x58] sm:$0xff]   ;;  %v10430_v19 = vld [vmem:[%s13286_s1 + $0x68] sm:$0xff]   ;;  %v10432_v23 = vld [vmem:[%s13286_s1 + $0x70] sm:$0xff]  }
 0x521   : > { %v2728_v29 = vadd.f32 %v2711_v11, %v2618_v20  ;;  %v10425_v11 = vld [vmem:[%s13286_s1 + $0x10] sm:$0xff]   ;;  %v10427_v16 = vld [vmem:[%s13286_s1 + $0x18] sm:$0xff]   ;;  %v10431_v20 = vld [vmem:[%s13286_s1 + $0x28] sm:$0xff]  }
 0x522   : > { %v2729_v30 = vadd.f32 %v2715_v18, %v2620_v28  ;;  %v10429_v18 = vld [vmem:[%s13286_s1 + $0x20] sm:$0xff]   ;;  %v10433_v24 = vld [vmem:[%s13286_s1 + $0x30] sm:$0xff]   ;;  %v10435_v28 = vld [vmem:[%s13286_s1 + $0x38] sm:$0xff]  }
 0x523   : > { %v12556_v12 = vmax.f32 %v2728_v29, 0.0  ;;  %v10438_v29 = vld [vmem:[#allocation24 + $0x4] ss:$8 sps:$4 sm:$0xff]  }
 0x524   : > { %v12558_v6 = vmax.f32 %v2729_v30, 0.0  ;;  %v3271_v30 = vld [vmem:[#allocation22] sm:$0x3] }
 0x525   : > { %v3282_v31 = vrot.slane %v3271_v30, %v12550_v2 }
 0x526   : > { %v2740_v13 = vcombine.low %v12556_v12, %v12558_v6 }
 0x528   : > { %v2748_v52 = vrot.slane %v2740_v13, %v12502_v3  ;;  %v3278_v13 = vrot.slane %v3271_v30, %v12547_v0  ;;  %v10507_v30 = vld [vmem:[#allocation24 + $0x174] ss:$8 sps:$4 sm:$0xff]  }
 0x55c   : > { %v2658_v33 = vpop.f32.mrb[12].mxu0  ;;  %v2699_v34 = vpop.f32.mrb[12].mxu1 }
 0x55d   : > { %v2659_v36 = vadd.f32 %v2658_v33, %v12539_v22  ;;  %v2660_v37 = vpop.f32.mrb[13].mxu0  ;;  %v2701_v39 = vpop.f32.mrb[13].mxu1 }
 0x55e   : > { %v2661_v40 = vadd.f32 %v2660_v37, %v12543_v14  ;;  %v2662_v41 = vpop.f32.mrb[14].mxu0  ;;  %v2703_v42 = vpop.f32.mrb[14].mxu1  ;;  %v10420_v14 = vld [vmem:[%s13286_s1 + $0x40] sm:$0xff]  }
 0x55f   : > { %v2700_v43 = vadd.f32 %v2699_v34, %v2659_v36  ;;  %v2663_v44 = vpop.f32.mrb[15].mxu0  ;;  %v2704_v45 = vpop.f32.mrb[15].mxu1  ;;  %9579 = vmatprep.subr.bf16.mxu1 %v10420_v14  ;;  %v3739_v42 = vpack.c.bf16 %v12558_v6, %v12558_v6  ;;  %v10451_v6 = vld [vmem:[#allocation24 + $0x50] ss:$8 sps:$4 sm:$0xff]   ;;  %v10456_v14 = vld [vmem:[#allocation24 + $0x64] ss:$8 sps:$4 sm:$0xff]  }
 0x560   : > { %v2702_v46 = vadd.f32 %v2701_v39, %v2661_v40  ;;  %v10436_v40 = vld [vmem:[#allocation24] ss:$8 sps:$4 sm:$0xff]   ;;  %v10444_v44 = vld [vmem:[#allocation24 + $0x24] ss:$8 sps:$4 sm:$0xff]   ;;  %v10447_v45 = vld [vmem:[#allocation24 + $0x34] ss:$8 sps:$4 sm:$0xff]  }
 0x561   : > { %v2730_v48 = vadd.f32 %v2719_v38, %v2700_v43  ;;  %v10439_v43 = vld [vmem:[#allocation24 + $0x10] ss:$8 sps:$4 sm:$0xff]  }
 0x562   : > { %v2731_v22 = vadd.f32 %v2723_v21, %v2702_v46  ;;  %v10441_v21 = vld [vmem:[#allocation24 + $0x14] ss:$8 sps:$4 sm:$0xff]   ;;  %v10445_v46 = vld [vmem:[#allocation24 + $0x30] ss:$8 sps:$4 sm:$0xff]  }
 0x563   : > { %v12566_v49 = vmax.f32 %v2730_v48, 0.0  ;;  %v10448_v48 = vld [vmem:[#allocation24 + $0x40] ss:$8 sps:$4 sm:$0xff]  }
 0x564   : > { %v12568_v50 = vmax.f32 %v2731_v22, 0.0  ;;  %v10453_v22 = vld [vmem:[#allocation24 + $0x54] ss:$8 sps:$4 sm:$0xff]  }
 0x566   : > { %v2741_v51 = vcombine.low %v12566_v49, %v12568_v50 }
 0x568   : > { %v2755_v53 = vrot.slane %v2741_v51, %v12502_v3  ;;  %v10454_v51 = vld [vmem:[#allocation24 + $0x60] ss:$8 sps:$4 sm:$0xff]  }
 0x56a   : > { %v2756_v54 = vcombine.low %v2748_v52, %v2755_v53  ;;  %v10459_v52 = vld [vmem:[#allocation24 + $0x74] ss:$8 sps:$4 sm:$0xff]   ;;  %v10457_v53 = vld [vmem:[#allocation24 + $0x70] ss:$8 sps:$4 sm:$0xff]  }
 0x56c   : > { %2758 = vst [vmem:[#allocation2] sm:$0xff] %v2756_v54  ;;  %v10462_v54 = vld [vmem:[#allocation24 + $0x84] ss:$8 sps:$4 sm:$0xff]  }
 0x5dc   : > { %v3230_v58 = vpop.f32.mrb[16].mxu0 }
 0x5dd   : > { %v9737_v59 = vadd.f32 %v3230_v58, %v2828_v56  ;;  %v3232_v60 = vpop.f32.mrb[17].mxu0  ;;  %v10465_v56 = vld [vmem:[#allocation24 + $0x94] ss:$8 sps:$4 sm:$0xff]   ;;  %v10468_v58 = vld [vmem:[#allocation24 + $0xa4] ss:$8 sps:$4 sm:$0xff]  }
 0x5de   : > { %v9738_v61 = vadd.f32 %v3232_v60, %v2832_v57  ;;  %v3234_v62 = vpop.f32.mrb[18].mxu0  ;;  %v10463_v57 = vld [vmem:[#allocation24 + $0x90] ss:$8 sps:$4 sm:$0xff]   ;;  %v10471_v60 = vld [vmem:[#allocation24 + $0xb4] ss:$8 sps:$4 sm:$0xff]  }
 0x5df   : > { %v3237_v63 = vmax.f32 %v9737_v59, 0.0  ;;  %v3235_v26 = vpop.f32.mrb[19].mxu0  ;;  %v10466_v59 = vld [vmem:[#allocation24 + $0xa0] ss:$8 sps:$4 sm:$0xff]   ;;  %v10474_v62 = vld [vmem:[#allocation24 + $0xc4] ss:$8 sps:$4 sm:$0xff]  }
 0x5e0   : > { %v3238_v3 = vmax.f32 %v9738_v61, 0.0  ;;  %v10469_v61 = vld [vmem:[#allocation24 + $0xb0] ss:$8 sps:$4 sm:$0xff]   ;;  %v10477_v26 = vld [vmem:[#allocation24 + $0xd4] ss:$8 sps:$4 sm:$0xff]  }
 0x5e1   : > { %v3272_v8 = vpack.c.bf16 %v3237_v63, %v3237_v63  ;;  %v10472_v63 = vld [vmem:[#allocation24 + $0xc0] ss:$8 sps:$4 sm:$0xff]  }
 0x5e2   : > { %v3273_v4 = vpack.c.bf16 %v3238_v3, %v3238_v3  ;;  %v10475_v3 = vld [vmem:[#allocation24 + $0xd0] ss:$8 sps:$4 sm:$0xff]  }
 0x5e4   : > { %3477 = vmatprep.mubr.bf16.mxu1 %v3273_v4  ;;  %v10480_v4 = vld [vmem:[#allocation24 + $0xe4] ss:$8 sps:$4 sm:$0xff]  }
 0x5e5   : > { %3478 = vmatmul.mubr.bf16.vlgmr.msra.gmra.mrb[16].mxu1 %v3272_v8  ;;  %v10483_v8 = vld [vmem:[#allocation24 + $0xf4] ss:$8 sps:$4 sm:$0xff]  }
 0x5e6   : > { %9580 = vmatpush3.bf16.msra.mxu1 %v10421_v5  ;;  %v10478_v5 = vld [vmem:[#allocation24 + $0xe0] ss:$8 sps:$4 sm:$0xff]  }
 0x5e7   : > { %9581 = vmatprep.subr.bf16.mxu1 %v10422_v9  ;;  %v10481_v9 = vld [vmem:[#allocation24 + $0xf0] ss:$8 sps:$4 sm:$0xff]  }
 0x5ea   : > { %9582 = vmatpush3.bf16.msra.mxu1 %v10423_v10  ;;  %v10486_v10 = vld [vmem:[#allocation24 + $0x104] ss:$8 sps:$4 sm:$0xff]  }
 0x5eb   : > { %9583 = vmatprep.subr.bf16.mxu1 %v10424_v25  ;;  %v10484_v25 = vld [vmem:[#allocation24 + $0x100] ss:$8 sps:$4 sm:$0xff]  }
 0x5ee   : > { %9584 = vmatpush3.bf16.msra.mxu1 %v10425_v11  ;;  %v3738_v11 = vpack.c.bf16 %v12556_v12, %v12556_v12  ;;  %v10496_v12 = vld [vmem:[#allocation24 + $0x140] ss:$8 sps:$4 sm:$0xff]  }
 0x5ef   : > { %9585 = vmatprep.subr.bf16.mxu1 %v10426_v15  ;;  %v10489_v15 = vld [vmem:[#allocation24 + $0x114] ss:$8 sps:$4 sm:$0xff]  }
 0x5f2   : > { %9586 = vmatpush3.bf16.msra.mxu1 %v10427_v16  ;;  %v3741_v16 = vpack.c.bf16 %v12568_v50, %v12568_v50  ;;  %v10499_v50 = vld [vmem:[#allocation24 + $0x150] ss:$8 sps:$4 sm:$0xff]  }
 0x5f3   : > { %9587 = vmatprep.subr.bf16.mxu1 %v10428_v17  ;;  %v10487_v17 = vld [vmem:[#allocation24 + $0x110] ss:$8 sps:$4 sm:$0xff]  }
 0x5f6   : > { %9588 = vmatpush3.bf16.msra.mxu1 %v10429_v18  ;;  %v10492_v18 = vld [vmem:[#allocation24 + $0x124] ss:$8 sps:$4 sm:$0xff]  }
 0x5f7   : > { %9589 = vmatprep.subr.bf16.mxu1 %v10430_v19  ;;  %v10490_v19 = vld [vmem:[#allocation24 + $0x120] ss:$8 sps:$4 sm:$0xff]  }
 0x5fa   : > { %9590 = vmatpush3.bf16.msra.mxu1 %v10431_v20  ;;  %v10495_v20 = vld [vmem:[#allocation24 + $0x134] ss:$8 sps:$4 sm:$0xff]  }
 0x5fb   : > { %9591 = vmatprep.subr.bf16.mxu1 %v10432_v23  ;;  %v10493_v23 = vld [vmem:[#allocation24 + $0x130] ss:$8 sps:$4 sm:$0xff]  }
 0x5fe   : > { %9592 = vmatpush3.bf16.msra.mxu1 %v10433_v24  ;;  %v10498_v24 = vld [vmem:[#allocation24 + $0x144] ss:$8 sps:$4 sm:$0xff]  }
 0x5ff   : > { %9593 = vmatprep.subr.bf16.mxu1 %v10434_v27  ;;  %v10501_v27 = vld [vmem:[#allocation24 + $0x154] ss:$8 sps:$4 sm:$0xff]  }
 0x602   : > { %9594 = vmatpush3.bf16.msra.mxu1 %v10435_v28  ;;  %v10504_v28 = vld [vmem:[#allocation24 + $0x164] ss:$8 sps:$4 sm:$0xff]  }
 0x603   : > { %4073 = vmatprep.subr.bf16.mxu1 %v10438_v29  ;;  %v10502_v29 = vld [vmem:[#allocation24 + $0x160] ss:$8 sps:$4 sm:$0xff]  }
 0x6b8   : > { %v3479_v7 = vpop.f32.mrb[16].mxu1 }
 0x6b9   : > { %v3480_v32 = vadd.f32 %v3479_v7, %v3278_v13  ;;  %v3481_v33 = vpop.f32.mrb[17].mxu1  ;;  %v10505_v13 = vld [vmem:[#allocation24 + $0x170] ss:$8 sps:$4 sm:$0xff]   ;;  %v10508_v7 = vld [vmem:[#allocation24 + $0x180] ss:$8 sps:$4 sm:$0xff]  }
 0x6ba   : > { %v3482_v34 = vadd.f32 %v3481_v33, %v3282_v31  ;;  %v3483_v35 = vpop.f32.mrb[18].mxu1  ;;  %v10510_v31 = vld [vmem:[#allocation24 + $0x184] ss:$8 sps:$4 sm:$0xff]   ;;  %v10511_v33 = vld [vmem:[#allocation24 + $0x190] ss:$8 sps:$4 sm:$0xff]  }
 0x6bb   : > { %v3486_v36 = vmax.f32 %v3480_v32, 0.0  ;;  %v3484_v37 = vpop.f32.mrb[19].mxu1  ;;  %v10513_v32 = vld [vmem:[#allocation24 + $0x194] ss:$8 sps:$4 sm:$0xff]   ;;  %v10514_v35 = vld [vmem:[#allocation24 + $0x1a0] ss:$8 sps:$4 sm:$0xff]  }
 0x6bc   : > { %v3487_v38 = vmax.f32 %v3482_v34, 0.0  ;;  %v10516_v34 = vld [vmem:[#allocation24 + $0x1a4] ss:$8 sps:$4 sm:$0xff]  }
 0x6bd   : > { %v3521_v41 = vpack.c.bf16 %v3486_v36, %v3486_v36  ;;  %v10519_v36 = vld [vmem:[#allocation24 + $0x1b4] ss:$8 sps:$4 sm:$0xff]   ;;  %v10532_v37 = vld [vmem:[#allocation27] ss:$8 sps:$4 sm:$0xff]  }
 0x6be   : > { %v3522_v39 = vpack.c.bf16 %v3487_v38, %v3487_v38  ;;  %v10534_v38 = vld [vmem:[#allocation27 + $0x4] ss:$8 sps:$4 sm:$0xff]  }
 0x6bf   : > { %4363 = vmatprep.subr.bf16.mxu0 %v10534_v38 }
 0x6c0   : > { %3657 = vmatprep.mubr.bf16.mxu1 %v3522_v39  ;;  %v10517_v39 = vld [vmem:[#allocation24 + $0x1b0] ss:$8 sps:$4 sm:$0xff]   ;;  %4364 = vmatpush1.bf16.msra.mxu0 %v10532_v37 }
 0x6c1   : > { %3658 = vmatmul.mubr.bf16.vlgmr.msra.gmra.mrb[20].mxu1 %v3521_v41  ;;  %v10522_v41 = vld [vmem:[#allocation24 + $0x1c4] ss:$8 sps:$4 sm:$0xff]  }
 0x6c2   : > { %4074 = vmatpush1.bf16.msra.mxu1 %v10436_v40  ;;  %4105 = vmatprep.mubr.bf16.mxu1 %v3739_v42  ;;  %v10537_v40 = vld [vmem:[#allocation27 + $0x14] ss:$8 sps:$4 sm:$0xff]   ;;  %v10540_v42 = vld [vmem:[#allocation27 + $0x24] ss:$8 sps:$4 sm:$0xff]  }
 0x6c3   : > { %4075 = vmatprep.subr.bf16.mxu1 %v10441_v21  ;;  %v10535_v21 = vld [vmem:[#allocation27 + $0x10] ss:$8 sps:$4 sm:$0xff]   ;;  %4365 = vmatprep.subr.bf16.mxu0 %v10537_v40 }
 0x6c4   : > { %4366 = vmatpush1.bf16.msra.mxu0 %v10535_v21 }
 0x6c5   : > { %4367 = vmatprep.subr.bf16.mxu0 %v10540_v42  ;;  %v10582_v42 = vld [vmem:[%s13287_s0 + $0x48] sm:$0xff]  }
 0x6c6   : > { %4076 = vmatpush1.bf16.msra.mxu1 %v10439_v43  ;;  %v10520_v43 = vld [vmem:[#allocation24 + $0x1c0] ss:$8 sps:$4 sm:$0xff]  }
 0x6c7   : > { %4077 = vmatprep.subr.bf16.mxu1 %v10444_v44  ;;  %v10525_v44 = vld [vmem:[#allocation24 + $0x1d4] ss:$8 sps:$4 sm:$0xff]  }
 0x6ca   : > { %4078 = vmatpush1.bf16.msra.mxu1 %v10442_v1  ;;  %v10538_v1 = vld [vmem:[#allocation27 + $0x20] ss:$8 sps:$4 sm:$0xff]  }
 0x6cb   : > { %4079 = vmatprep.subr.bf16.mxu1 %v10447_v45  ;;  %v10543_v45 = vld [vmem:[#allocation27 + $0x34] ss:$8 sps:$4 sm:$0xff]   ;;  %4368 = vmatpush1.bf16.msra.mxu0 %v10538_v1 }
 0x6cc   : > { %4369 = vmatprep.subr.bf16.mxu0 %v10543_v45  ;;  %v10585_v1 = vld [vmem:[%s13287_s0 + $0x10] sm:$0xff]   ;;  %v10586_v45 = vld [vmem:[%s13287_s0 + $0x58] sm:$0xff]  }
 0x6ce   : > { %4080 = vmatpush1.bf16.msra.mxu1 %v10445_v46  ;;  %v10523_v46 = vld [vmem:[#allocation24 + $0x1d0] ss:$8 sps:$4 sm:$0xff]  }
 0x6cf   : > { %4081 = vmatprep.subr.bf16.mxu1 %v10450_v47  ;;  %v10528_v47 = vld [vmem:[#allocation24 + $0x1e4] ss:$8 sps:$4 sm:$0xff]  }
 0x6d2   : > { %4082 = vmatpush1.bf16.msra.mxu1 %v10448_v48  ;;  %v10541_v48 = vld [vmem:[#allocation27 + $0x30] ss:$8 sps:$4 sm:$0xff]  }
 0x6d3   : > { %4083 = vmatprep.subr.bf16.mxu1 %v10453_v22  ;;  %v10546_v22 = vld [vmem:[#allocation27 + $0x44] ss:$8 sps:$4 sm:$0xff]   ;;  %4370 = vmatpush1.bf16.msra.mxu0 %v10541_v48 }
 0x6d4   : > { %4371 = vmatprep.subr.bf16.mxu0 %v10546_v22  ;;  %v10589_v48 = vld [vmem:[%s13287_s0 + $0x20] sm:$0xff]   ;;  %v10590_v22 = vld [vmem:[%s13287_s0 + $0x68] sm:$0xff]  }
 0x6d6   : > { %4084 = vmatpush1.bf16.msra.mxu1 %v10451_v6  ;;  %v10526_v6 = vld [vmem:[#allocation24 + $0x1e0] ss:$8 sps:$4 sm:$0xff]  }
 0x6d7   : > { %4085 = vmatprep.subr.bf16.mxu1 %v10456_v14  ;;  %v10531_v14 = vld [vmem:[#allocation24 + $0x1f4] ss:$8 sps:$4 sm:$0xff]  }
 0x6da   : > { %4086 = vmatpush1.bf16.msra.mxu1 %v10454_v51  ;;  %v10544_v51 = vld [vmem:[#allocation27 + $0x40] ss:$8 sps:$4 sm:$0xff]  }
 0x6db   : > { %4087 = vmatprep.subr.bf16.mxu1 %v10459_v52  ;;  %v10549_v52 = vld [vmem:[#allocation27 + $0x54] ss:$8 sps:$4 sm:$0xff]   ;;  %4372 = vmatpush1.bf16.msra.mxu0 %v10544_v51 }
 0x6dc   : > { %4373 = vmatprep.subr.bf16.mxu0 %v10549_v52  ;;  %v10593_v51 = vld [vmem:[%s13287_s0 + $0x30] sm:$0xff]   ;;  %v10594_v52 = vld [vmem:[%s13287_s0 + $0x78] sm:$0xff]  }
 0x6de   : > { %4088 = vmatpush1.bf16.msra.mxu1 %v10457_v53  ;;  %v10529_v53 = vld [vmem:[#allocation24 + $0x1f0] ss:$8 sps:$4 sm:$0xff]  }
 0x6df   : > { %4089 = vmatprep.subr.bf16.mxu1 %v10462_v54  ;;  %v10547_v54 = vld [vmem:[#allocation27 + $0x50] ss:$8 sps:$4 sm:$0xff]  }
 0x6e0   : > { %4374 = vmatpush1.bf16.msra.mxu0 %v10547_v54  ;;  %v4189_v54 = vld [vmem:[#allocation28] sm:$0x3] }
 0x6e2   : > { %4090 = vmatpush1.bf16.msra.mxu1 %v10460_v55  ;;  %v10552_v55 = vld [vmem:[#allocation27 + $0x64] ss:$8 sps:$4 sm:$0xff]  }
 0x6e3   : > { %4091 = vmatprep.subr.bf16.mxu1 %v10465_v56  ;;  %v3740_v56 = vpack.c.bf16 %v12566_v49, %v12566_v49  ;;  %4375 = vmatprep.subr.bf16.mxu0 %v10552_v55  ;;  %v10567_v49 = vld [vmem:[#allocation27 + $0xb4] ss:$8 sps:$4 sm:$0xff]   ;;  %v4196_v55 = vrot.slane %v4189_v54, %v12547_v0 }
 0x6e6   : > { %4092 = vmatpush1.bf16.msra.mxu1 %v10463_v57  ;;  %v10550_v57 = vld [vmem:[#allocation27 + $0x60] ss:$8 sps:$4 sm:$0xff]  }
 0x6e7   : > { %4093 = vmatprep.subr.bf16.mxu1 %v10468_v58  ;;  %v10555_v58 = vld [vmem:[#allocation27 + $0x74] ss:$8 sps:$4 sm:$0xff]   ;;  %4376 = vmatpush1.bf16.msra.mxu0 %v10550_v57 }
 0x6e8   : > { %4377 = vmatprep.subr.bf16.mxu0 %v10555_v58 }
 0x6ea   : > { %4094 = vmatpush1.bf16.msra.mxu1 %v10466_v59  ;;  %v10553_v59 = vld [vmem:[#allocation27 + $0x70] ss:$8 sps:$4 sm:$0xff]  }
 0x6eb   : > { %4095 = vmatprep.subr.bf16.mxu1 %v10471_v60  ;;  %v10558_v60 = vld [vmem:[#allocation27 + $0x84] ss:$8 sps:$4 sm:$0xff]   ;;  %4378 = vmatpush1.bf16.msra.mxu0 %v10553_v59 }
 0x6ec   : > { %4379 = vmatprep.subr.bf16.mxu0 %v10558_v60 }
 0x6ee   : > { %4096 = vmatpush1.bf16.msra.mxu1 %v10469_v61  ;;  %v10556_v61 = vld [vmem:[#allocation27 + $0x80] ss:$8 sps:$4 sm:$0xff]  }
 0x6ef   : > { %4097 = vmatprep.subr.bf16.mxu1 %v10474_v62  ;;  %v10561_v62 = vld [vmem:[#allocation27 + $0x94] ss:$8 sps:$4 sm:$0xff]   ;;  %4380 = vmatpush1.bf16.msra.mxu0 %v10556_v61 }
 0x6f0   : > { %4381 = vmatprep.subr.bf16.mxu0 %v10561_v62 }
 0x6f2   : > { %4098 = vmatpush1.bf16.msra.mxu1 %v10472_v63  ;;  %v10559_v63 = vld [vmem:[#allocation27 + $0x90] ss:$8 sps:$4 sm:$0xff]  }
 0x6f3   : > { %4099 = vmatprep.subr.bf16.mxu1 %v10477_v26  ;;  %v10564_v26 = vld [vmem:[#allocation27 + $0xa4] ss:$8 sps:$4 sm:$0xff]   ;;  %4382 = vmatpush1.bf16.msra.mxu0 %v10559_v63 }
 0x6f4   : > { %4383 = vmatprep.subr.bf16.mxu0 %v10564_v26 }
 0x6f6   : > { %4100 = vmatpush1.bf16.msra.mxu1 %v10475_v3  ;;  %v10562_v3 = vld [vmem:[#allocation27 + $0xa0] ss:$8 sps:$4 sm:$0xff]  }
 0x6f7   : > { %4101 = vmatprep.subr.bf16.mxu1 %v10480_v4  ;;  %4384 = vmatpush1.bf16.msra.mxu0 %v10562_v3  ;;  %v10565_v4 = vld [vmem:[#allocation27 + $0xb0] ss:$8 sps:$4 sm:$0xff]  }
 0x6f8   : > { %4385 = vmatprep.subr.bf16.mxu0 %v10567_v49 }
 0x6fa   : > { %4102 = vmatpush1.bf16.msra.mxu1 %v10478_v5  ;;  %v10570_v5 = vld [vmem:[#allocation27 + $0xc4] ss:$8 sps:$4 sm:$0xff]  }
 0x6fb   : > { %4103 = vmatprep.subr.bf16.mxu1 %v10483_v8  ;;  %4386 = vmatpush1.bf16.msra.mxu0 %v10565_v4  ;;  %v10568_v8 = vld [vmem:[#allocation27 + $0xc0] ss:$8 sps:$4 sm:$0xff]  }
 0x6fc   : > { %4387 = vmatprep.subr.bf16.mxu0 %v10570_v5  ;;  %v9089_v5 = vld [vmem:[#allocation4] ss:$0 sm:$0xff] }
 0x6fe   : > { %4104 = vmatpush1.bf16.msra.mxu1 %v10481_v9  ;;  %v10573_v9 = vld [vmem:[#allocation27 + $0xd4] ss:$8 sps:$4 sm:$0xff]  }
 0x6ff   : > { %4114 = vmatprep.subr.bf16.mxu1 %v10486_v10  ;;  %4388 = vmatpush1.bf16.msra.mxu0 %v10568_v8  ;;  %v10571_v10 = vld [vmem:[#allocation27 + $0xd0] ss:$8 sps:$4 sm:$0xff]  }
 0x700   : > { %4389 = vmatprep.subr.bf16.mxu0 %v10573_v9 }
 0x701   : > { %4106 = vmatmul.mubr.bf16.vlgmr.msra.gmra.mrb[24].mxu1 %v3738_v11 }
 0x702   : > { %4115 = vmatpush1.bf16.msra.mxu1 %v10484_v25  ;;  %4146 = vmatprep.mubr.bf16.mxu1 %v3741_v16  ;;  %v10576_v25 = vld [vmem:[#allocation27 + $0xe4] ss:$8 sps:$4 sm:$0xff]  }
 0x703   : > { %4116 = vmatprep.subr.bf16.mxu1 %v10489_v15  ;;  %4390 = vmatpush1.bf16.msra.mxu0 %v10571_v10  ;;  %v10574_v15 = vld [vmem:[#allocation27 + $0xe0] ss:$8 sps:$4 sm:$0xff]   ;;  %v8975_v16 = vld [vmem:[#allocation3] ss:$0 sm:$0xff] }
 0x704   : > { %4391 = vmatprep.subr.bf16.mxu0 %v10576_v25 }
 0x706   : > { %4117 = vmatpush1.bf16.msra.mxu1 %v10487_v17 }
 0x707   : > { %4118 = vmatprep.subr.bf16.mxu1 %v10492_v18  ;;  %4392 = vmatpush1.bf16.msra.mxu0 %v10574_v15 }
 0x70a   : > { %4119 = vmatpush1.bf16.msra.mxu1 %v10490_v19 }
 0x70b   : > { %4120 = vmatprep.subr.bf16.mxu1 %v10495_v20 }
 0x70e   : > { %4121 = vmatpush1.bf16.msra.mxu1 %v10493_v23  ;;  %v10579_v23 = vld [vmem:[#allocation27 + $0xf4] ss:$8 sps:$4 sm:$0xff]  }
 0x70f   : > { %4122 = vmatprep.subr.bf16.mxu1 %v10498_v24  ;;  %4393 = vmatprep.subr.bf16.mxu0 %v10579_v23 }
 0x712   : > { %4123 = vmatpush1.bf16.msra.mxu1 %v10496_v12  ;;  %v10577_v12 = vld [vmem:[#allocation27 + $0xf0] ss:$8 sps:$4 sm:$0xff]  }
 0x713   : > { %4124 = vmatprep.subr.bf16.mxu1 %v10501_v27  ;;  %4394 = vmatpush1.bf16.msra.mxu0 %v10577_v12 }
 0x716   : > { %4125 = vmatpush1.bf16.msra.mxu1 %v10499_v50  ;;  %v10580_v50 = vld [vmem:[%s13287_s0 + $0x40] sm:$0xff]  }
 0x717   : > { %4126 = vmatprep.subr.bf16.mxu1 %v10504_v28  ;;  %9601 = vmatprep.subr.bf16.mxu0 %v10580_v50 }
 0x71a   : > { %4127 = vmatpush1.bf16.msra.mxu1 %v10502_v29 }
 0x71b   : > { %4128 = vmatprep.subr.bf16.mxu1 %v10507_v30 }
 0x71e   : > { %4129 = vmatpush1.bf16.msra.mxu1 %v10505_v13  ;;  %v3737_v13 = vld [vmem:[#allocation25] sm:$0x3] }
 0x71f   : > { %4130 = vmatprep.subr.bf16.mxu1 %v10510_v31  ;;  %v3746_v31 = vrot.slane %v3737_v13, %v12547_v0 }
 0x722   : > { %4131 = vmatpush1.bf16.msra.mxu1 %v10508_v7  ;;  %v3750_v7 = vrot.slane %v3737_v13, %v12550_v2 }
 0x723   : > { %4132 = vmatprep.subr.bf16.mxu1 %v10513_v32 }
 0x726   : > { %4133 = vmatpush1.bf16.msra.mxu1 %v10511_v33 }
 0x727   : > { %4134 = vmatprep.subr.bf16.mxu1 %v10516_v34 }
 0x72a   : > { %4135 = vmatpush1.bf16.msra.mxu1 %v10514_v35 }
 0x72b   : > { %4136 = vmatprep.subr.bf16.mxu1 %v10519_v36 }
 0x72e   : > { %4137 = vmatpush1.bf16.msra.mxu1 %v10517_v39 }
 0x72f   : > { %4138 = vmatprep.subr.bf16.mxu1 %v10522_v41  ;;  %v10581_v41 = vld [vmem:[%s13287_s0] sm:$0xff]  }
 0x732   : > { %4139 = vmatpush1.bf16.msra.mxu1 %v10520_v43  ;;  %v10583_v43 = vld [vmem:[%s13287_s0 + $0x8] sm:$0xff]  }
 0x733   : > { %4140 = vmatprep.subr.bf16.mxu1 %v10525_v44  ;;  %v10584_v44 = vld [vmem:[%s13287_s0 + $0x50] sm:$0xff]  }
 0x736   : > { %4141 = vmatpush1.bf16.msra.mxu1 %v10523_v46  ;;  %v10587_v46 = vld [vmem:[%s13287_s0 + $0x18] sm:$0xff]  }
 0x737   : > { %4142 = vmatprep.subr.bf16.mxu1 %v10528_v47  ;;  %v10588_v47 = vld [vmem:[%s13287_s0 + $0x60] sm:$0xff]  }
 0x73a   : > { %4143 = vmatpush1.bf16.msra.mxu1 %v10526_v6  ;;  %v10591_v6 = vld [vmem:[%s13287_s0 + $0x28] sm:$0xff]  }
 0x73b   : > { %4144 = vmatprep.subr.bf16.mxu1 %v10531_v14  ;;  %v10592_v14 = vld [vmem:[%s13287_s0 + $0x70] sm:$0xff]  }
 0x73e   : > { %4145 = vmatpush1.bf16.msra.mxu1 %v10529_v53  ;;  %v10595_v53 = vld [vmem:[%s13287_s0 + $0x38] sm:$0xff]  }
 0x741   : > { %4147 = vmatmul.mubr.bf16.vlgmr.msra.gmra.mrb[24].mxu1 %v3740_v56  ;;  %v4200_v56 = vrot.slane %v4189_v54, %v12550_v2 }
 0x794   : > { %v9595_v11 = vpop.f32.mrb[20].mxu1 }
 0x795   : > { %v9596_v17 = vpop.f32.mrb[21].mxu1 }
 0x796   : > { %v9597_v18 = vadd.f32 %v9596_v17, %v9595_v11  ;;  %v9598_v19 = vpop.f32.mrb[22].mxu1 }
 0x797   : > { %v9599_v20 = vpop.f32.mrb[23].mxu1 }
 0x798   : > { %v3660_v24 = vadd.f32 %v9597_v18, %v8975_v16 }
 0x79a   : > { %v8992_v27 = vmul.f32 -1.442695, %v3660_v24 }
 0x79c   : > { %10596 = vpow2.f32 %v8992_v27 }
 0x7a6   : > { %v10597_v28 = vpop.eup %10596 }
 0x7a7   : > { %v3668_v29 = vadd.f32 1.0, %v10597_v28 }
 0x7a9   : > { %10598 = vrcp.f32 %v3668_v29 }
 0x7b3   : > { %v10599_v30 = vpop.eup %10598 }
 0x7b4   : > { %3672 = vst.msk [vmem:[%s13288_s12] sm:$0x3] %vm3671_vm4, %v10599_v30 }
 0x814   : > { %v4148_v32 = vpop.f32.mrb[24].mxu1 }
 0x815   : > { %v9739_v33 = vadd.f32 %v4148_v32, %v3746_v31  ;;  %v4150_v34 = vpop.f32.mrb[25].mxu1 }
 0x816   : > { %v9740_v35 = vadd.f32 %v4150_v34, %v3750_v7  ;;  %v4152_v36 = vpop.f32.mrb[26].mxu1 }
 0x817   : > { %v4155_v37 = vmax.f32 %v9739_v33, 0.0  ;;  %v4153_v38 = vpop.f32.mrb[27].mxu1 }
 0x818   : > { %v4156_v39 = vmax.f32 %v9740_v35, 0.0 }
 0x819   : > { %v4190_v21 = vpack.c.bf16 %v4155_v37, %v4155_v37 }
 0x81a   : > { %v4191_v40 = vpack.c.bf16 %v4156_v39, %v4156_v39 }
 0x81c   : > { %4395 = vmatprep.mubr.bf16.mxu0 %v4191_v40 }
 0x81d   : > { %4396 = vmatmul.mubr.bf16.vlgmr.msra.gmra.mrb[20].mxu0 %v4190_v21 }
 0x81e   : > { %9602 = vmatpush3.bf16.msra.mxu0 %v10581_v41 }
 0x81f   : > { %9603 = vmatprep.subr.bf16.mxu0 %v10582_v42 }
 0x822   : > { %9604 = vmatpush3.bf16.msra.mxu0 %v10583_v43 }
 0x823   : > { %9605 = vmatprep.subr.bf16.mxu0 %v10584_v44 }
 0x826   : > { %9606 = vmatpush3.bf16.msra.mxu0 %v10585_v1 }
 0x827   : > { %9607 = vmatprep.subr.bf16.mxu0 %v10586_v45 }
 0x82a   : > { %9608 = vmatpush3.bf16.msra.mxu0 %v10587_v46 }
 0x82b   : > { %9609 = vmatprep.subr.bf16.mxu0 %v10588_v47 }
 0x82e   : > { %9610 = vmatpush3.bf16.msra.mxu0 %v10589_v48 }
 0x82f   : > { %9611 = vmatprep.subr.bf16.mxu0 %v10590_v22 }
 0x832   : > { %9612 = vmatpush3.bf16.msra.mxu0 %v10591_v6 }
 0x833   : > { %9613 = vmatprep.subr.bf16.mxu0 %v10592_v14 }
 0x836   : > { %9614 = vmatpush3.bf16.msra.mxu0 %v10593_v51 }
 0x837   : > { %9615 = vmatprep.subr.bf16.mxu0 %v10594_v52 }
 0x83a   : > { %9616 = vmatpush3.bf16.msra.mxu0 %v10595_v53 }
 0x8f0   : > { %v4397_v57 = vpop.f32.mrb[20].mxu0 }
 0x8f1   : > { %v4398_v58 = vadd.f32 %v4397_v57, %v4196_v55  ;;  %v4399_v59 = vpop.f32.mrb[21].mxu0 }
 0x8f2   : > { %v4400_v60 = vadd.f32 %v4399_v59, %v4200_v56  ;;  %v4401_v61 = vpop.f32.mrb[22].mxu0 }
 0x8f3   : > { %v4404_v62 = vmax.f32 %v4398_v58, 0.0  ;;  %v4402_v63 = vpop.f32.mrb[23].mxu0 }
 0x8f4   : > { %v4405_v26 = vmax.f32 %v4400_v60, 0.0 }
 0x8f5   : > { %v4439_v49 = vpack.c.bf16 %v4404_v62, %v4404_v62 }
 0x8f6   : > { %v4440_v3 = vpack.c.bf16 %v4405_v26, %v4405_v26 }
 0x8f8   : > { %4575 = vmatprep.mubr.bf16.mxu0 %v4440_v3 }
 0x8f9   : > { %4576 = vmatmul.mubr.bf16.vlgmr.msra.gmra.mrb[24].mxu0 %v4439_v49 }
 0x9cc   : > { %v9617_v4 = vpop.f32.mrb[24].mxu0 }
 0x9cd   : > { %v9618_v8 = vpop.f32.mrb[25].mxu0 }
 0x9ce   : > { %v9619_v9 = vadd.f32 %v9618_v8, %v9617_v4  ;;  %v9620_v0 = vpop.f32.mrb[26].mxu0 }
 0x9cf   : > { %v9621_v10 = vpop.f32.mrb[27].mxu0 }
 0x9d0   : > { %v4578_v2 = vadd.f32 %v9619_v9, %v9089_v5 }
 0x9d2   : > { %4583 = vst.msk [vmem:[%s13289_s24] sm:$0x3] %vm3671_vm4, %v4578_v2 }
 0x9d3 PF: > { %v10600_v25 = vld [vmem:[%s12473_s23 + $0x4] ss:$8 sps:$4 sm:$0xff]   ;;  %v10604_v15 = vld [vmem:[%s12473_s23] ss:$8 sps:$4 sm:$0xff]   ;;  %v10606_v17 = vld [vmem:[%s12473_s23 + $0x14] ss:$8 sps:$4 sm:$0xff]   ;;  %v4846_v22 = vlaneseq }
 0x9d4   : > { %v10602_v11 = vld [vmem:[%s12473_s23 + $0x204] ss:$8 sps:$4 sm:$0xff]   ;;  %5235 = vmatprep.subr.bf16.mxu0 %v10600_v25  ;;  %v10605_v16 = vld [vmem:[%s12473_s23 + $0x200] ss:$8 sps:$4 sm:$0xff]   ;;  %v10608_v18 = vld [vmem:[%s12473_s23 + $0x214] ss:$8 sps:$4 sm:$0xff]  }
 0x9d5   : > { %5637 = vmatprep.subr.bf16.mxu1 %v10602_v11  ;;  %5236 = vmatpush1.bf16.msra.mxu0 %v10604_v15  ;;  %v10610_v19 = vld [vmem:[%s12473_s23 + $0x10] ss:$8 sps:$4 sm:$0xff]   ;;  %v10612_v23 = vld [vmem:[%s12473_s23 + $0x24] ss:$8 sps:$4 sm:$0xff]   ;;  %v10616_v12 = vld [vmem:[%s12473_s23 + $0x20] ss:$8 sps:$4 sm:$0xff]  }
 0x9d6   : > { %5638 = vmatpush1.bf16.msra.mxu1 %v10605_v16  ;;  %5237 = vmatprep.subr.bf16.mxu0 %v10606_v17  ;;  %v10611_v20 = vld [vmem:[%s12473_s23 + $0x210] ss:$8 sps:$4 sm:$0xff]   ;;  %v10614_v24 = vld [vmem:[%s12473_s23 + $0x224] ss:$8 sps:$4 sm:$0xff]   ;;  %v10617_v27 = vld [vmem:[%s12473_s23 + $0x220] ss:$8 sps:$4 sm:$0xff]  }
 0x9d7   : > { %5639 = vmatprep.subr.bf16.mxu1 %v10608_v18  ;;  %v10618_v50 = vld [vmem:[%s12473_s23 + $0x34] ss:$8 sps:$4 sm:$0xff]   ;;  %v10622_v29 = vld [vmem:[%s12473_s23 + $0x30] ss:$8 sps:$4 sm:$0xff]   ;;  %v10624_v13 = vld [vmem:[%s12473_s23 + $0x44] ss:$8 sps:$4 sm:$0xff]  }
 0x9d8   : > { %v10620_v28 = vld [vmem:[%s12473_s23 + $0x234] ss:$8 sps:$4 sm:$0xff]   ;;  %v10623_v30 = vld [vmem:[%s12473_s23 + $0x230] ss:$8 sps:$4 sm:$0xff]   ;;  %v10626_v31 = vld [vmem:[%s12473_s23 + $0x244] ss:$8 sps:$4 sm:$0xff]  }
 0x9d9   : > { %5238 = vmatpush1.bf16.msra.mxu0 %v10610_v19  ;;  %v10628_v7 = vld [vmem:[%s12473_s23 + $0x40] ss:$8 sps:$4 sm:$0xff]   ;;  %v10630_v33 = vld [vmem:[%s12473_s23 + $0x54] ss:$8 sps:$4 sm:$0xff]   ;;  %v10634_v35 = vld [vmem:[%s12473_s23 + $0x50] ss:$8 sps:$4 sm:$0xff]  }
 0x9da   : > { %5640 = vmatpush1.bf16.msra.mxu1 %v10611_v20  ;;  %5239 = vmatprep.subr.bf16.mxu0 %v10612_v23  ;;  %v10629_v32 = vld [vmem:[%s12473_s23 + $0x240] ss:$8 sps:$4 sm:$0xff]   ;;  %v10632_v34 = vld [vmem:[%s12473_s23 + $0x254] ss:$8 sps:$4 sm:$0xff]   ;;  %v10635_v36 = vld [vmem:[%s12473_s23 + $0x250] ss:$8 sps:$4 sm:$0xff]  }
 0x9db   : > { %5641 = vmatprep.subr.bf16.mxu1 %v10614_v24  ;;  %v10636_v37 = vld [vmem:[%s12473_s23 + $0x64] ss:$8 sps:$4 sm:$0xff]   ;;  %v10640_v39 = vld [vmem:[%s12473_s23 + $0x60] ss:$8 sps:$4 sm:$0xff]   ;;  %v10642_v41 = vld [vmem:[%s12473_s23 + $0x74] ss:$8 sps:$4 sm:$0xff]  }
 0x9dc   : > { %v10638_v38 = vld [vmem:[%s12473_s23 + $0x264] ss:$8 sps:$4 sm:$0xff]   ;;  %v10641_v40 = vld [vmem:[%s12473_s23 + $0x260] ss:$8 sps:$4 sm:$0xff]   ;;  %v10644_v21 = vld [vmem:[%s12473_s23 + $0x274] ss:$8 sps:$4 sm:$0xff]  }
 0x9dd   : > { %5240 = vmatpush1.bf16.msra.mxu0 %v10616_v12  ;;  %v10646_v42 = vld [vmem:[%s12473_s23 + $0x70] ss:$8 sps:$4 sm:$0xff]   ;;  %v10648_v44 = vld [vmem:[%s12473_s23 + $0x84] ss:$8 sps:$4 sm:$0xff]   ;;  %v10652_v45 = vld [vmem:[%s12473_s23 + $0x80] ss:$8 sps:$4 sm:$0xff]  }
 0x9de   : > { %5642 = vmatpush1.bf16.msra.mxu1 %v10617_v27  ;;  %5241 = vmatprep.subr.bf16.mxu0 %v10618_v50  ;;  %v10647_v43 = vld [vmem:[%s12473_s23 + $0x270] ss:$8 sps:$4 sm:$0xff]   ;;  %v10650_v1 = vld [vmem:[%s12473_s23 + $0x284] ss:$8 sps:$4 sm:$0xff]   ;;  %v10653_v46 = vld [vmem:[%s12473_s23 + $0x280] ss:$8 sps:$4 sm:$0xff]  }
 0x9df   : > { %5643 = vmatprep.subr.bf16.mxu1 %v10620_v28  ;;  %v11928_v47 = vmov 1983009808   ;;  %v10654_v6 = vld [vmem:[%s12473_s23 + $0x94] ss:$8 sps:$4 sm:$0xff]   ;;  %v10658_v51 = vld [vmem:[%s12473_s23 + $0x90] ss:$8 sps:$4 sm:$0xff]  }
 0x9e0   : > { %v4844_v48 = vunpack.c.l.s4 %v11928_v47  ;;  %v10656_v14 = vld [vmem:[%s12473_s23 + $0x294] ss:$8 sps:$4 sm:$0xff]   ;;  %v12665_v53 = vshrl.u32 %v4846_v22, 7  ;;  %v10659_v54 = vld [vmem:[%s12473_s23 + $0x290] ss:$8 sps:$4 sm:$0xff]   ;;  %vm8307_vm7 = vcmask 9216  }
 0x9e1   : > { %5242 = vmatpush1.bf16.msra.mxu0 %v10622_v29  ;;  %v10660_v55 = vld [vmem:[%s12473_s23 + $0xa4] ss:$8 sps:$4 sm:$0xff]   ;;  %v10664_v57 = vld [vmem:[%s12473_s23 + $0xa0] ss:$8 sps:$4 sm:$0xff]   ;;  %v10666_v60 = vld [vmem:[%s12473_s23 + $0xb4] ss:$8 sps:$4 sm:$0xff]  }
 0x9e2   : > { %5644 = vmatpush1.bf16.msra.mxu1 %v10623_v30  ;;  %5243 = vmatprep.subr.bf16.mxu0 %v10624_v13  ;;  %v4845_v52 = vunpack.c.0.s8 %v4844_v48  ;;  %v10662_v56 = vld [vmem:[%s12473_s23 + $0x2a4] ss:$8 sps:$4 sm:$0xff]   ;;  %v10665_v58 = vld [vmem:[%s12473_s23 + $0x2a0] ss:$8 sps:$4 sm:$0xff]   ;;  %v10668_v61 = vld [vmem:[%s12473_s23 + $0x2b4] ss:$8 sps:$4 sm:$0xff]  }
 0x9e3   : > { %5645 = vmatprep.subr.bf16.mxu1 %v10626_v31  ;;  %v4840_v62 = vld [vmem:[#allocation2] sm:$0xff]  ;;  %v10670_v63 = vld [vmem:[%s12473_s23 + $0xb0] ss:$8 sps:$4 sm:$0xff]   ;;  %v10672_v49 = vld [vmem:[%s12473_s23 + $0xc4] ss:$8 sps:$4 sm:$0xff]  }
 0x9e4   : > { %v4848_v59 = vsub.s32 %v4845_v52, %v12665_v53  ;;  %v10671_v3 = vld [vmem:[%s12473_s23 + $0x2b0] ss:$8 sps:$4 sm:$0xff]   ;;  %v10674_v4 = vld [vmem:[%s12473_s23 + $0x2c4] ss:$8 sps:$4 sm:$0xff]   ;;  %v10676_v8 = vld [vmem:[%s12473_s23 + $0xc0] ss:$8 sps:$4 sm:$0xff]   ;;  %v4842_v17 = vcombine.high %v4840_v62, %v4840_v62 }
 0x9e5   : > { %5244 = vmatpush1.bf16.msra.mxu0 %v10628_v7  ;;  %v10677_v0 = vld [vmem:[%s12473_s23 + $0x2c0] ss:$8 sps:$4 sm:$0xff]   ;;  %v10678_v10 = vld [vmem:[%s12473_s23 + $0xd4] ss:$8 sps:$4 sm:$0xff]   ;;  %v10682_v25 = vld [vmem:[%s12473_s23 + $0xd0] ss:$8 sps:$4 sm:$0xff]  }
 0x9e6   : > { %5646 = vmatpush1.bf16.msra.mxu1 %v10629_v32  ;;  %5245 = vmatprep.subr.bf16.mxu0 %v10630_v33  ;;  %v4849_v26 = vrot.slane %v4840_v62, %v4848_v59  ;;  %v10680_v2 = vld [vmem:[%s12473_s23 + $0x2d4] ss:$8 sps:$4 sm:$0xff]   ;;  %v10683_v11 = vld [vmem:[%s12473_s23 + $0x2d0] ss:$8 sps:$4 sm:$0xff]   ;;  %v10684_v15 = vld [vmem:[%s12473_s23 + $0xe4] ss:$8 sps:$4 sm:$0xff]   ;;  %v12695_v24 = vrot.slane %v4842_v17, %v4848_v59 }
 0x9e7   : > { %5647 = vmatprep.subr.bf16.mxu1 %v10632_v34  ;;  %v10686_v16 = vld [vmem:[%s12473_s23 + $0x2e4] ss:$8 sps:$4 sm:$0xff]   ;;  %v10688_v18 = vld [vmem:[%s12473_s23 + $0xe0] ss:$8 sps:$4 sm:$0xff]   ;;  %v10690_v20 = vld [vmem:[%s12473_s23 + $0xf4] ss:$8 sps:$4 sm:$0xff]  }
 0x9e8   : > { %v4857_v5 = vcombine.high %v4849_v26, %v4849_v26  ;;  %v10689_v19 = vld [vmem:[%s12473_s23 + $0x2e0] ss:$8 sps:$4 sm:$0xff]   ;;  %v10692_v23 = vld [vmem:[%s12473_s23 + $0x2f4] ss:$8 sps:$4 sm:$0xff]   ;;  %v10694_v12 = vld [vmem:[%s12473_s23 + $0xf0] ss:$8 sps:$4 sm:$0xff]   ;;  %v4858_v29 = vcombine.high %v12695_v24, %v12695_v24  ;;  %v12704_v13 = vpack.c.bf16 %v4849_v26, %v4849_v26 }
 0x9e9   : > { %5246 = vmatpush1.bf16.msra.mxu0 %v10634_v35  ;;  %v10695_v27 = vld [vmem:[%s12473_s23 + $0x2f0] ss:$8 sps:$4 sm:$0xff]   ;;  %v10698_v50 = vld [vmem:[%s12473_s23 + $0x104] ss:$8 sps:$4 sm:$0xff]   ;;  %v10696_v30 = vld [vmem:[%s12473_s23 + $0x100] ss:$8 sps:$4 sm:$0xff]  }
 0x9ea   : > { %5648 = vmatpush1.bf16.msra.mxu1 %v10635_v36  ;;  %5247 = vmatprep.subr.bf16.mxu0 %v10636_v37  ;;  %v12680_v9 = vpack.c.bf16 %v4857_v5, %v4857_v5  ;;  %v10701_v28 = vld [vmem:[%s12473_s23 + $0x304] ss:$8 sps:$4 sm:$0xff]   ;;  %v10699_v31 = vld [vmem:[%s12473_s23 + $0x300] ss:$8 sps:$4 sm:$0xff]   ;;  %v10704_v7 = vld [vmem:[%s12473_s23 + $0x114] ss:$8 sps:$4 sm:$0xff]   ;;  %v12709_v33 = vpack.c.bf16 %v4858_v29, %v4858_v29 }
 0x9eb   : > { %5649 = vmatprep.subr.bf16.mxu1 %v10638_v38  ;;  %v10707_v32 = vld [vmem:[%s12473_s23 + $0x314] ss:$8 sps:$4 sm:$0xff]   ;;  %v10702_v34 = vld [vmem:[%s12473_s23 + $0x110] ss:$8 sps:$4 sm:$0xff]   ;;  %v10710_v36 = vld [vmem:[%s12473_s23 + $0x124] ss:$8 sps:$4 sm:$0xff]  }
 0x9ec   : > { %5267 = vmatprep.mubr.bf16.mxu0 %v12680_v9  ;;  %5669 = vmatprep.mubr.bf16.mxu1 %v12680_v9  ;;  %v10705_v35 = vld [vmem:[%s12473_s23 + $0x310] ss:$8 sps:$4 sm:$0xff]   ;;  %v10713_v37 = vld [vmem:[%s12473_s23 + $0x324] ss:$8 sps:$4 sm:$0xff]   ;;  %v10708_v38 = vld [vmem:[%s12473_s23 + $0x120] ss:$8 sps:$4 sm:$0xff]  }
 0x9ed   : > { %5248 = vmatpush1.bf16.msra.mxu0 %v10640_v39  ;;  %v10711_v39 = vld [vmem:[%s12473_s23 + $0x320] ss:$8 sps:$4 sm:$0xff]   ;;  %v10731_v47 = vld [vmem:[%s12473_s23 + $0x354] ss:$8 sps:$4 sm:$0xff]   ;;  %v10726_v48 = vld [vmem:[%s12473_s23 + $0x150] ss:$8 sps:$4 sm:$0xff]  }
 0x9ee   : > { %5650 = vmatpush1.bf16.msra.mxu1 %v10641_v40  ;;  %5249 = vmatprep.subr.bf16.mxu0 %v10642_v41  ;;  %v10716_v40 = vld [vmem:[%s12473_s23 + $0x134] ss:$8 sps:$4 sm:$0xff]   ;;  %v10729_v22 = vld [vmem:[%s12473_s23 + $0x350] ss:$8 sps:$4 sm:$0xff]   ;;  %v10735_v52 = vld [vmem:[%s12473_s23 + $0x360] ss:$8 sps:$4 sm:$0xff]  }
 0x9ef   : > { %5651 = vmatprep.subr.bf16.mxu1 %v10644_v21  ;;  %v10719_v41 = vld [vmem:[%s12473_s23 + $0x334] ss:$8 sps:$4 sm:$0xff]   ;;  %v10714_v21 = vld [vmem:[%s12473_s23 + $0x130] ss:$8 sps:$4 sm:$0xff]   ;;  %v10749_v59 = vld [vmem:[%s12473_s23 + $0x384] ss:$8 sps:$4 sm:$0xff]  }
 0x9f0   : > { %v10752_v62 = vld [vmem:[%s12473_s23 + $0x194] ss:$8 sps:$4 sm:$0xff]   ;;  %v10750_v26 = vld [vmem:[%s12473_s23 + $0x190] ss:$8 sps:$4 sm:$0xff]   ;;  %v10756_v5 = vld [vmem:[%s12473_s23 + $0x1a0] ss:$8 sps:$4 sm:$0xff]  }
 0x9f1   : > { %5250 = vmatpush1.bf16.msra.mxu0 %v10646_v42  ;;  %v10717_v42 = vld [vmem:[%s12473_s23 + $0x330] ss:$8 sps:$4 sm:$0xff]   ;;  %v10771_v17 = vld [vmem:[%s12473_s23 + $0x3c0] ss:$8 sps:$4 sm:$0xff]   ;;  %v10788_v29 = vld [vmem:[%s12473_s23 + $0x1f4] ss:$8 sps:$4 sm:$0xff]  }
 0x9f2   : > { %5652 = vmatpush1.bf16.msra.mxu1 %v10647_v43  ;;  %5251 = vmatprep.subr.bf16.mxu0 %v10648_v44  ;;  %v10722_v43 = vld [vmem:[%s12473_s23 + $0x144] ss:$8 sps:$4 sm:$0xff]  }
 0x9f3   : > { %5653 = vmatprep.subr.bf16.mxu1 %v10650_v1  ;;  %v10725_v44 = vld [vmem:[%s12473_s23 + $0x344] ss:$8 sps:$4 sm:$0xff]   ;;  %v10720_v1 = vld [vmem:[%s12473_s23 + $0x140] ss:$8 sps:$4 sm:$0xff]  }
 0x9f5   : > { %5252 = vmatpush1.bf16.msra.mxu0 %v10652_v45  ;;  %v10723_v45 = vld [vmem:[%s12473_s23 + $0x340] ss:$8 sps:$4 sm:$0xff]  }
 0x9f6   : > { %5654 = vmatpush1.bf16.msra.mxu1 %v10653_v46  ;;  %5253 = vmatprep.subr.bf16.mxu0 %v10654_v6  ;;  %v10728_v46 = vld [vmem:[%s12473_s23 + $0x154] ss:$8 sps:$4 sm:$0xff]   ;;  %v10734_v6 = vld [vmem:[%s12473_s23 + $0x164] ss:$8 sps:$4 sm:$0xff]  }
 0x9f7   : > { %5655 = vmatprep.subr.bf16.mxu1 %v10656_v14  ;;  %v10737_v14 = vld [vmem:[%s12473_s23 + $0x364] ss:$8 sps:$4 sm:$0xff]  }
 0x9f9   : > { %5254 = vmatpush1.bf16.msra.mxu0 %v10658_v51  ;;  %v10732_v51 = vld [vmem:[%s12473_s23 + $0x160] ss:$8 sps:$4 sm:$0xff]  }
 0x9fa   : > { %5656 = vmatpush1.bf16.msra.mxu1 %v10659_v54  ;;  %5255 = vmatprep.subr.bf16.mxu0 %v10660_v55  ;;  %v10740_v54 = vld [vmem:[%s12473_s23 + $0x174] ss:$8 sps:$4 sm:$0xff]  }
 0x9fb   : > { %5657 = vmatprep.subr.bf16.mxu1 %v10662_v56  ;;  %v10743_v55 = vld [vmem:[%s12473_s23 + $0x374] ss:$8 sps:$4 sm:$0xff]   ;;  %v10738_v56 = vld [vmem:[%s12473_s23 + $0x170] ss:$8 sps:$4 sm:$0xff]  }
 0x9fd   : > { %5256 = vmatpush1.bf16.msra.mxu0 %v10664_v57  ;;  %v10741_v57 = vld [vmem:[%s12473_s23 + $0x370] ss:$8 sps:$4 sm:$0xff]  }
 0x9fe   : > { %5658 = vmatpush1.bf16.msra.mxu1 %v10665_v58  ;;  %5257 = vmatprep.subr.bf16.mxu0 %v10666_v60  ;;  %v10746_v58 = vld [vmem:[%s12473_s23 + $0x184] ss:$8 sps:$4 sm:$0xff]   ;;  %v10744_v60 = vld [vmem:[%s12473_s23 + $0x180] ss:$8 sps:$4 sm:$0xff]  }
 0x9ff   : > { %5659 = vmatprep.subr.bf16.mxu1 %v10668_v61  ;;  %v10747_v61 = vld [vmem:[%s12473_s23 + $0x380] ss:$8 sps:$4 sm:$0xff]  }
 0xa01   : > { %5258 = vmatpush1.bf16.msra.mxu0 %v10670_v63  ;;  %v10755_v63 = vld [vmem:[%s12473_s23 + $0x394] ss:$8 sps:$4 sm:$0xff]  }
 0xa02   : > { %5660 = vmatpush1.bf16.msra.mxu1 %v10671_v3  ;;  %5259 = vmatprep.subr.bf16.mxu0 %v10672_v49  ;;  %v10753_v3 = vld [vmem:[%s12473_s23 + $0x390] ss:$8 sps:$4 sm:$0xff]   ;;  %v10758_v49 = vld [vmem:[%s12473_s23 + $0x1a4] ss:$8 sps:$4 sm:$0xff]  }
 0xa03   : > { %5661 = vmatprep.subr.bf16.mxu1 %v10674_v4  ;;  %v10761_v4 = vld [vmem:[%s12473_s23 + $0x3a4] ss:$8 sps:$4 sm:$0xff]  }
 0xa05   : > { %5260 = vmatpush1.bf16.msra.mxu0 %v10676_v8  ;;  %v10759_v8 = vld [vmem:[%s12473_s23 + $0x3a0] ss:$8 sps:$4 sm:$0xff]  }
 0xa06   : > { %5662 = vmatpush1.bf16.msra.mxu1 %v10677_v0  ;;  %5261 = vmatprep.subr.bf16.mxu0 %v10678_v10  ;;  %v10764_v0 = vld [vmem:[%s12473_s23 + $0x1b4] ss:$8 sps:$4 sm:$0xff]  }
 0xa07   : > { %5663 = vmatprep.subr.bf16.mxu1 %v10680_v2  ;;  %v10767_v10 = vld [vmem:[%s12473_s23 + $0x3b4] ss:$8 sps:$4 sm:$0xff]   ;;  %v10762_v2 = vld [vmem:[%s12473_s23 + $0x1b0] ss:$8 sps:$4 sm:$0xff]  }
 0xa09   : > { %5262 = vmatpush1.bf16.msra.mxu0 %v10682_v25  ;;  %v10765_v25 = vld [vmem:[%s12473_s23 + $0x3b0] ss:$8 sps:$4 sm:$0xff]  }
 0xa0a   : > { %5664 = vmatpush1.bf16.msra.mxu1 %v10683_v11  ;;  %5263 = vmatprep.subr.bf16.mxu0 %v10684_v15  ;;  %v10770_v11 = vld [vmem:[%s12473_s23 + $0x1c4] ss:$8 sps:$4 sm:$0xff]  }
 0xa0b   : > { %5665 = vmatprep.subr.bf16.mxu1 %v10686_v16  ;;  %v10773_v15 = vld [vmem:[%s12473_s23 + $0x3c4] ss:$8 sps:$4 sm:$0xff]   ;;  %v10768_v16 = vld [vmem:[%s12473_s23 + $0x1c0] ss:$8 sps:$4 sm:$0xff]  }
 0xa0d   : > { %5264 = vmatpush1.bf16.msra.mxu0 %v10688_v18  ;;  %v10776_v18 = vld [vmem:[%s12473_s23 + $0x1d4] ss:$8 sps:$4 sm:$0xff]  }
 0xa0e   : > { %5666 = vmatpush1.bf16.msra.mxu1 %v10689_v19  ;;  %5265 = vmatprep.subr.bf16.mxu0 %v10690_v20  ;;  %v10779_v19 = vld [vmem:[%s12473_s23 + $0x3d4] ss:$8 sps:$4 sm:$0xff]   ;;  %v10774_v20 = vld [vmem:[%s12473_s23 + $0x1d0] ss:$8 sps:$4 sm:$0xff]  }
 0xa0f   : > { %5667 = vmatprep.subr.bf16.mxu1 %v10692_v23  ;;  %v10777_v23 = vld [vmem:[%s12473_s23 + $0x3d0] ss:$8 sps:$4 sm:$0xff]  }
 0xa11   : > { %5266 = vmatpush1.bf16.msra.mxu0 %v10694_v12  ;;  %v10782_v12 = vld [vmem:[%s12473_s23 + $0x1e4] ss:$8 sps:$4 sm:$0xff]  }
 0xa12   : > { %5668 = vmatpush1.bf16.msra.mxu1 %v10695_v27  ;;  %5276 = vmatprep.subr.bf16.mxu0 %v10698_v50  ;;  %v10785_v27 = vld [vmem:[%s12473_s23 + $0x3e4] ss:$8 sps:$4 sm:$0xff]   ;;  %v10780_v50 = vld [vmem:[%s12473_s23 + $0x1e0] ss:$8 sps:$4 sm:$0xff]  }
 0xa13   : > { %5678 = vmatprep.subr.bf16.mxu1 %v10701_v28  ;;  %v10783_v28 = vld [vmem:[%s12473_s23 + $0x3e0] ss:$8 sps:$4 sm:$0xff]  }
 0xa14   : > { %5268 = vmatmul.mubr.bf16.vlgmr.msra.gmra.mrb[0].mxu0 %v12704_v13 }
 0xa15   : > { %5670 = vmatmul.mubr.bf16.vlgmr.msra.gmra.mrb[0].mxu1 %v12704_v13  ;;  %5277 = vmatpush1.bf16.msra.mxu0 %v10696_v30  ;;  %v10791_v30 = vld [vmem:[%s12473_s23 + $0x3f4] ss:$8 sps:$4 sm:$0xff]  }
 0xa16   : > { %5679 = vmatpush1.bf16.msra.mxu1 %v10699_v31  ;;  %5278 = vmatprep.subr.bf16.mxu0 %v10704_v7  ;;  %v10786_v31 = vld [vmem:[%s12473_s23 + $0x1f0] ss:$8 sps:$4 sm:$0xff]  }
 0xa17   : > { %5680 = vmatprep.subr.bf16.mxu1 %v10707_v32  ;;  %5308 = vmatprep.mubr.bf16.mxu0 %v12709_v33  ;;  %v10789_v7 = vld [vmem:[%s12473_s23 + $0x3f0] ss:$8 sps:$4 sm:$0xff]   ;;  %v10795_v32 = vld [vmem:[%s12473_s23 + $0x404] ss:$8 sps:$4 sm:$0xff]  }
 0xa18   : > { %5710 = vmatprep.mubr.bf16.mxu1 %v12709_v33 }
 0xa19   : > { %5279 = vmatpush1.bf16.msra.mxu0 %v10702_v34  ;;  %v10798_v34 = vld [vmem:[%s12473_s23 + $0x604] ss:$8 sps:$4 sm:$0xff]  }
 0xa1a   : > { %5681 = vmatpush1.bf16.msra.mxu1 %v10705_v35  ;;  %5280 = vmatprep.subr.bf16.mxu0 %v10710_v36  ;;  %v12777_v35 = vpack.c.bf16 %v12695_v24, %v12695_v24  ;;  %v10793_v36 = vld [vmem:[%s12473_s23 + $0x400] ss:$8 sps:$4 sm:$0xff]   ;;  %v10802_v24 = vld [vmem:[%s12473_s23 + $0x610] ss:$8 sps:$4 sm:$0xff]  }
 0xa1b   : > { %5682 = vmatprep.subr.bf16.mxu1 %v10713_v37  ;;  %v10796_v37 = vld [vmem:[%s12473_s23 + $0x600] ss:$8 sps:$4 sm:$0xff]  }
 0xa1d   : > { %5281 = vmatpush1.bf16.msra.mxu0 %v10708_v38  ;;  %v10801_v38 = vld [vmem:[%s12473_s23 + $0x414] ss:$8 sps:$4 sm:$0xff]  }
 0xa1e   : > { %5683 = vmatpush1.bf16.msra.mxu1 %v10711_v39  ;;  %5282 = vmatprep.subr.bf16.mxu0 %v10716_v40  ;;  %v10804_v39 = vld [vmem:[%s12473_s23 + $0x614] ss:$8 sps:$4 sm:$0xff]   ;;  %v10799_v40 = vld [vmem:[%s12473_s23 + $0x410] ss:$8 sps:$4 sm:$0xff]  }
 0xa1f   : > { %5684 = vmatprep.subr.bf16.mxu1 %v10719_v41  ;;  %v10807_v41 = vld [vmem:[%s12473_s23 + $0x424] ss:$8 sps:$4 sm:$0xff]  }
 0xa21   : > { %5283 = vmatpush1.bf16.msra.mxu0 %v10714_v21  ;;  %v10810_v21 = vld [vmem:[%s12473_s23 + $0x624] ss:$8 sps:$4 sm:$0xff]  }
 0xa22   : > { %5685 = vmatpush1.bf16.msra.mxu1 %v10717_v42  ;;  %5284 = vmatprep.subr.bf16.mxu0 %v10722_v43  ;;  %v10805_v42 = vld [vmem:[%s12473_s23 + $0x420] ss:$8 sps:$4 sm:$0xff]  }
 0xa23   : > { %5686 = vmatprep.subr.bf16.mxu1 %v10725_v44  ;;  %v10808_v43 = vld [vmem:[%s12473_s23 + $0x620] ss:$8 sps:$4 sm:$0xff]   ;;  %v10813_v44 = vld [vmem:[%s12473_s23 + $0x434] ss:$8 sps:$4 sm:$0xff]  }
 0xa25   : > { %5285 = vmatpush1.bf16.msra.mxu0 %v10720_v1  ;;  %v10816_v1 = vld [vmem:[%s12473_s23 + $0x634] ss:$8 sps:$4 sm:$0xff]  }
 0xa26   : > { %5687 = vmatpush1.bf16.msra.mxu1 %v10723_v45  ;;  %5286 = vmatprep.subr.bf16.mxu0 %v10728_v46  ;;  %v10811_v45 = vld [vmem:[%s12473_s23 + $0x430] ss:$8 sps:$4 sm:$0xff]  }
 0xa27   : > { %5688 = vmatprep.subr.bf16.mxu1 %v10731_v47  ;;  %v10814_v46 = vld [vmem:[%s12473_s23 + $0x630] ss:$8 sps:$4 sm:$0xff]   ;;  %v10822_v47 = vld [vmem:[%s12473_s23 + $0x644] ss:$8 sps:$4 sm:$0xff]  }
 0xa29   : > { %5287 = vmatpush1.bf16.msra.mxu0 %v10726_v48  ;;  %v10817_v48 = vld [vmem:[%s12473_s23 + $0x440] ss:$8 sps:$4 sm:$0xff]  }
 0xa2a   : > { %5689 = vmatpush1.bf16.msra.mxu1 %v10729_v22  ;;  %5288 = vmatprep.subr.bf16.mxu0 %v10734_v6  ;;  %v10820_v22 = vld [vmem:[%s12473_s23 + $0x640] ss:$8 sps:$4 sm:$0xff]   ;;  %v10825_v6 = vld [vmem:[%s12473_s23 + $0x454] ss:$8 sps:$4 sm:$0xff]  }
 0xa2b   : > { %5690 = vmatprep.subr.bf16.mxu1 %v10737_v14  ;;  %v10828_v14 = vld [vmem:[%s12473_s23 + $0x654] ss:$8 sps:$4 sm:$0xff]  }
 0xa2d   : > { %5289 = vmatpush1.bf16.msra.mxu0 %v10732_v51  ;;  %v10823_v51 = vld [vmem:[%s12473_s23 + $0x450] ss:$8 sps:$4 sm:$0xff]  }
 0xa2e   : > { %5691 = vmatpush1.bf16.msra.mxu1 %v10735_v52  ;;  %5290 = vmatprep.subr.bf16.mxu0 %v10740_v54  ;;  %v10826_v52 = vld [vmem:[%s12473_s23 + $0x650] ss:$8 sps:$4 sm:$0xff]   ;;  %v10831_v54 = vld [vmem:[%s12473_s23 + $0x464] ss:$8 sps:$4 sm:$0xff]  }
 0xa2f   : > { %5692 = vmatprep.subr.bf16.mxu1 %v10743_v55  ;;  %v10834_v55 = vld [vmem:[%s12473_s23 + $0x664] ss:$8 sps:$4 sm:$0xff]  }
 0xa31   : > { %5291 = vmatpush1.bf16.msra.mxu0 %v10738_v56  ;;  %v10829_v56 = vld [vmem:[%s12473_s23 + $0x460] ss:$8 sps:$4 sm:$0xff]  }
 0xa32   : > { %5693 = vmatpush1.bf16.msra.mxu1 %v10741_v57  ;;  %5292 = vmatprep.subr.bf16.mxu0 %v10746_v58  ;;  %v10832_v57 = vld [vmem:[%s12473_s23 + $0x660] ss:$8 sps:$4 sm:$0xff]   ;;  %v10837_v58 = vld [vmem:[%s12473_s23 + $0x474] ss:$8 sps:$4 sm:$0xff]  }
 0xa33   : > { %5694 = vmatprep.subr.bf16.mxu1 %v10749_v59  ;;  %v10840_v59 = vld [vmem:[%s12473_s23 + $0x674] ss:$8 sps:$4 sm:$0xff]  }
 0xa35   : > { %5293 = vmatpush1.bf16.msra.mxu0 %v10744_v60  ;;  %v10835_v60 = vld [vmem:[%s12473_s23 + $0x470] ss:$8 sps:$4 sm:$0xff]  }
 0xa36   : > { %5695 = vmatpush1.bf16.msra.mxu1 %v10747_v61  ;;  %5294 = vmatprep.subr.bf16.mxu0 %v10752_v62  ;;  %v10838_v61 = vld [vmem:[%s12473_s23 + $0x670] ss:$8 sps:$4 sm:$0xff]   ;;  %v10843_v62 = vld [vmem:[%s12473_s23 + $0x484] ss:$8 sps:$4 sm:$0xff]  }
 0xa37   : > { %5696 = vmatprep.subr.bf16.mxu1 %v10755_v63  ;;  %v10846_v63 = vld [vmem:[%s12473_s23 + $0x684] ss:$8 sps:$4 sm:$0xff]  }
 0xa39   : > { %5295 = vmatpush1.bf16.msra.mxu0 %v10750_v26  ;;  %v10841_v26 = vld [vmem:[%s12473_s23 + $0x480] ss:$8 sps:$4 sm:$0xff]  }
 0xa3a   : > { %5697 = vmatpush1.bf16.msra.mxu1 %v10753_v3  ;;  %5296 = vmatprep.subr.bf16.mxu0 %v10758_v49  ;;  %v10844_v3 = vld [vmem:[%s12473_s23 + $0x680] ss:$8 sps:$4 sm:$0xff]   ;;  %v10849_v49 = vld [vmem:[%s12473_s23 + $0x494] ss:$8 sps:$4 sm:$0xff]  }
 0xa3b   : > { %5698 = vmatprep.subr.bf16.mxu1 %v10761_v4  ;;  %v10852_v4 = vld [vmem:[%s12473_s23 + $0x694] ss:$8 sps:$4 sm:$0xff]  }
 0xa3d   : > { %5297 = vmatpush1.bf16.msra.mxu0 %v10756_v5  ;;  %v10847_v5 = vld [vmem:[%s12473_s23 + $0x490] ss:$8 sps:$4 sm:$0xff]  }
 0xa3e   : > { %5699 = vmatpush1.bf16.msra.mxu1 %v10759_v8  ;;  %5298 = vmatprep.subr.bf16.mxu0 %v10764_v0  ;;  %v10850_v8 = vld [vmem:[%s12473_s23 + $0x690] ss:$8 sps:$4 sm:$0xff]   ;;  %v10855_v0 = vld [vmem:[%s12473_s23 + $0x4a4] ss:$8 sps:$4 sm:$0xff]  }
 0xa3f   : > { %5700 = vmatprep.subr.bf16.mxu1 %v10767_v10  ;;  %v10858_v10 = vld [vmem:[%s12473_s23 + $0x6a4] ss:$8 sps:$4 sm:$0xff]  }
 0xa41   : > { %5299 = vmatpush1.bf16.msra.mxu0 %v10762_v2  ;;  %v10853_v2 = vld [vmem:[%s12473_s23 + $0x4a0] ss:$8 sps:$4 sm:$0xff]  }
 0xa42   : > { %5701 = vmatpush1.bf16.msra.mxu1 %v10765_v25  ;;  %5300 = vmatprep.subr.bf16.mxu0 %v10770_v11  ;;  %v10856_v25 = vld [vmem:[%s12473_s23 + $0x6a0] ss:$8 sps:$4 sm:$0xff]   ;;  %v10861_v11 = vld [vmem:[%s12473_s23 + $0x4b4] ss:$8 sps:$4 sm:$0xff]  }
 0xa43   : > { %5702 = vmatprep.subr.bf16.mxu1 %v10773_v15  ;;  %v10864_v15 = vld [vmem:[%s12473_s23 + $0x6b4] ss:$8 sps:$4 sm:$0xff]  }
 0xa45   : > { %5301 = vmatpush1.bf16.msra.mxu0 %v10768_v16  ;;  %v10859_v16 = vld [vmem:[%s12473_s23 + $0x4b0] ss:$8 sps:$4 sm:$0xff]  }
 0xa46   : > { %5703 = vmatpush1.bf16.msra.mxu1 %v10771_v17  ;;  %5302 = vmatprep.subr.bf16.mxu0 %v10776_v18  ;;  %v10862_v17 = vld [vmem:[%s12473_s23 + $0x6b0] ss:$8 sps:$4 sm:$0xff]   ;;  %v10867_v18 = vld [vmem:[%s12473_s23 + $0x4c4] ss:$8 sps:$4 sm:$0xff]  }
 0xa47   : > { %5704 = vmatprep.subr.bf16.mxu1 %v10779_v19  ;;  %v10870_v19 = vld [vmem:[%s12473_s23 + $0x6c4] ss:$8 sps:$4 sm:$0xff]  }
 0xa49   : > { %5303 = vmatpush1.bf16.msra.mxu0 %v10774_v20  ;;  %v10865_v20 = vld [vmem:[%s12473_s23 + $0x4c0] ss:$8 sps:$4 sm:$0xff]  }
 0xa4a   : > { %5705 = vmatpush1.bf16.msra.mxu1 %v10777_v23  ;;  %5304 = vmatprep.subr.bf16.mxu0 %v10782_v12  ;;  %v10868_v23 = vld [vmem:[%s12473_s23 + $0x6c0] ss:$8 sps:$4 sm:$0xff]   ;;  %v10873_v12 = vld [vmem:[%s12473_s23 + $0x4d4] ss:$8 sps:$4 sm:$0xff]  }
 0xa4b   : > { %5706 = vmatprep.subr.bf16.mxu1 %v10785_v27  ;;  %v10876_v27 = vld [vmem:[%s12473_s23 + $0x6d4] ss:$8 sps:$4 sm:$0xff]  }
 0xa4d   : > { %5305 = vmatpush1.bf16.msra.mxu0 %v10780_v50  ;;  %v10871_v50 = vld [vmem:[%s12473_s23 + $0x4d0] ss:$8 sps:$4 sm:$0xff]  }
 0xa4e   : > { %5707 = vmatpush1.bf16.msra.mxu1 %v10783_v28  ;;  %5306 = vmatprep.subr.bf16.mxu0 %v10788_v29  ;;  %v10874_v28 = vld [vmem:[%s12473_s23 + $0x6d0] ss:$8 sps:$4 sm:$0xff]   ;;  %v10879_v29 = vld [vmem:[%s12473_s23 + $0x4e4] ss:$8 sps:$4 sm:$0xff]  }
 0xa4f   : > { %5708 = vmatprep.subr.bf16.mxu1 %v10791_v30  ;;  %v10882_v30 = vld [vmem:[%s12473_s23 + $0x6e4] ss:$8 sps:$4 sm:$0xff]  }
 0xa51   : > { %5307 = vmatpush1.bf16.msra.mxu0 %v10786_v31  ;;  %v10877_v31 = vld [vmem:[%s12473_s23 + $0x4e0] ss:$8 sps:$4 sm:$0xff]  }
 0xa52   : > { %5709 = vmatpush1.bf16.msra.mxu1 %v10789_v7  ;;  %6039 = vmatprep.subr.bf16.mxu0 %v10795_v32  ;;  %v10880_v7 = vld [vmem:[%s12473_s23 + $0x6e0] ss:$8 sps:$4 sm:$0xff]   ;;  %v10885_v32 = vld [vmem:[%s12473_s23 + $0x4f4] ss:$8 sps:$4 sm:$0xff]  }
 0xa53   : > { %6441 = vmatprep.subr.bf16.mxu1 %v10798_v34  ;;  %v10888_v34 = vld [vmem:[%s12473_s23 + $0x6f4] ss:$8 sps:$4 sm:$0xff]  }
 0xa54   : > { %5309 = vmatmul.mubr.bf16.vlgmr.msra.gmra.mrb[0].mxu0 %v12777_v35 }
 0xa55   : > { %5711 = vmatmul.mubr.bf16.vlgmr.msra.gmra.mrb[0].mxu1 %v12777_v35  ;;  %6040 = vmatpush1.bf16.msra.mxu0 %v10793_v36  ;;  %v10883_v36 = vld [vmem:[%s12473_s23 + $0x4f0] ss:$8 sps:$4 sm:$0xff]  }
 0xa56   : > { %6442 = vmatpush1.bf16.msra.mxu1 %v10796_v37  ;;  %6041 = vmatprep.subr.bf16.mxu0 %v10801_v38  ;;  %v10886_v37 = vld [vmem:[%s12473_s23 + $0x6f0] ss:$8 sps:$4 sm:$0xff]   ;;  %v10891_v38 = vld [vmem:[%s12473_s23 + $0x504] ss:$8 sps:$4 sm:$0xff]  }
 0xa57   : > { %6443 = vmatprep.subr.bf16.mxu1 %v10804_v39  ;;  %6071 = vmatprep.mubr.bf16.mxu0 %v12680_v9  ;;  %v10894_v39 = vld [vmem:[%s12473_s23 + $0x704] ss:$8 sps:$4 sm:$0xff]  }
 0xa58   : > { %6473 = vmatprep.mubr.bf16.mxu1 %v12680_v9  ;;  %v10819_v9 = vld [vmem:[%s12473_s23 + $0x444] ss:$8 sps:$4 sm:$0xff]  }
 0xa59   : > { %6042 = vmatpush1.bf16.msra.mxu0 %v10799_v40  ;;  %v10889_v40 = vld [vmem:[%s12473_s23 + $0x500] ss:$8 sps:$4 sm:$0xff]  }
 0xa5a   : > { %6444 = vmatpush1.bf16.msra.mxu1 %v10802_v24  ;;  %6043 = vmatprep.subr.bf16.mxu0 %v10807_v41  ;;  %v10892_v24 = vld [vmem:[%s12473_s23 + $0x700] ss:$8 sps:$4 sm:$0xff]   ;;  %v10897_v41 = vld [vmem:[%s12473_s23 + $0x514] ss:$8 sps:$4 sm:$0xff]  }
 0xa5b   : > { %6445 = vmatprep.subr.bf16.mxu1 %v10810_v21  ;;  %v10900_v21 = vld [vmem:[%s12473_s23 + $0x714] ss:$8 sps:$4 sm:$0xff]  }
 0xa5d   : > { %6044 = vmatpush1.bf16.msra.mxu0 %v10805_v42  ;;  %v10895_v42 = vld [vmem:[%s12473_s23 + $0x510] ss:$8 sps:$4 sm:$0xff]  }
 0xa5e   : > { %6446 = vmatpush1.bf16.msra.mxu1 %v10808_v43  ;;  %6045 = vmatprep.subr.bf16.mxu0 %v10813_v44  ;;  %v10898_v43 = vld [vmem:[%s12473_s23 + $0x710] ss:$8 sps:$4 sm:$0xff]   ;;  %v10903_v44 = vld [vmem:[%s12473_s23 + $0x524] ss:$8 sps:$4 sm:$0xff]  }
 0xa5f   : > { %6447 = vmatprep.subr.bf16.mxu1 %v10816_v1  ;;  %v10906_v1 = vld [vmem:[%s12473_s23 + $0x724] ss:$8 sps:$4 sm:$0xff]  }
 0xa61   : > { %6046 = vmatpush1.bf16.msra.mxu0 %v10811_v45  ;;  %v10901_v45 = vld [vmem:[%s12473_s23 + $0x520] ss:$8 sps:$4 sm:$0xff]  }
 0xa62   : > { %6448 = vmatpush1.bf16.msra.mxu1 %v10814_v46  ;;  %6047 = vmatprep.subr.bf16.mxu0 %v10819_v9  ;;  %v10909_v46 = vld [vmem:[%s12473_s23 + $0x534] ss:$8 sps:$4 sm:$0xff]  }
 0xa63   : > { %6449 = vmatprep.subr.bf16.mxu1 %v10822_v47  ;;  %v10912_v9 = vld [vmem:[%s12473_s23 + $0x734] ss:$8 sps:$4 sm:$0xff]   ;;  %v10907_v47 = vld [vmem:[%s12473_s23 + $0x530] ss:$8 sps:$4 sm:$0xff]  }
 0xa65   : > { %6048 = vmatpush1.bf16.msra.mxu0 %v10817_v48  ;;  %v10910_v48 = vld [vmem:[%s12473_s23 + $0x730] ss:$8 sps:$4 sm:$0xff]  }
 0xa66   : > { %6450 = vmatpush1.bf16.msra.mxu1 %v10820_v22  ;;  %6049 = vmatprep.subr.bf16.mxu0 %v10825_v6  ;;  %v10918_v22 = vld [vmem:[%s12473_s23 + $0x744] ss:$8 sps:$4 sm:$0xff]   ;;  %v10913_v6 = vld [vmem:[%s12473_s23 + $0x540] ss:$8 sps:$4 sm:$0xff]  }
 0xa67   : > { %6451 = vmatprep.subr.bf16.mxu1 %v10828_v14  ;;  %v10916_v14 = vld [vmem:[%s12473_s23 + $0x740] ss:$8 sps:$4 sm:$0xff]  }
 0xa69   : > { %6050 = vmatpush1.bf16.msra.mxu0 %v10823_v51  ;;  %v10921_v51 = vld [vmem:[%s12473_s23 + $0x554] ss:$8 sps:$4 sm:$0xff]  }
 0xa6a   : > { %6452 = vmatpush1.bf16.msra.mxu1 %v10826_v52  ;;  %6051 = vmatprep.subr.bf16.mxu0 %v10831_v54  ;;  %v10924_v52 = vld [vmem:[%s12473_s23 + $0x754] ss:$8 sps:$4 sm:$0xff]   ;;  %v10919_v54 = vld [vmem:[%s12473_s23 + $0x550] ss:$8 sps:$4 sm:$0xff]  }
 0xa6b   : > { %6453 = vmatprep.subr.bf16.mxu1 %v10834_v55  ;;  %v10922_v55 = vld [vmem:[%s12473_s23 + $0x750] ss:$8 sps:$4 sm:$0xff]  }
 0xa6d   : > { %6052 = vmatpush1.bf16.msra.mxu0 %v10829_v56  ;;  %v10927_v56 = vld [vmem:[%s12473_s23 + $0x564] ss:$8 sps:$4 sm:$0xff]  }
 0xa6e   : > { %6454 = vmatpush1.bf16.msra.mxu1 %v10832_v57  ;;  %6053 = vmatprep.subr.bf16.mxu0 %v10837_v58  ;;  %v10930_v57 = vld [vmem:[%s12473_s23 + $0x764] ss:$8 sps:$4 sm:$0xff]   ;;  %v10925_v58 = vld [vmem:[%s12473_s23 + $0x560] ss:$8 sps:$4 sm:$0xff]  }
 0xa6f   : > { %6455 = vmatprep.subr.bf16.mxu1 %v10840_v59  ;;  %v10928_v59 = vld [vmem:[%s12473_s23 + $0x760] ss:$8 sps:$4 sm:$0xff]  }
 0xa71   : > { %6054 = vmatpush1.bf16.msra.mxu0 %v10835_v60  ;;  %v10933_v60 = vld [vmem:[%s12473_s23 + $0x574] ss:$8 sps:$4 sm:$0xff]  }
 0xa72   : > { %6456 = vmatpush1.bf16.msra.mxu1 %v10838_v61  ;;  %6055 = vmatprep.subr.bf16.mxu0 %v10843_v62  ;;  %v10936_v61 = vld [vmem:[%s12473_s23 + $0x774] ss:$8 sps:$4 sm:$0xff]   ;;  %v10931_v62 = vld [vmem:[%s12473_s23 + $0x570] ss:$8 sps:$4 sm:$0xff]  }
 0xa73   : > { %6457 = vmatprep.subr.bf16.mxu1 %v10846_v63  ;;  %v10934_v63 = vld [vmem:[%s12473_s23 + $0x770] ss:$8 sps:$4 sm:$0xff]  }
 0xa75   : > { %6056 = vmatpush1.bf16.msra.mxu0 %v10841_v26  ;;  %v10939_v26 = vld [vmem:[%s12473_s23 + $0x584] ss:$8 sps:$4 sm:$0xff]  }
 0xa76   : > { %6458 = vmatpush1.bf16.msra.mxu1 %v10844_v3  ;;  %6057 = vmatprep.subr.bf16.mxu0 %v10849_v49  ;;  %v10942_v3 = vld [vmem:[%s12473_s23 + $0x784] ss:$8 sps:$4 sm:$0xff]   ;;  %v10937_v49 = vld [vmem:[%s12473_s23 + $0x580] ss:$8 sps:$4 sm:$0xff]  }
 0xa77   : > { %6459 = vmatprep.subr.bf16.mxu1 %v10852_v4  ;;  %v10940_v4 = vld [vmem:[%s12473_s23 + $0x780] ss:$8 sps:$4 sm:$0xff]  }
 0xa79   : > { %6058 = vmatpush1.bf16.msra.mxu0 %v10847_v5  ;;  %v10945_v5 = vld [vmem:[%s12473_s23 + $0x594] ss:$8 sps:$4 sm:$0xff]  }
 0xa7a   : > { %6460 = vmatpush1.bf16.msra.mxu1 %v10850_v8  ;;  %6059 = vmatprep.subr.bf16.mxu0 %v10855_v0  ;;  %v10948_v8 = vld [vmem:[%s12473_s23 + $0x794] ss:$8 sps:$4 sm:$0xff]   ;;  %v10943_v0 = vld [vmem:[%s12473_s23 + $0x590] ss:$8 sps:$4 sm:$0xff]  }
 0xa7b   : > { %6461 = vmatprep.subr.bf16.mxu1 %v10858_v10  ;;  %v10946_v10 = vld [vmem:[%s12473_s23 + $0x790] ss:$8 sps:$4 sm:$0xff]  }
 0xa7d   : > { %6060 = vmatpush1.bf16.msra.mxu0 %v10853_v2  ;;  %v10951_v2 = vld [vmem:[%s12473_s23 + $0x5a4] ss:$8 sps:$4 sm:$0xff]  }
 0xa7e   : > { %6462 = vmatpush1.bf16.msra.mxu1 %v10856_v25  ;;  %6061 = vmatprep.subr.bf16.mxu0 %v10861_v11  ;;  %v10954_v25 = vld [vmem:[%s12473_s23 + $0x7a4] ss:$8 sps:$4 sm:$0xff]   ;;  %v10949_v11 = vld [vmem:[%s12473_s23 + $0x5a0] ss:$8 sps:$4 sm:$0xff]  }
 0xa7f   : > { %6463 = vmatprep.subr.bf16.mxu1 %v10864_v15  ;;  %v10952_v15 = vld [vmem:[%s12473_s23 + $0x7a0] ss:$8 sps:$4 sm:$0xff]  }
 0xa81   : > { %6062 = vmatpush1.bf16.msra.mxu0 %v10859_v16  ;;  %v10957_v16 = vld [vmem:[%s12473_s23 + $0x5b4] ss:$8 sps:$4 sm:$0xff]  }
 0xa82   : > { %6464 = vmatpush1.bf16.msra.mxu1 %v10862_v17  ;;  %6063 = vmatprep.subr.bf16.mxu0 %v10867_v18  ;;  %v10960_v17 = vld [vmem:[%s12473_s23 + $0x7b4] ss:$8 sps:$4 sm:$0xff]   ;;  %v10955_v18 = vld [vmem:[%s12473_s23 + $0x5b0] ss:$8 sps:$4 sm:$0xff]  }
 0xa83   : > { %6465 = vmatprep.subr.bf16.mxu1 %v10870_v19  ;;  %v10958_v19 = vld [vmem:[%s12473_s23 + $0x7b0] ss:$8 sps:$4 sm:$0xff]  }
 0xa85   : > { %6064 = vmatpush1.bf16.msra.mxu0 %v10865_v20  ;;  %v10963_v20 = vld [vmem:[%s12473_s23 + $0x5c4] ss:$8 sps:$4 sm:$0xff]  }
 0xa86   : > { %6466 = vmatpush1.bf16.msra.mxu1 %v10868_v23  ;;  %6065 = vmatprep.subr.bf16.mxu0 %v10873_v12  ;;  %v10966_v23 = vld [vmem:[%s12473_s23 + $0x7c4] ss:$8 sps:$4 sm:$0xff]   ;;  %v10961_v12 = vld [vmem:[%s12473_s23 + $0x5c0] ss:$8 sps:$4 sm:$0xff]  }
 0xa87   : > { %6467 = vmatprep.subr.bf16.mxu1 %v10876_v27  ;;  %v10964_v27 = vld [vmem:[%s12473_s23 + $0x7c0] ss:$8 sps:$4 sm:$0xff]  }
 0xa89   : > { %6066 = vmatpush1.bf16.msra.mxu0 %v10871_v50  ;;  %v10969_v50 = vld [vmem:[%s12473_s23 + $0x5d4] ss:$8 sps:$4 sm:$0xff]  }
 0xa8a   : > { %6468 = vmatpush1.bf16.msra.mxu1 %v10874_v28  ;;  %6067 = vmatprep.subr.bf16.mxu0 %v10879_v29  ;;  %v10972_v28 = vld [vmem:[%s12473_s23 + $0x7d4] ss:$8 sps:$4 sm:$0xff]   ;;  %v10967_v29 = vld [vmem:[%s12473_s23 + $0x5d0] ss:$8 sps:$4 sm:$0xff]  }
 0xa8b   : > { %6469 = vmatprep.subr.bf16.mxu1 %v10882_v30  ;;  %v10970_v30 = vld [vmem:[%s12473_s23 + $0x7d0] ss:$8 sps:$4 sm:$0xff]  }
 0xa8d   : > { %6068 = vmatpush1.bf16.msra.mxu0 %v10877_v31  ;;  %v10975_v31 = vld [vmem:[%s12473_s23 + $0x5e4] ss:$8 sps:$4 sm:$0xff]  }
 0xa8e   : > { %6470 = vmatpush1.bf16.msra.mxu1 %v10880_v7  ;;  %6069 = vmatprep.subr.bf16.mxu0 %v10885_v32  ;;  %v10978_v7 = vld [vmem:[%s12473_s23 + $0x7e4] ss:$8 sps:$4 sm:$0xff]   ;;  %v10973_v32 = vld [vmem:[%s12473_s23 + $0x5e0] ss:$8 sps:$4 sm:$0xff]  }
 0xa8f   : > { %6471 = vmatprep.subr.bf16.mxu1 %v10888_v34  ;;  %v10976_v34 = vld [vmem:[%s12473_s23 + $0x7e0] ss:$8 sps:$4 sm:$0xff]  }
 0xa91   : > { %6070 = vmatpush1.bf16.msra.mxu0 %v10883_v36  ;;  %v10981_v36 = vld [vmem:[%s12473_s23 + $0x5f4] ss:$8 sps:$4 sm:$0xff]  }
 0xa92   : > { %6472 = vmatpush1.bf16.msra.mxu1 %v10886_v37  ;;  %6080 = vmatprep.subr.bf16.mxu0 %v10891_v38  ;;  %v10984_v37 = vld [vmem:[%s12473_s23 + $0x7f4] ss:$8 sps:$4 sm:$0xff]   ;;  %v10979_v38 = vld [vmem:[%s12473_s23 + $0x5f0] ss:$8 sps:$4 sm:$0xff]  }
 0xa93   : > { %6482 = vmatprep.subr.bf16.mxu1 %v10894_v39  ;;  %v10982_v39 = vld [vmem:[%s12473_s23 + $0x7f0] ss:$8 sps:$4 sm:$0xff]  }
 0xa94   : > { %6072 = vmatmul.mubr.bf16.vlgmr.msra.gmra.mrb[4].mxu0 %v12704_v13 }
 0xa95   : > { %6474 = vmatmul.mubr.bf16.vlgmr.msra.gmra.mrb[4].mxu1 %v12704_v13  ;;  %6081 = vmatpush1.bf16.msra.mxu0 %v10889_v40  ;;  %v10904_v13 = vld [vmem:[%s12473_s23 + $0x720] ss:$8 sps:$4 sm:$0xff]  }
 0xa96   : > { %6483 = vmatpush1.bf16.msra.mxu1 %v10892_v24  ;;  %6082 = vmatprep.subr.bf16.mxu0 %v10897_v41  ;;  %v10987_v40 = vld [vmem:[%s12481_s9 + $0x4] ss:$8 sps:$4 sm:$0xff]   ;;  %v10985_v41 = vld [vmem:[%s12481_s9] ss:$8 sps:$4 sm:$0xff]  }
 0xa97   : > { %6484 = vmatprep.subr.bf16.mxu1 %v10900_v21  ;;  %6112 = vmatprep.mubr.bf16.mxu0 %v12709_v33  ;;  %v10990_v24 = vld [vmem:[%s12481_s9 + $0x104] ss:$8 sps:$4 sm:$0xff]   ;;  %v10988_v21 = vld [vmem:[%s12481_s9 + $0x100] ss:$8 sps:$4 sm:$0xff]  }
 0xa98   : > { %6514 = vmatprep.mubr.bf16.mxu1 %v12709_v33  ;;  %v10915_v33 = vld [vmem:[%s12473_s23 + $0x544] ss:$8 sps:$4 sm:$0xff]  }
 0xa99   : > { %6083 = vmatpush1.bf16.msra.mxu0 %v10895_v42  ;;  %v10993_v42 = vld [vmem:[%s12481_s9 + $0x14] ss:$8 sps:$4 sm:$0xff]  }
 0xa9a   : > { %6485 = vmatpush1.bf16.msra.mxu1 %v10898_v43  ;;  %6084 = vmatprep.subr.bf16.mxu0 %v10903_v44  ;;  %v10996_v43 = vld [vmem:[%s12481_s9 + $0x114] ss:$8 sps:$4 sm:$0xff]   ;;  %v10991_v44 = vld [vmem:[%s12481_s9 + $0x10] ss:$8 sps:$4 sm:$0xff]  }
 0xa9b   : > { %6486 = vmatprep.subr.bf16.mxu1 %v10906_v1  ;;  %v10994_v1 = vld [vmem:[%s12481_s9 + $0x110] ss:$8 sps:$4 sm:$0xff]  }
 0xa9d   : > { %6085 = vmatpush1.bf16.msra.mxu0 %v10901_v45  ;;  %v10999_v45 = vld [vmem:[%s12481_s9 + $0x24] ss:$8 sps:$4 sm:$0xff]  }
 0xa9e   : > { %6487 = vmatpush1.bf16.msra.mxu1 %v10904_v13  ;;  %6086 = vmatprep.subr.bf16.mxu0 %v10909_v46  ;;  %v11002_v13 = vld [vmem:[%s12481_s9 + $0x124] ss:$8 sps:$4 sm:$0xff]   ;;  %v10997_v46 = vld [vmem:[%s12481_s9 + $0x20] ss:$8 sps:$4 sm:$0xff]  }
 0xa9f   : > { %6488 = vmatprep.subr.bf16.mxu1 %v10912_v9  ;;  %v11000_v9 = vld [vmem:[%s12481_s9 + $0x120] ss:$8 sps:$4 sm:$0xff]  }
 0xaa1   : > { %6087 = vmatpush1.bf16.msra.mxu0 %v10907_v47  ;;  %v11008_v47 = vld [vmem:[%s12481_s9 + $0x134] ss:$8 sps:$4 sm:$0xff]  }
 0xaa2   : > { %6489 = vmatpush1.bf16.msra.mxu1 %v10910_v48  ;;  %6088 = vmatprep.subr.bf16.mxu0 %v10915_v33  ;;  %v11003_v48 = vld [vmem:[%s12481_s9 + $0x30] ss:$8 sps:$4 sm:$0xff]  }
 0xaa3   : > { %6490 = vmatprep.subr.bf16.mxu1 %v10918_v22  ;;  %v11006_v33 = vld [vmem:[%s12481_s9 + $0x130] ss:$8 sps:$4 sm:$0xff]   ;;  %v11011_v22 = vld [vmem:[%s12481_s9 + $0x44] ss:$8 sps:$4 sm:$0xff]  }
 0xaa5   : > { %6089 = vmatpush1.bf16.msra.mxu0 %v10913_v6  ;;  %v11014_v6 = vld [vmem:[%s12481_s9 + $0x144] ss:$8 sps:$4 sm:$0xff]  }
 0xaa6   : > { %6491 = vmatpush1.bf16.msra.mxu1 %v10916_v14  ;;  %6090 = vmatprep.subr.bf16.mxu0 %v10921_v51  ;;  %v11009_v14 = vld [vmem:[%s12481_s9 + $0x40] ss:$8 sps:$4 sm:$0xff]  }
 0xaa7   : > { %6492 = vmatprep.subr.bf16.mxu1 %v10924_v52  ;;  %v11012_v51 = vld [vmem:[%s12481_s9 + $0x140] ss:$8 sps:$4 sm:$0xff]   ;;  %v11017_v52 = vld [vmem:[%s12481_s9 + $0x54] ss:$8 sps:$4 sm:$0xff]  }
 0xaa9   : > { %6091 = vmatpush1.bf16.msra.mxu0 %v10919_v54  ;;  %v11020_v54 = vld [vmem:[%s12481_s9 + $0x154] ss:$8 sps:$4 sm:$0xff]  }
 0xaaa   : > { %6493 = vmatpush1.bf16.msra.mxu1 %v10922_v55  ;;  %6092 = vmatprep.subr.bf16.mxu0 %v10927_v56  ;;  %v11015_v55 = vld [vmem:[%s12481_s9 + $0x50] ss:$8 sps:$4 sm:$0xff]  }
 0xaab   : > { %6494 = vmatprep.subr.bf16.mxu1 %v10930_v57  ;;  %v11018_v56 = vld [vmem:[%s12481_s9 + $0x150] ss:$8 sps:$4 sm:$0xff]   ;;  %v11023_v57 = vld [vmem:[%s12481_s9 + $0x64] ss:$8 sps:$4 sm:$0xff]  }
 0xaad   : > { %6093 = vmatpush1.bf16.msra.mxu0 %v10925_v58  ;;  %v11026_v58 = vld [vmem:[%s12481_s9 + $0x164] ss:$8 sps:$4 sm:$0xff]  }
 0xaae   : > { %6495 = vmatpush1.bf16.msra.mxu1 %v10928_v59  ;;  %6094 = vmatprep.subr.bf16.mxu0 %v10933_v60  ;;  %v11021_v59 = vld [vmem:[%s12481_s9 + $0x60] ss:$8 sps:$4 sm:$0xff]  }
 0xaaf   : > { %6496 = vmatprep.subr.bf16.mxu1 %v10936_v61  ;;  %v11024_v60 = vld [vmem:[%s12481_s9 + $0x160] ss:$8 sps:$4 sm:$0xff]   ;;  %v11029_v61 = vld [vmem:[%s12481_s9 + $0x74] ss:$8 sps:$4 sm:$0xff]  }
 0xab1   : > { %6095 = vmatpush1.bf16.msra.mxu0 %v10931_v62  ;;  %v11032_v62 = vld [vmem:[%s12481_s9 + $0x174] ss:$8 sps:$4 sm:$0xff]  }
 0xab2   : > { %6497 = vmatpush1.bf16.msra.mxu1 %v10934_v63  ;;  %6096 = vmatprep.subr.bf16.mxu0 %v10939_v26  ;;  %v11027_v63 = vld [vmem:[%s12481_s9 + $0x70] ss:$8 sps:$4 sm:$0xff]  }
 0xab3   : > { %6498 = vmatprep.subr.bf16.mxu1 %v10942_v3  ;;  %v11030_v26 = vld [vmem:[%s12481_s9 + $0x170] ss:$8 sps:$4 sm:$0xff]   ;;  %v11035_v3 = vld [vmem:[%s12481_s9 + $0x84] ss:$8 sps:$4 sm:$0xff]  }
 0xab5   : > { %6097 = vmatpush1.bf16.msra.mxu0 %v10937_v49  ;;  %v11038_v49 = vld [vmem:[%s12481_s9 + $0x184] ss:$8 sps:$4 sm:$0xff]  }
 0xab6   : > { %6499 = vmatpush1.bf16.msra.mxu1 %v10940_v4  ;;  %6098 = vmatprep.subr.bf16.mxu0 %v10945_v5  ;;  %v11033_v4 = vld [vmem:[%s12481_s9 + $0x80] ss:$8 sps:$4 sm:$0xff]  }
 0xab7   : > { %6500 = vmatprep.subr.bf16.mxu1 %v10948_v8  ;;  %v11036_v5 = vld [vmem:[%s12481_s9 + $0x180] ss:$8 sps:$4 sm:$0xff]   ;;  %v11041_v8 = vld [vmem:[%s12481_s9 + $0x94] ss:$8 sps:$4 sm:$0xff]  }
 0xab9   : > { %6099 = vmatpush1.bf16.msra.mxu0 %v10943_v0  ;;  %v11044_v0 = vld [vmem:[%s12481_s9 + $0x194] ss:$8 sps:$4 sm:$0xff]  }
 0xaba   : > { %6501 = vmatpush1.bf16.msra.mxu1 %v10946_v10  ;;  %6100 = vmatprep.subr.bf16.mxu0 %v10951_v2  ;;  %v11039_v10 = vld [vmem:[%s12481_s9 + $0x90] ss:$8 sps:$4 sm:$0xff]  }
 0xabb   : > { %6502 = vmatprep.subr.bf16.mxu1 %v10954_v25  ;;  %v11042_v2 = vld [vmem:[%s12481_s9 + $0x190] ss:$8 sps:$4 sm:$0xff]   ;;  %v11047_v25 = vld [vmem:[%s12481_s9 + $0xa4] ss:$8 sps:$4 sm:$0xff]  }
 0xabd   : > { %6101 = vmatpush1.bf16.msra.mxu0 %v10949_v11  ;;  %v11050_v11 = vld [vmem:[%s12481_s9 + $0x1a4] ss:$8 sps:$4 sm:$0xff]  }
 0xabe   : > { %6503 = vmatpush1.bf16.msra.mxu1 %v10952_v15  ;;  %6102 = vmatprep.subr.bf16.mxu0 %v10957_v16  ;;  %v11045_v15 = vld [vmem:[%s12481_s9 + $0xa0] ss:$8 sps:$4 sm:$0xff]  }
 0xabf   : > { %6504 = vmatprep.subr.bf16.mxu1 %v10960_v17  ;;  %v11048_v16 = vld [vmem:[%s12481_s9 + $0x1a0] ss:$8 sps:$4 sm:$0xff]   ;;  %v11053_v17 = vld [vmem:[%s12481_s9 + $0xb4] ss:$8 sps:$4 sm:$0xff]  }
 0xac1   : > { %6103 = vmatpush1.bf16.msra.mxu0 %v10955_v18  ;;  %v11056_v18 = vld [vmem:[%s12481_s9 + $0x1b4] ss:$8 sps:$4 sm:$0xff]  }
 0xac2   : > { %6505 = vmatpush1.bf16.msra.mxu1 %v10958_v19  ;;  %6104 = vmatprep.subr.bf16.mxu0 %v10963_v20  ;;  %v11051_v19 = vld [vmem:[%s12481_s9 + $0xb0] ss:$8 sps:$4 sm:$0xff]  }
 0xac3   : > { %6506 = vmatprep.subr.bf16.mxu1 %v10966_v23  ;;  %v11054_v20 = vld [vmem:[%s12481_s9 + $0x1b0] ss:$8 sps:$4 sm:$0xff]   ;;  %v11059_v23 = vld [vmem:[%s12481_s9 + $0xc4] ss:$8 sps:$4 sm:$0xff]  }
 0xac5   : > { %6105 = vmatpush1.bf16.msra.mxu0 %v10961_v12  ;;  %v11062_v12 = vld [vmem:[%s12481_s9 + $0x1c4] ss:$8 sps:$4 sm:$0xff]  }
 0xac6   : > { %6507 = vmatpush1.bf16.msra.mxu1 %v10964_v27  ;;  %6106 = vmatprep.subr.bf16.mxu0 %v10969_v50  ;;  %v11057_v27 = vld [vmem:[%s12481_s9 + $0xc0] ss:$8 sps:$4 sm:$0xff]  }
 0xac7   : > { %6508 = vmatprep.subr.bf16.mxu1 %v10972_v28  ;;  %v11060_v50 = vld [vmem:[%s12481_s9 + $0x1c0] ss:$8 sps:$4 sm:$0xff]   ;;  %v11065_v28 = vld [vmem:[%s12481_s9 + $0xd4] ss:$8 sps:$4 sm:$0xff]  }
 0xac9   : > { %6107 = vmatpush1.bf16.msra.mxu0 %v10967_v29  ;;  %v11068_v29 = vld [vmem:[%s12481_s9 + $0x1d4] ss:$8 sps:$4 sm:$0xff]  }
 0xaca   : > { %6509 = vmatpush1.bf16.msra.mxu1 %v10970_v30  ;;  %6108 = vmatprep.subr.bf16.mxu0 %v10975_v31  ;;  %v11063_v30 = vld [vmem:[%s12481_s9 + $0xd0] ss:$8 sps:$4 sm:$0xff]  }
 0xacb   : > { %6510 = vmatprep.subr.bf16.mxu1 %v10978_v7  ;;  %v11066_v31 = vld [vmem:[%s12481_s9 + $0x1d0] ss:$8 sps:$4 sm:$0xff]   ;;  %v11071_v7 = vld [vmem:[%s12481_s9 + $0xe4] ss:$8 sps:$4 sm:$0xff]  }
 0xacd   : > { %6109 = vmatpush1.bf16.msra.mxu0 %v10973_v32  ;;  %v11074_v32 = vld [vmem:[%s12481_s9 + $0x1e4] ss:$8 sps:$4 sm:$0xff]  }
 0xace   : > { %6511 = vmatpush1.bf16.msra.mxu1 %v10976_v34  ;;  %6110 = vmatprep.subr.bf16.mxu0 %v10981_v36  ;;  %v11069_v34 = vld [vmem:[%s12481_s9 + $0xe0] ss:$8 sps:$4 sm:$0xff]  }
 0xacf   : > { %6512 = vmatprep.subr.bf16.mxu1 %v10984_v37  ;;  %v11072_v36 = vld [vmem:[%s12481_s9 + $0x1e0] ss:$8 sps:$4 sm:$0xff]   ;;  %v11077_v37 = vld [vmem:[%s12481_s9 + $0xf4] ss:$8 sps:$4 sm:$0xff]  }
 0xad1   : > { %6111 = vmatpush1.bf16.msra.mxu0 %v10979_v38  ;;  %v11080_v38 = vld [vmem:[%s12481_s9 + $0x1f4] ss:$8 sps:$4 sm:$0xff]  }
 0xad2   : > { %6513 = vmatpush1.bf16.msra.mxu1 %v10982_v39  ;;  %6875 = vmatprep.subr.bf16.mxu0 %v10987_v40  ;;  %v11075_v39 = vld [vmem:[%s12481_s9 + $0xf0] ss:$8 sps:$4 sm:$0xff]  }
 0xad3   : > { %7076 = vmatprep.subr.bf16.mxu1 %v10990_v24  ;;  %v11078_v40 = vld [vmem:[%s12481_s9 + $0x1f0] ss:$8 sps:$4 sm:$0xff]   ;;  %v11083_v24 = vld [vmem:[%s12481_s9 + $0x204] ss:$8 sps:$4 sm:$0xff]  }
 0xad4   : > { %6113 = vmatmul.mubr.bf16.vlgmr.msra.gmra.mrb[4].mxu0 %v12777_v35 }
 0xad5   : > { %6515 = vmatmul.mubr.bf16.vlgmr.msra.gmra.mrb[4].mxu1 %v12777_v35  ;;  %6876 = vmatpush1.bf16.msra.mxu0 %v10985_v41  ;;  %v11005_v35 = vld [vmem:[%s12481_s9 + $0x34] ss:$8 sps:$4 sm:$0xff]   ;;  %v11086_v41 = vld [vmem:[%s12481_s9 + $0x304] ss:$8 sps:$4 sm:$0xff]  }
 0xad6   : > { %7077 = vmatpush1.bf16.msra.mxu1 %v10988_v21  ;;  %6877 = vmatprep.subr.bf16.mxu0 %v10993_v42  ;;  %v12982_v21 = vsub.s32 0, %v12665_v53  ;;  %v12985_v42 = vsub.s32 1, %v12665_v53 }
 0xad7   : > { %7078 = vmatprep.subr.bf16.mxu1 %v10996_v43  ;;  %v4867_v43 = vld [vmem:[%s12492_s2] sm:$0x3] }
 0xad9   : > { %6878 = vmatpush1.bf16.msra.mxu0 %v10991_v44  ;;  %v4868_v44 = vld [vmem:[%s12492_s2 + $0x2] sm:$0x3] }
 0xada   : > { %7079 = vmatpush1.bf16.msra.mxu1 %v10994_v1  ;;  %6879 = vmatprep.subr.bf16.mxu0 %v10999_v45  ;;  %v4878_v1 = vrot.slane %v4867_v43, %v12982_v21  ;;  %v4886_v45 = vrot.slane %v4868_v44, %v12982_v21 }
 0xadb   : > { %7080 = vmatprep.subr.bf16.mxu1 %v11002_v13  ;;  %v4882_v13 = vrot.slane %v4867_v43, %v12985_v42  ;;  %v11135_v43 = vld [vmem:[%s12481_s9 + $0x290] ss:$8 sps:$4 sm:$0xff]  }
 0xadd   : > { %6880 = vmatpush1.bf16.msra.mxu0 %v10997_v46  ;;  %v4890_v46 = vrot.slane %v4868_v44, %v12985_v42  ;;  %v11138_v44 = vld [vmem:[%s12481_s9 + $0x390] ss:$8 sps:$4 sm:$0xff]  }
 0xade   : > { %7081 = vmatpush1.bf16.msra.mxu1 %v11000_v9  ;;  %6881 = vmatprep.subr.bf16.mxu0 %v11005_v35 }
 0xadf   : > { %7082 = vmatprep.subr.bf16.mxu1 %v11008_v47 }
 0xae1   : > { %6882 = vmatpush1.bf16.msra.mxu0 %v11003_v48 }
 0xae2   : > { %7083 = vmatpush1.bf16.msra.mxu1 %v11006_v33  ;;  %6883 = vmatprep.subr.bf16.mxu0 %v11011_v22 }
 0xae3   : > { %7084 = vmatprep.subr.bf16.mxu1 %v11014_v6 }
 0xae5   : > { %6884 = vmatpush1.bf16.msra.mxu0 %v11009_v14 }
 0xae6   : > { %7085 = vmatpush1.bf16.msra.mxu1 %v11012_v51  ;;  %6885 = vmatprep.subr.bf16.mxu0 %v11017_v52 }
 0xae7   : > { %7086 = vmatprep.subr.bf16.mxu1 %v11020_v54 }
 0xae9   : > { %6886 = vmatpush1.bf16.msra.mxu0 %v11015_v55 }
 0xaea   : > { %7087 = vmatpush1.bf16.msra.mxu1 %v11018_v56  ;;  %6887 = vmatprep.subr.bf16.mxu0 %v11023_v57 }
 0xaeb   : > { %7088 = vmatprep.subr.bf16.mxu1 %v11026_v58 }
 0xaed   : > { %6888 = vmatpush1.bf16.msra.mxu0 %v11021_v59 }
 0xaee   : > { %7089 = vmatpush1.bf16.msra.mxu1 %v11024_v60  ;;  %6889 = vmatprep.subr.bf16.mxu0 %v11029_v61  ;;  %v11081_v61 = vld [vmem:[%s12481_s9 + $0x200] ss:$8 sps:$4 sm:$0xff]  }
 0xaef   : > { %7090 = vmatprep.subr.bf16.mxu1 %v11032_v62  ;;  %v11084_v62 = vld [vmem:[%s12481_s9 + $0x300] ss:$8 sps:$4 sm:$0xff]  }
 0xaf1   : > { %6890 = vmatpush1.bf16.msra.mxu0 %v11027_v63 }
 0xaf2   : > { %7091 = vmatpush1.bf16.msra.mxu1 %v11030_v26  ;;  %6891 = vmatprep.subr.bf16.mxu0 %v11035_v3  ;;  %v11089_v3 = vld [vmem:[%s12481_s9 + $0x214] ss:$8 sps:$4 sm:$0xff]  }
 0xaf3   : > { %7092 = vmatprep.subr.bf16.mxu1 %v11038_v49  ;;  %v11092_v49 = vld [vmem:[%s12481_s9 + $0x314] ss:$8 sps:$4 sm:$0xff]  }
 0xaf5   : > { %6892 = vmatpush1.bf16.msra.mxu0 %v11033_v4  ;;  %v11087_v4 = vld [vmem:[%s12481_s9 + $0x210] ss:$8 sps:$4 sm:$0xff]  }
 0xaf6   : > { %7093 = vmatpush1.bf16.msra.mxu1 %v11036_v5  ;;  %6893 = vmatprep.subr.bf16.mxu0 %v11041_v8  ;;  %v11090_v5 = vld [vmem:[%s12481_s9 + $0x310] ss:$8 sps:$4 sm:$0xff]   ;;  %v11095_v8 = vld [vmem:[%s12481_s9 + $0x224] ss:$8 sps:$4 sm:$0xff]  }
 0xaf7   : > { %7094 = vmatprep.subr.bf16.mxu1 %v11044_v0  ;;  %v11098_v0 = vld [vmem:[%s12481_s9 + $0x324] ss:$8 sps:$4 sm:$0xff]  }
 0xaf9   : > { %6894 = vmatpush1.bf16.msra.mxu0 %v11039_v10  ;;  %v11093_v10 = vld [vmem:[%s12481_s9 + $0x220] ss:$8 sps:$4 sm:$0xff]  }
 0xafa   : > { %7095 = vmatpush1.bf16.msra.mxu1 %v11042_v2  ;;  %6895 = vmatprep.subr.bf16.mxu0 %v11047_v25  ;;  %v11096_v2 = vld [vmem:[%s12481_s9 + $0x320] ss:$8 sps:$4 sm:$0xff]   ;;  %v11101_v25 = vld [vmem:[%s12481_s9 + $0x234] ss:$8 sps:$4 sm:$0xff]  }
 0xafb   : > { %7096 = vmatprep.subr.bf16.mxu1 %v11050_v11  ;;  %v11104_v11 = vld [vmem:[%s12481_s9 + $0x334] ss:$8 sps:$4 sm:$0xff]  }
 0xafd   : > { %6896 = vmatpush1.bf16.msra.mxu0 %v11045_v15  ;;  %v11099_v15 = vld [vmem:[%s12481_s9 + $0x230] ss:$8 sps:$4 sm:$0xff]  }
 0xafe   : > { %7097 = vmatpush1.bf16.msra.mxu1 %v11048_v16  ;;  %6897 = vmatprep.subr.bf16.mxu0 %v11053_v17  ;;  %v11102_v16 = vld [vmem:[%s12481_s9 + $0x330] ss:$8 sps:$4 sm:$0xff]   ;;  %v11107_v17 = vld [vmem:[%s12481_s9 + $0x244] ss:$8 sps:$4 sm:$0xff]  }
 0xaff   : > { %7098 = vmatprep.subr.bf16.mxu1 %v11056_v18  ;;  %v11110_v18 = vld [vmem:[%s12481_s9 + $0x344] ss:$8 sps:$4 sm:$0xff]  }
 0xb01   : > { %6898 = vmatpush1.bf16.msra.mxu0 %v11051_v19  ;;  %v11105_v19 = vld [vmem:[%s12481_s9 + $0x240] ss:$8 sps:$4 sm:$0xff]  }
 0xb02   : > { %7099 = vmatpush1.bf16.msra.mxu1 %v11054_v20  ;;  %6899 = vmatprep.subr.bf16.mxu0 %v11059_v23  ;;  %v11108_v20 = vld [vmem:[%s12481_s9 + $0x340] ss:$8 sps:$4 sm:$0xff]   ;;  %v11113_v23 = vld [vmem:[%s12481_s9 + $0x254] ss:$8 sps:$4 sm:$0xff]  }
 0xb03   : > { %7100 = vmatprep.subr.bf16.mxu1 %v11062_v12  ;;  %v11116_v12 = vld [vmem:[%s12481_s9 + $0x354] ss:$8 sps:$4 sm:$0xff]  }
 0xb05   : > { %6900 = vmatpush1.bf16.msra.mxu0 %v11057_v27  ;;  %v11111_v27 = vld [vmem:[%s12481_s9 + $0x250] ss:$8 sps:$4 sm:$0xff]  }
 0xb06   : > { %7101 = vmatpush1.bf16.msra.mxu1 %v11060_v50  ;;  %6901 = vmatprep.subr.bf16.mxu0 %v11065_v28  ;;  %v11114_v50 = vld [vmem:[%s12481_s9 + $0x350] ss:$8 sps:$4 sm:$0xff]   ;;  %v11119_v28 = vld [vmem:[%s12481_s9 + $0x264] ss:$8 sps:$4 sm:$0xff]  }
 0xb07   : > { %7102 = vmatprep.subr.bf16.mxu1 %v11068_v29  ;;  %v11122_v29 = vld [vmem:[%s12481_s9 + $0x364] ss:$8 sps:$4 sm:$0xff]  }
 0xb09   : > { %6902 = vmatpush1.bf16.msra.mxu0 %v11063_v30  ;;  %v11117_v30 = vld [vmem:[%s12481_s9 + $0x260] ss:$8 sps:$4 sm:$0xff]  }
 0xb0a   : > { %7103 = vmatpush1.bf16.msra.mxu1 %v11066_v31  ;;  %6903 = vmatprep.subr.bf16.mxu0 %v11071_v7  ;;  %v11120_v31 = vld [vmem:[%s12481_s9 + $0x360] ss:$8 sps:$4 sm:$0xff]   ;;  %v11125_v7 = vld [vmem:[%s12481_s9 + $0x274] ss:$8 sps:$4 sm:$0xff]  }
 0xb0b   : > { %7104 = vmatprep.subr.bf16.mxu1 %v11074_v32  ;;  %v11128_v32 = vld [vmem:[%s12481_s9 + $0x374] ss:$8 sps:$4 sm:$0xff]  }
 0xb0d   : > { %6904 = vmatpush1.bf16.msra.mxu0 %v11069_v34  ;;  %v11123_v34 = vld [vmem:[%s12481_s9 + $0x270] ss:$8 sps:$4 sm:$0xff]  }
 0xb0e   : > { %7105 = vmatpush1.bf16.msra.mxu1 %v11072_v36  ;;  %6905 = vmatprep.subr.bf16.mxu0 %v11077_v37  ;;  %v11126_v36 = vld [vmem:[%s12481_s9 + $0x370] ss:$8 sps:$4 sm:$0xff]   ;;  %v11131_v37 = vld [vmem:[%s12481_s9 + $0x284] ss:$8 sps:$4 sm:$0xff]  }
 0xb0f   : > { %7106 = vmatprep.subr.bf16.mxu1 %v11080_v38  ;;  %v11134_v38 = vld [vmem:[%s12481_s9 + $0x384] ss:$8 sps:$4 sm:$0xff]  }
 0xb11   : > { %6906 = vmatpush1.bf16.msra.mxu0 %v11075_v39  ;;  %v11129_v39 = vld [vmem:[%s12481_s9 + $0x280] ss:$8 sps:$4 sm:$0xff]  }
 0xb12   : > { %7107 = vmatpush1.bf16.msra.mxu1 %v11078_v40  ;;  %7277 = vmatprep.subr.bf16.mxu0 %v11083_v24  ;;  %v11132_v40 = vld [vmem:[%s12481_s9 + $0x380] ss:$8 sps:$4 sm:$0xff]   ;;  %v11137_v24 = vld [vmem:[%s12481_s9 + $0x294] ss:$8 sps:$4 sm:$0xff]  }
 0xb13   : > { %7478 = vmatprep.subr.bf16.mxu1 %v11086_v41  ;;  %v11140_v41 = vld [vmem:[%s12481_s9 + $0x394] ss:$8 sps:$4 sm:$0xff]  }
 0xb27   : > { %v5310_v9 = vpop.f32.mrb[0].mxu0 }
 0xb28   : > { %v5712_v35 = vpop.f32.mrb[0].mxu1  ;;  %v9749_v47 = vadd.f32 %v5310_v9, %v4878_v1  ;;  %v5312_v33 = vpop.f32.mrb[1].mxu0  ;;  %v11143_v1 = vld [vmem:[%s12481_s9 + $0x2a4] ss:$8 sps:$4 sm:$0xff]   ;;  %v11149_v9 = vld [vmem:[%s12481_s9 + $0x2b4] ss:$8 sps:$4 sm:$0xff]  }
 0xb29   : > { %v9751_v48 = vadd.f32 %v5712_v35, %v4886_v45  ;;  %v5714_v22 = vpop.f32.mrb[1].mxu1  ;;  %v9750_v53 = vadd.f32 %v5312_v33, %v4882_v13  ;;  %v5314_v14 = vpop.f32.mrb[2].mxu0  ;;  %v11146_v45 = vld [vmem:[%s12481_s9 + $0x3a4] ss:$8 sps:$4 sm:$0xff]   ;;  %v11141_v13 = vld [vmem:[%s12481_s9 + $0x2a0] ss:$8 sps:$4 sm:$0xff]  }
 0xb2a   : > { %v9752_v6 = vadd.f32 %v5714_v22, %v4890_v46  ;;  %v5716_v51 = vpop.f32.mrb[2].mxu1  ;;  %v6523_v52 = vmax.f32 %v9749_v47, 0.0  ;;  %v5315_v55 = vpop.f32.mrb[3].mxu0  ;;  %v11144_v46 = vld [vmem:[%s12481_s9 + $0x3a0] ss:$8 sps:$4 sm:$0xff]  }
 0xb2b   : > { %v6525_v54 = vmax.f32 %v9751_v48, 0.0  ;;  %v5717_v56 = vpop.f32.mrb[3].mxu1  ;;  %v6524_v57 = vmax.f32 %v9750_v53, 0.0  ;;  %v11152_v35 = vld [vmem:[%s12481_s9 + $0x3b4] ss:$8 sps:$4 sm:$0xff]  }
 0xb2c   : > { %v6526_v58 = vmax.f32 %v9752_v6, 0.0  ;;  %v6659_v63 = vpack.c.bf16 %v6523_v52, %v6523_v52  ;;  %v11147_v47 = vld [vmem:[%s12481_s9 + $0x2b0] ss:$8 sps:$4 sm:$0xff]   ;;  %v11155_v33 = vld [vmem:[%s12481_s9 + $0x2c4] ss:$8 sps:$4 sm:$0xff]  }
 0xb2d   : > { %v6660_v59 = vpack.c.bf16 %v6524_v57, %v6524_v57  ;;  %v6661_v26 = vpack.c.bf16 %v6525_v54, %v6525_v54  ;;  %v11150_v48 = vld [vmem:[%s12481_s9 + $0x3b0] ss:$8 sps:$4 sm:$0xff]   ;;  %v11158_v22 = vld [vmem:[%s12481_s9 + $0x3c4] ss:$8 sps:$4 sm:$0xff]   ;;  %v11153_v53 = vld [vmem:[%s12481_s9 + $0x2c0] ss:$8 sps:$4 sm:$0xff]  }
 0xb2e   : > { %v6662_v60 = vpack.c.bf16 %v6526_v58, %v6526_v58  ;;  %v11156_v6 = vld [vmem:[%s12481_s9 + $0x3c0] ss:$8 sps:$4 sm:$0xff]   ;;  %v11161_v14 = vld [vmem:[%s12481_s9 + $0x2d4] ss:$8 sps:$4 sm:$0xff]   ;;  %v11159_v52 = vld [vmem:[%s12481_s9 + $0x2d0] ss:$8 sps:$4 sm:$0xff]  }
 0xb2f   : > { %6907 = vmatprep.mubr.bf16.mxu0 %v6660_v59  ;;  %v11164_v51 = vld [vmem:[%s12481_s9 + $0x3d4] ss:$8 sps:$4 sm:$0xff]   ;;  %v11162_v54 = vld [vmem:[%s12481_s9 + $0x3d0] ss:$8 sps:$4 sm:$0xff]   ;;  %v11167_v55 = vld [vmem:[%s12481_s9 + $0x2e4] ss:$8 sps:$4 sm:$0xff]  }
 0xb30   : > { %7108 = vmatprep.mubr.bf16.mxu1 %v6662_v60  ;;  %6908 = vmatmul.mubr.bf16.vlgmr.msra.gmra.mrb[8].mxu0 %v6659_v63  ;;  %v11170_v56 = vld [vmem:[%s12481_s9 + $0x3e4] ss:$8 sps:$4 sm:$0xff]   ;;  %v11165_v57 = vld [vmem:[%s12481_s9 + $0x2e0] ss:$8 sps:$4 sm:$0xff]   ;;  %v11173_v59 = vld [vmem:[%s12481_s9 + $0x2f4] ss:$8 sps:$4 sm:$0xff]  }
 0xb31   : > { %7109 = vmatmul.mubr.bf16.vlgmr.msra.gmra.mrb[8].mxu1 %v6661_v26  ;;  %7278 = vmatpush1.bf16.msra.mxu0 %v11081_v61  ;;  %v11168_v58 = vld [vmem:[%s12481_s9 + $0x3e0] ss:$8 sps:$4 sm:$0xff]   ;;  %v11176_v60 = vld [vmem:[%s12481_s9 + $0x3f4] ss:$8 sps:$4 sm:$0xff]   ;;  %v11171_v61 = vld [vmem:[%s12481_s9 + $0x2f0] ss:$8 sps:$4 sm:$0xff]  }
 0xb32   : > { %7479 = vmatpush1.bf16.msra.mxu1 %v11084_v62  ;;  %7279 = vmatprep.subr.bf16.mxu0 %v11089_v3  ;;  %v11174_v62 = vld [vmem:[%s12481_s9 + $0x3f0] ss:$8 sps:$4 sm:$0xff]   ;;  %v11177_v63 = vld [vmem:[%s12484_s18 + $0x40] sm:$0xff]  }
 0xb33   : > { %7480 = vmatprep.subr.bf16.mxu1 %v11092_v49  ;;  %v11178_v26 = vld [vmem:[%s12484_s18 + $0xc0] sm:$0xff]   ;;  %v4869_v3 = vld [vmem:[%s12492_s2 + $0x4] sm:$0x3]  ;;  %v4870_v49 = vld [vmem:[%s12492_s2 + $0x6] sm:$0x3] }
 0xb35   : > { %7280 = vmatpush1.bf16.msra.mxu0 %v11087_v4  ;;  %v4894_v4 = vrot.slane %v4869_v3, %v12982_v21 }
 0xb36   : > { %7481 = vmatpush1.bf16.msra.mxu1 %v11090_v5  ;;  %7281 = vmatprep.subr.bf16.mxu0 %v11095_v8  ;;  %v4902_v5 = vrot.slane %v4870_v49, %v12982_v21  ;;  %v4898_v8 = vrot.slane %v4869_v3, %v12985_v42 }
 0xb37   : > { %7482 = vmatprep.subr.bf16.mxu1 %v11098_v0  ;;  %v4906_v0 = vrot.slane %v4870_v49, %v12985_v42 }
 0xb39   : > { %7282 = vmatpush1.bf16.msra.mxu0 %v11093_v10 }
 0xb3a   : > { %7483 = vmatpush1.bf16.msra.mxu1 %v11096_v2  ;;  %7283 = vmatprep.subr.bf16.mxu0 %v11101_v25 }
 0xb3b   : > { %7484 = vmatprep.subr.bf16.mxu1 %v11104_v11 }
 0xb3d   : > { %7284 = vmatpush1.bf16.msra.mxu0 %v11099_v15 }
 0xb3e   : > { %7485 = vmatpush1.bf16.msra.mxu1 %v11102_v16  ;;  %7285 = vmatprep.subr.bf16.mxu0 %v11107_v17 }
 0xb3f   : > { %7486 = vmatprep.subr.bf16.mxu1 %v11110_v18 }
 0xb41   : > { %7286 = vmatpush1.bf16.msra.mxu0 %v11105_v19 }
 0xb42   : > { %7487 = vmatpush1.bf16.msra.mxu1 %v11108_v20  ;;  %7287 = vmatprep.subr.bf16.mxu0 %v11113_v23 }
 0xb43   : > { %7488 = vmatprep.subr.bf16.mxu1 %v11116_v12 }
 0xb45   : > { %7288 = vmatpush1.bf16.msra.mxu0 %v11111_v27 }
 0xb46   : > { %7489 = vmatpush1.bf16.msra.mxu1 %v11114_v50  ;;  %7289 = vmatprep.subr.bf16.mxu0 %v11119_v28 }
 0xb47   : > { %7490 = vmatprep.subr.bf16.mxu1 %v11122_v29 }
 0xb49   : > { %7290 = vmatpush1.bf16.msra.mxu0 %v11117_v30 }
 0xb4a   : > { %7491 = vmatpush1.bf16.msra.mxu1 %v11120_v31  ;;  %7291 = vmatprep.subr.bf16.mxu0 %v11125_v7  ;;  %v11179_v7 = vld [vmem:[%s12484_s18] sm:$0xff]  }
 0xb4b   : > { %7492 = vmatprep.subr.bf16.mxu1 %v11128_v32  ;;  %v11180_v32 = vld [vmem:[%s12484_s18 + $0x80] sm:$0xff]  }
 0xb4d   : > { %7292 = vmatpush1.bf16.msra.mxu0 %v11123_v34 }
 0xb4e   : > { %7493 = vmatpush1.bf16.msra.mxu1 %v11126_v36  ;;  %7293 = vmatprep.subr.bf16.mxu0 %v11131_v37  ;;  %v11181_v37 = vld [vmem:[%s12484_s18 + $0x48] sm:$0xff]  }
 0xb4f   : > { %7494 = vmatprep.subr.bf16.mxu1 %v11134_v38  ;;  %v11182_v38 = vld [vmem:[%s12484_s18 + $0xc8] sm:$0xff]  }
 0xb51   : > { %7294 = vmatpush1.bf16.msra.mxu0 %v11129_v39  ;;  %v11183_v39 = vld [vmem:[%s12484_s18 + $0x8] sm:$0xff]  }
 0xb52   : > { %7495 = vmatpush1.bf16.msra.mxu1 %v11132_v40  ;;  %7295 = vmatprep.subr.bf16.mxu0 %v11137_v24  ;;  %v11184_v40 = vld [vmem:[%s12484_s18 + $0x88] sm:$0xff]   ;;  %v11185_v24 = vld [vmem:[%s12484_s18 + $0x50] sm:$0xff]  }
 0xb53   : > { %7496 = vmatprep.subr.bf16.mxu1 %v11140_v41  ;;  %v11186_v41 = vld [vmem:[%s12484_s18 + $0xd0] sm:$0xff]  }
 0xb55   : > { %7296 = vmatpush1.bf16.msra.mxu0 %v11135_v43  ;;  %v11187_v43 = vld [vmem:[%s12484_s18 + $0x10] sm:$0xff]  }
 0xb56   : > { %7497 = vmatpush1.bf16.msra.mxu1 %v11138_v44  ;;  %7297 = vmatprep.subr.bf16.mxu0 %v11143_v1  ;;  %v11188_v44 = vld [vmem:[%s12484_s18 + $0x90] sm:$0xff]   ;;  %v11189_v1 = vld [vmem:[%s12484_s18 + $0x58] sm:$0xff]  }
 0xb57   : > { %7498 = vmatprep.subr.bf16.mxu1 %v11146_v45  ;;  %v11190_v45 = vld [vmem:[%s12484_s18 + $0xd8] sm:$0xff]  }
 0xb59   : > { %7298 = vmatpush1.bf16.msra.mxu0 %v11141_v13  ;;  %v11191_v13 = vld [vmem:[%s12484_s18 + $0x18] sm:$0xff]  }
 0xb5a   : > { %7499 = vmatpush1.bf16.msra.mxu1 %v11144_v46  ;;  %7299 = vmatprep.subr.bf16.mxu0 %v11149_v9  ;;  %v11192_v46 = vld [vmem:[%s12484_s18 + $0x98] sm:$0xff]   ;;  %v11193_v9 = vld [vmem:[%s12484_s18 + $0x60] sm:$0xff]  }
 0xb5b   : > { %7500 = vmatprep.subr.bf16.mxu1 %v11152_v35  ;;  %v11194_v35 = vld [vmem:[%s12484_s18 + $0xe0] sm:$0xff]  }
 0xb5d   : > { %7300 = vmatpush1.bf16.msra.mxu0 %v11147_v47  ;;  %v11195_v47 = vld [vmem:[%s12484_s18 + $0x20] sm:$0xff]  }
 0xb5e   : > { %7501 = vmatpush1.bf16.msra.mxu1 %v11150_v48  ;;  %7301 = vmatprep.subr.bf16.mxu0 %v11155_v33  ;;  %v11196_v48 = vld [vmem:[%s12484_s18 + $0xa0] sm:$0xff]   ;;  %v11197_v33 = vld [vmem:[%s12484_s18 + $0x68] sm:$0xff]  }
 0xb5f   : > { %7502 = vmatprep.subr.bf16.mxu1 %v11158_v22  ;;  %v11198_v22 = vld [vmem:[%s12484_s18 + $0xe8] sm:$0xff]  }
 0xb61   : > { %7302 = vmatpush1.bf16.msra.mxu0 %v11153_v53  ;;  %v11199_v53 = vld [vmem:[%s12484_s18 + $0x28] sm:$0xff]  }
 0xb62   : > { %7503 = vmatpush1.bf16.msra.mxu1 %v11156_v6  ;;  %7303 = vmatprep.subr.bf16.mxu0 %v11161_v14  ;;  %v11200_v6 = vld [vmem:[%s12484_s18 + $0xa8] sm:$0xff]   ;;  %v11201_v14 = vld [vmem:[%s12484_s18 + $0x70] sm:$0xff]  }
 0xb63   : > { %7504 = vmatprep.subr.bf16.mxu1 %v11164_v51  ;;  %v11202_v51 = vld [vmem:[%s12484_s18 + $0xf0] sm:$0xff]  }
 0xb65   : > { %7304 = vmatpush1.bf16.msra.mxu0 %v11159_v52  ;;  %v11203_v52 = vld [vmem:[%s12484_s18 + $0x30] sm:$0xff]  }
 0xb66   : > { %7505 = vmatpush1.bf16.msra.mxu1 %v11162_v54  ;;  %7305 = vmatprep.subr.bf16.mxu0 %v11167_v55  ;;  %v11204_v54 = vld [vmem:[%s12484_s18 + $0xb0] sm:$0xff]   ;;  %v11205_v55 = vld [vmem:[%s12484_s18 + $0x78] sm:$0xff]  }
 0xb67   : > { %7506 = vmatprep.subr.bf16.mxu1 %v11170_v56  ;;  %v11206_v56 = vld [vmem:[%s12484_s18 + $0xf8] sm:$0xff]  }
 0xb69   : > { %7306 = vmatpush1.bf16.msra.mxu0 %v11165_v57  ;;  %v11207_v57 = vld [vmem:[%s12484_s18 + $0x38] sm:$0xff]  }
 0xb6a   : > { %7507 = vmatpush1.bf16.msra.mxu1 %v11168_v58  ;;  %7307 = vmatprep.subr.bf16.mxu0 %v11173_v59  ;;  %v11208_v58 = vld [vmem:[%s12484_s18 + $0xb8] sm:$0xff]   ;;  %v11209_v59 = vld [vmem:[%s12484_s18 + $0x140] sm:$0xff]  }
 0xb6b   : > { %7508 = vmatprep.subr.bf16.mxu1 %v11176_v60  ;;  %v11210_v60 = vld [vmem:[%s12484_s18 + $0x1c0] sm:$0xff]  }
 0xb6d   : > { %7308 = vmatpush1.bf16.msra.mxu0 %v11171_v61  ;;  %v6667_v61 = vld [vmem:[%s12494_s4] sm:$0x3] }
 0xb6e   : > { %7509 = vmatpush1.bf16.msra.mxu1 %v11174_v62  ;;  %9623 = vmatprep.subr.bf16.mxu0 %v11177_v63  ;;  %v6668_v62 = vld [vmem:[%s12494_s4 + $0x2] sm:$0x3]  ;;  %v6678_v63 = vrot.slane %v6667_v61, %v12982_v21  ;;  %v6682_v3 = vrot.slane %v6667_v61, %v12985_v42 }
 0xb6f   : > { %9645 = vmatprep.subr.bf16.mxu1 %v11178_v26  ;;  %v6686_v26 = vrot.slane %v6668_v62, %v12982_v21  ;;  %v6690_v49 = vrot.slane %v6668_v62, %v12985_v42 }
 0xba7   : > { %v6114_v10 = vpop.f32.mrb[4].mxu0 }
 0xba8   : > { %v6516_v2 = vpop.f32.mrb[4].mxu1  ;;  %v9753_v25 = vadd.f32 %v6114_v10, %v4894_v4  ;;  %v6116_v15 = vpop.f32.mrb[5].mxu0 }
 0xba9   : > { %v9755_v11 = vadd.f32 %v6516_v2, %v4902_v5  ;;  %v6518_v16 = vpop.f32.mrb[5].mxu1  ;;  %v9754_v17 = vadd.f32 %v6116_v15, %v4898_v8  ;;  %v6118_v19 = vpop.f32.mrb[6].mxu0 }
 0xbaa   : > { %v9756_v18 = vadd.f32 %v6518_v16, %v4906_v0  ;;  %v6520_v20 = vpop.f32.mrb[6].mxu1  ;;  %v6527_v23 = vmax.f32 %v9753_v25, 0.0  ;;  %v6119_v27 = vpop.f32.mrb[7].mxu0 }
 0xbab   : > { %v6529_v12 = vmax.f32 %v9755_v11, 0.0  ;;  %v6521_v50 = vpop.f32.mrb[7].mxu1  ;;  %v6528_v28 = vmax.f32 %v9754_v17, 0.0 }
 0xbac   : > { %v6530_v29 = vmax.f32 %v9756_v18, 0.0  ;;  %v6663_v34 = vpack.c.bf16 %v6527_v23, %v6527_v23 }
 0xbad   : > { %v6664_v30 = vpack.c.bf16 %v6528_v28, %v6528_v28  ;;  %v6665_v36 = vpack.c.bf16 %v6529_v12, %v6529_v12  ;;  %v11211_v28 = vld [vmem:[%s12484_s18 + $0x100] sm:$0xff]  }
 0xbae   : > { %v6666_v31 = vpack.c.bf16 %v6530_v29, %v6530_v29  ;;  %v11212_v29 = vld [vmem:[%s12484_s18 + $0x180] sm:$0xff]  }
 0xbaf   : > { %7309 = vmatprep.mubr.bf16.mxu0 %v6664_v30 }
 0xbb0   : > { %7510 = vmatprep.mubr.bf16.mxu1 %v6666_v31  ;;  %7310 = vmatmul.mubr.bf16.vlgmr.msra.gmra.mrb[12].mxu0 %v6663_v34  ;;  %v11215_v34 = vld [vmem:[%s12484_s18 + $0x108] sm:$0xff]  }
 0xbb1   : > { %7511 = vmatmul.mubr.bf16.vlgmr.msra.gmra.mrb[12].mxu1 %v6665_v36  ;;  %9624 = vmatpush3.bf16.msra.mxu0 %v11179_v7  ;;  %v11213_v7 = vld [vmem:[%s12484_s18 + $0x148] sm:$0xff]  }
 0xbb2   : > { %9646 = vmatpush3.bf16.msra.mxu1 %v11180_v32  ;;  %9625 = vmatprep.subr.bf16.mxu0 %v11181_v37  ;;  %v11214_v32 = vld [vmem:[%s12484_s18 + $0x1c8] sm:$0xff]   ;;  %v11217_v37 = vld [vmem:[%s12484_s18 + $0x150] sm:$0xff]  }
 0xbb3   : > { %9647 = vmatprep.subr.bf16.mxu1 %v11182_v38  ;;  %v11216_v36 = vld [vmem:[%s12484_s18 + $0x188] sm:$0xff]   ;;  %v11218_v38 = vld [vmem:[%s12484_s18 + $0x1d0] sm:$0xff]  }
 0xbb5   : > { %9626 = vmatpush3.bf16.msra.mxu0 %v11183_v39  ;;  %v11219_v39 = vld [vmem:[%s12484_s18 + $0x110] sm:$0xff]  }
 0xbb6   : > { %9648 = vmatpush3.bf16.msra.mxu1 %v11184_v40  ;;  %9627 = vmatprep.subr.bf16.mxu0 %v11185_v24  ;;  %v11220_v40 = vld [vmem:[%s12484_s18 + $0x190] sm:$0xff]   ;;  %v11221_v24 = vld [vmem:[%s12484_s18 + $0x158] sm:$0xff]  }
 0xbb7   : > { %9649 = vmatprep.subr.bf16.mxu1 %v11186_v41  ;;  %v11222_v41 = vld [vmem:[%s12484_s18 + $0x1d8] sm:$0xff]  }
 0xbb9   : > { %9628 = vmatpush3.bf16.msra.mxu0 %v11187_v43  ;;  %v11223_v43 = vld [vmem:[%s12484_s18 + $0x118] sm:$0xff]  }
 0xbba   : > { %9650 = vmatpush3.bf16.msra.mxu1 %v11188_v44  ;;  %9629 = vmatprep.subr.bf16.mxu0 %v11189_v1  ;;  %v11224_v44 = vld [vmem:[%s12484_s18 + $0x198] sm:$0xff]   ;;  %v11225_v1 = vld [vmem:[%s12484_s18 + $0x160] sm:$0xff]  }
 0xbbb   : > { %9651 = vmatprep.subr.bf16.mxu1 %v11190_v45  ;;  %v11226_v45 = vld [vmem:[%s12484_s18 + $0x1e0] sm:$0xff]  }
 0xbbd   : > { %9630 = vmatpush3.bf16.msra.mxu0 %v11191_v13  ;;  %v11227_v13 = vld [vmem:[%s12484_s18 + $0x120] sm:$0xff]  }
 0xbbe   : > { %9652 = vmatpush3.bf16.msra.mxu1 %v11192_v46  ;;  %9631 = vmatprep.subr.bf16.mxu0 %v11193_v9  ;;  %v11228_v46 = vld [vmem:[%s12484_s18 + $0x1a0] sm:$0xff]   ;;  %v11229_v9 = vld [vmem:[%s12484_s18 + $0x168] sm:$0xff]  }
 0xbbf   : > { %9653 = vmatprep.subr.bf16.mxu1 %v11194_v35  ;;  %v11230_v35 = vld [vmem:[%s12484_s18 + $0x1e8] sm:$0xff]  }
 0xbc1   : > { %9632 = vmatpush3.bf16.msra.mxu0 %v11195_v47  ;;  %v11231_v47 = vld [vmem:[%s12484_s18 + $0x128] sm:$0xff]  }
 0xbc2   : > { %9654 = vmatpush3.bf16.msra.mxu1 %v11196_v48  ;;  %9633 = vmatprep.subr.bf16.mxu0 %v11197_v33  ;;  %v11232_v48 = vld [vmem:[%s12484_s18 + $0x1a8] sm:$0xff]   ;;  %v11233_v33 = vld [vmem:[%s12484_s18 + $0x170] sm:$0xff]  }
 0xbc3   : > { %9655 = vmatprep.subr.bf16.mxu1 %v11198_v22  ;;  %v11234_v22 = vld [vmem:[%s12484_s18 + $0x1f0] sm:$0xff]  }
 0xbc5   : > { %9634 = vmatpush3.bf16.msra.mxu0 %v11199_v53  ;;  %v11235_v53 = vld [vmem:[%s12484_s18 + $0x130] sm:$0xff]  }
 0xbc6   : > { %9656 = vmatpush3.bf16.msra.mxu1 %v11200_v6  ;;  %9635 = vmatprep.subr.bf16.mxu0 %v11201_v14  ;;  %v11236_v6 = vld [vmem:[%s12484_s18 + $0x1b0] sm:$0xff]   ;;  %v11237_v14 = vld [vmem:[%s12484_s18 + $0x178] sm:$0xff]  }
 0xbc7   : > { %9657 = vmatprep.subr.bf16.mxu1 %v11202_v51  ;;  %v11238_v51 = vld [vmem:[%s12484_s18 + $0x1f8] sm:$0xff]  }
 0xbc9   : > { %9636 = vmatpush3.bf16.msra.mxu0 %v11203_v52  ;;  %v11239_v52 = vld [vmem:[%s12484_s18 + $0x138] sm:$0xff]  }
 0xbca   : > { %9658 = vmatpush3.bf16.msra.mxu1 %v11204_v54  ;;  %9637 = vmatprep.subr.bf16.mxu0 %v11205_v55  ;;  %v11240_v54 = vld [vmem:[%s12484_s18 + $0x1b8] sm:$0xff]  }
 0xbcb   : > { %9659 = vmatprep.subr.bf16.mxu1 %v11206_v56  ;;  %v6669_v55 = vld [vmem:[%s12494_s4 + $0x4] sm:$0x3]  ;;  %v6670_v56 = vld [vmem:[%s12494_s4 + $0x6] sm:$0x3] }
 0xbcd   : > { %9638 = vmatpush3.bf16.msra.mxu0 %v11207_v57  ;;  %v6694_v57 = vrot.slane %v6669_v55, %v12982_v21 }
 0xbce   : > { %9660 = vmatpush3.bf16.msra.mxu1 %v11208_v58  ;;  %9667 = vmatprep.subr.bf16.mxu0 %v11209_v59  ;;  %v6702_v58 = vrot.slane %v6670_v56, %v12982_v21  ;;  %v6698_v59 = vrot.slane %v6669_v55, %v12985_v42 }
 0xbcf   : > { %9689 = vmatprep.subr.bf16.mxu1 %v11210_v60  ;;  %v6706_v60 = vrot.slane %v6670_v56, %v12985_v42 }
 0xc03   : > { %v6909_v4 = vpop.f32.mrb[8].mxu0 }
 0xc04   : > { %v7110_v5 = vpop.f32.mrb[8].mxu1  ;;  %v6910_v8 = vadd.f32 %v6909_v4, %v6678_v63  ;;  %v6911_v10 = vpop.f32.mrb[9].mxu0 }
 0xc05   : > { %v7111_v0 = vadd.f32 %v7110_v5, %v6686_v26  ;;  %v7112_v2 = vpop.f32.mrb[9].mxu1  ;;  %v6912_v25 = vadd.f32 %v6911_v10, %v6682_v3  ;;  %v6913_v15 = vpop.f32.mrb[10].mxu0 }
 0xc06   : > { %v7113_v11 = vadd.f32 %v7112_v2, %v6690_v49  ;;  %v7114_v16 = vpop.f32.mrb[10].mxu1  ;;  %v7519_v17 = vmax.f32 %v6910_v8, 0.0  ;;  %v6914_v19 = vpop.f32.mrb[11].mxu0 }
 0xc07   : > { %v7521_v18 = vmax.f32 %v7111_v0, 0.0  ;;  %v7115_v20 = vpop.f32.mrb[11].mxu1  ;;  %v7520_v23 = vmax.f32 %v6912_v25, 0.0 }
 0xc08   : > { %v7522_v12 = vmax.f32 %v7113_v11, 0.0  ;;  %v7655_v30 = vpack.c.bf16 %v7519_v17, %v7519_v17 }
 0xc09   : > { %v7656_v27 = vpack.c.bf16 %v7520_v23, %v7520_v23  ;;  %v7657_v31 = vpack.c.bf16 %v7521_v18, %v7521_v18  ;;  %v9490_v23 = vld [vmem:[%s12487_s15] ss:$0 sm:$0xff] }
 0xc0a   : > { %v7658_v50 = vpack.c.bf16 %v7522_v12, %v7522_v12 }
 0xc0b   : > { %7819 = vmatprep.mubr.bf16.mxu0 %v7656_v27  ;;  %v9491_v27 = vld [vmem:[%s12487_s15 + $0x1] ss:$0 sm:$0xff] }
 0xc0c   : > { %7955 = vmatprep.mubr.bf16.mxu1 %v7658_v50  ;;  %7820 = vmatmul.mubr.bf16.vlgmr.msra.gmra.mrb[16].mxu0 %v7655_v30 }
 0xc0d   : > { %7956 = vmatmul.mubr.bf16.vlgmr.msra.gmra.mrb[16].mxu1 %v7657_v31  ;;  %9668 = vmatpush3.bf16.msra.mxu0 %v11211_v28 }
 0xc0e   : > { %9690 = vmatpush3.bf16.msra.mxu1 %v11212_v29  ;;  %9669 = vmatprep.subr.bf16.mxu0 %v11213_v7 }
 0xc0f   : > { %9691 = vmatprep.subr.bf16.mxu1 %v11214_v32 }
 0xc11   : > { %9670 = vmatpush3.bf16.msra.mxu0 %v11215_v34 }
 0xc12   : > { %9692 = vmatpush3.bf16.msra.mxu1 %v11216_v36  ;;  %9671 = vmatprep.subr.bf16.mxu0 %v11217_v37 }
 0xc13   : > { %9693 = vmatprep.subr.bf16.mxu1 %v11218_v38 }
 0xc15   : > { %9672 = vmatpush3.bf16.msra.mxu0 %v11219_v39 }
 0xc16   : > { %9694 = vmatpush3.bf16.msra.mxu1 %v11220_v40  ;;  %9673 = vmatprep.subr.bf16.mxu0 %v11221_v24 }
 0xc17   : > { %9695 = vmatprep.subr.bf16.mxu1 %v11222_v41 }
 0xc19   : > { %9674 = vmatpush3.bf16.msra.mxu0 %v11223_v43 }
 0xc1a   : > { %9696 = vmatpush3.bf16.msra.mxu1 %v11224_v44  ;;  %9675 = vmatprep.subr.bf16.mxu0 %v11225_v1 }
 0xc1b   : > { %9697 = vmatprep.subr.bf16.mxu1 %v11226_v45 }
 0xc1d   : > { %9676 = vmatpush3.bf16.msra.mxu0 %v11227_v13 }
 0xc1e   : > { %9698 = vmatpush3.bf16.msra.mxu1 %v11228_v46  ;;  %9677 = vmatprep.subr.bf16.mxu0 %v11229_v9 }
 0xc1f   : > { %9699 = vmatprep.subr.bf16.mxu1 %v11230_v35 }
 0xc21   : > { %9678 = vmatpush3.bf16.msra.mxu0 %v11231_v47 }
 0xc22   : > { %9700 = vmatpush3.bf16.msra.mxu1 %v11232_v48  ;;  %9679 = vmatprep.subr.bf16.mxu0 %v11233_v33 }
 0xc23   : > { %9701 = vmatprep.subr.bf16.mxu1 %v11234_v22 }
 0xc25   : > { %9680 = vmatpush3.bf16.msra.mxu0 %v11235_v53 }
 0xc26   : > { %9702 = vmatpush3.bf16.msra.mxu1 %v11236_v6  ;;  %9681 = vmatprep.subr.bf16.mxu0 %v11237_v14 }
 0xc27   : > { %9703 = vmatprep.subr.bf16.mxu1 %v11238_v51 }
 0xc29   : > { %9682 = vmatpush3.bf16.msra.mxu0 %v11239_v52 }
 0xc2a   : > { %9704 = vmatpush3.bf16.msra.mxu1 %v11240_v54 }
 0xc83   : > { %v7311_v61 = vpop.f32.mrb[12].mxu0 }
 0xc84   : > { %v7512_v62 = vpop.f32.mrb[12].mxu1  ;;  %v7312_v63 = vadd.f32 %v7311_v61, %v6694_v57  ;;  %v7313_v3 = vpop.f32.mrb[13].mxu0 }
 0xc85   : > { %v7513_v26 = vadd.f32 %v7512_v62, %v6702_v58  ;;  %v7514_v49 = vpop.f32.mrb[13].mxu1  ;;  %v7314_v4 = vadd.f32 %v7313_v3, %v6698_v59  ;;  %v7315_v8 = vpop.f32.mrb[14].mxu0  ;;  %v9493_v3 = vld [vmem:[%s12487_s15 + $0x3] ss:$0 sm:$0xff] }
 0xc86   : > { %v7515_v5 = vadd.f32 %v7514_v49, %v6706_v60  ;;  %v7516_v0 = vpop.f32.mrb[14].mxu1  ;;  %v7523_v10 = vmax.f32 %v7312_v63, 0.0  ;;  %v7316_v25 = vpop.f32.mrb[15].mxu0  ;;  %v9492_v63 = vld [vmem:[%s12487_s15 + $0x2] ss:$0 sm:$0xff] }
 0xc87   : > { %v7525_v2 = vmax.f32 %v7513_v26, 0.0  ;;  %v7517_v21 = vpop.f32.mrb[15].mxu1  ;;  %v7524_v11 = vmax.f32 %v7314_v4, 0.0 }
 0xc88   : > { %v7526_v15 = vmax.f32 %v7515_v5, 0.0  ;;  %v7659_v17 = vpack.c.bf16 %v7523_v10, %v7523_v10 }
 0xc89   : > { %v7660_v16 = vpack.c.bf16 %v7524_v11, %v7524_v11  ;;  %v7661_v18 = vpack.c.bf16 %v7525_v2, %v7525_v2 }
 0xc8a   : > { %v7662_v42 = vpack.c.bf16 %v7526_v15, %v7526_v15 }
 0xc8b   : > { %8091 = vmatprep.mubr.bf16.mxu0 %v7660_v16 }
 0xc8c   : > { %8227 = vmatprep.mubr.bf16.mxu1 %v7662_v42  ;;  %8092 = vmatmul.mubr.bf16.vlgmr.msra.gmra.mrb[20].mxu0 %v7659_v17 }
 0xc8d   : > { %8228 = vmatmul.mubr.bf16.vlgmr.msra.gmra.mrb[20].mxu1 %v7661_v18 }
 0xcdf   : > { %v9639_v19 = vpop.f32.mrb[16].mxu0 }
 0xce0   : > { %v9661_v20 = vpop.f32.mrb[16].mxu1  ;;  %v9640_v12 = vpop.f32.mrb[17].mxu0 }
 0xce1   : > { %v9662_v50 = vpop.f32.mrb[17].mxu1  ;;  %v9641_v28 = vadd.f32 %v9640_v12, %v9639_v19  ;;  %v9642_v30 = vpop.f32.mrb[18].mxu0 }
 0xce2   : > { %v9663_v29 = vadd.f32 %v9662_v50, %v9661_v20  ;;  %v9664_v31 = vpop.f32.mrb[18].mxu1  ;;  %v9643_v7 = vpop.f32.mrb[19].mxu0 }
 0xce3   : > { %v9665_v32 = vpop.f32.mrb[19].mxu1  ;;  %v7822_v34 = vadd.f32 %v9641_v28, %v9490_v23 }
 0xce4   : > { %v7958_v36 = vadd.f32 %v9663_v29, %v9491_v27 }
 0xce5   : > { %v8247_v37 = vand.u32 2147483647, %v7822_v34  ;;  %v8235_v14 = vmax.f32 %v7822_v34, 0.0  ;;  %vm8239_vm8 = vcmp.ne.f32.partialorder %v7822_v34, %v7822_v34 }
 0xce6   : > { %v8248_v38 = vand.u32 2147483647, %v7958_v36  ;;  %v8236_v55 = vmax.f32 %v7958_v36, 0.0  ;;  %vm8240_vm9 = vcmp.ne.f32.partialorder %v7958_v36, %v7958_v36 }
 0xce7   : > { %v8251_v39 = vsub.f32 0.0, %v8247_v37 }
 0xce8   : > { %v8252_v40 = vsub.f32 0.0, %v8248_v38 }
 0xce9   : > { %v8255_v24 = vmul.f32 1.442695, %v8251_v39 }
 0xcea   : > { %v8257_v41 = vmul.f32 1.442695, %v8252_v40 }
 0xceb   : > { %11241 = vpow2.f32 %v8255_v24 }
 0xcec   : > { %11243 = vpow2.f32 %v8257_v41 }
 0xcf5   : > { %v11242_v43 = vpop.eup %11241 }
 0xcf6   : > { %v11244_v44 = vpop.eup %11243  ;;  %v8263_v1 = vadd.f32 1.0, %v11242_v43  ;;  %v8266_v13 = vmul.f32 -0.5, %v11242_v43  ;;  %v8269_v35 = vand.u32 2147483647, %v11242_v43 }
 0xcf7   : > { %v8272_v45 = vadd.f32 1.0, %v11244_v44  ;;  %v8275_v46 = vmul.f32 -0.5, %v11244_v44  ;;  %v8278_v48 = vand.u32 2147483647, %v11244_v44 }
 0xcf8   : > { %11245 = vlog2.f32 %v8263_v1  ;;  %v8267_v9 = vadd.f32 1.0, %v8266_v13  ;;  %vm8270_vm5 = vcmp.lt.f32.partialorder %v8269_v35, 0.0004427343 }
 0xcf9   : > { %11247 = vlog2.f32 %v8272_v45  ;;  %v8276_v47 = vadd.f32 1.0, %v8275_v46  ;;  %vm8279_vm6 = vcmp.lt.f32.partialorder %v8278_v48, 0.0004427343 }
 0xcfa   : > { %v8268_v6 = vmul.f32 %v11242_v43, %v8267_v9 }
 0xcfb   : > { %v8277_v52 = vmul.f32 %v11244_v44, %v8276_v47 }
 0xd02   : > { %v11246_v33 = vpop.eup %11245 }
 0xd03   : > { %v11248_v22 = vpop.eup %11247  ;;  %v8265_v53 = vmul.f32 0.6931472, %v11246_v33 }
 0xd04   : > { %v8274_v51 = vmul.f32 0.6931472, %v11248_v22 }
 0xd05   : > { %v8271_v54 = vsel %vm8270_vm5, %v8268_v6, %v8265_v53 }
 0xd06   : > { %v8299_v56 = vadd.f32 %v8271_v54, %v8235_v14  ;;  %v8280_v57 = vsel %vm8279_vm6, %v8277_v52, %v8274_v51 }
 0xd07   : > { %v8300_v58 = vadd.f32 %v8280_v57, %v8236_v55 }
 0xd08   : > { %v8303_v59 = vsel %vm8239_vm8, %v7822_v34, %v8299_v56 }
 0xd09   : > { %8308 = vst.msk [vmem:[%s12490_s22] sm:$0x3] %vm8307_vm7, %v8303_v59  ;;  %v8304_v60 = vsel %vm8240_vm9, %v7958_v36, %v8300_v58 }
 0xd0a   : > { %8309 = vst.msk [vmem:[%s12490_s22 + $0x2] sm:$0x3] %vm8307_vm7, %v8304_v60 }
 0xd5f   : > { %v9683_v61 = vpop.f32.mrb[20].mxu0 }
 0xd60   : > { %v9705_v62 = vpop.f32.mrb[20].mxu1  ;;  %v9684_v26 = vpop.f32.mrb[21].mxu0 }
 0xd61   : > { %v9706_v49 = vpop.f32.mrb[21].mxu1  ;;  %v9685_v4 = vadd.f32 %v9684_v26, %v9683_v61  ;;  %v9686_v8 = vpop.f32.mrb[22].mxu0 }
 0xd62   : > { %v9707_v5 = vadd.f32 %v9706_v49, %v9705_v62  ;;  %v9708_v0 = vpop.f32.mrb[22].mxu1  ;;  %v9687_v10 = vpop.f32.mrb[23].mxu0 }
 0xd63   : > { %v9709_v2 = vpop.f32.mrb[23].mxu1  ;;  %v8094_v25 = vadd.f32 %v9685_v4, %v9492_v63 }
 0xd64   : > { %v8230_v21 = vadd.f32 %v9707_v5, %v9493_v3 }
 0xd65   : > { %v8249_v11 = vand.u32 2147483647, %v8094_v25  ;;  %v8237_v37 = vmax.f32 %v8094_v25, 0.0  ;;  %vm8241_vm12 = vcmp.ne.f32.partialorder %v8094_v25, %v8094_v25 }
 0xd66   : > { %v8250_v15 = vand.u32 2147483647, %v8230_v21  ;;  %v8238_v24 = vmax.f32 %v8230_v21, 0.0  ;;  %vm8242_vm13 = vcmp.ne.f32.partialorder %v8230_v21, %v8230_v21 }
 0xd67   : > { %v8253_v16 = vsub.f32 0.0, %v8249_v11 }
 0xd68   : > { %v8254_v42 = vsub.f32 0.0, %v8250_v15 }
 0xd69   : > { %v8259_v17 = vmul.f32 1.442695, %v8253_v16 }
 0xd6a   : > { %v8261_v18 = vmul.f32 1.442695, %v8254_v42 }
 0xd6b   : > { %11249 = vpow2.f32 %v8259_v17 }
 0xd6c   : > { %11251 = vpow2.f32 %v8261_v18 }
 0xd75   : > { %v11250_v19 = vpop.eup %11249 }
 0xd76   : > { %v11252_v20 = vpop.eup %11251  ;;  %v8281_v23 = vadd.f32 1.0, %v11250_v19  ;;  %v8284_v27 = vmul.f32 -0.5, %v11250_v19  ;;  %v8287_v29 = vand.u32 2147483647, %v11250_v19 }
 0xd77   : > { %v8290_v12 = vadd.f32 1.0, %v11252_v20  ;;  %v8293_v50 = vmul.f32 -0.5, %v11252_v20  ;;  %v8296_v31 = vand.u32 2147483647, %v11252_v20 }
 0xd78   : > { %11253 = vlog2.f32 %v8281_v23  ;;  %v8285_v28 = vadd.f32 1.0, %v8284_v27  ;;  %vm8288_vm10 = vcmp.lt.f32.partialorder %v8287_v29, 0.0004427343 }
 0xd79   : > { %11255 = vlog2.f32 %v8290_v12  ;;  %v8294_v30 = vadd.f32 1.0, %v8293_v50  ;;  %vm8297_vm11 = vcmp.lt.f32.partialorder %v8296_v31, 0.0004427343 }
 0xd7a   : > { %v8286_v36 = vmul.f32 %v11250_v19, %v8285_v28 }
 0xd7b   : > { %v8295_v39 = vmul.f32 %v11252_v20, %v8294_v30 }
 0xd82   : > { %v11254_v7 = vpop.eup %11253 }
 0xd83   : > { %v11256_v32 = vpop.eup %11255  ;;  %v8283_v34 = vmul.f32 0.6931472, %v11254_v7 }
 0xd84   : > { %v8292_v38 = vmul.f32 0.6931472, %v11256_v32 }
 0xd85   : > { %v8289_v40 = vsel %vm8288_vm10, %v8286_v36, %v8283_v34 }
 0xd86   : > { %v8301_v41 = vadd.f32 %v8289_v40, %v8237_v37  ;;  %v8298_v43 = vsel %vm8297_vm11, %v8295_v39, %v8292_v38 }
 0xd87   : > { %v8302_v44 = vadd.f32 %v8298_v43, %v8238_v24 }
 0xd88   : > { %v8305_v1 = vsel %vm8241_vm12, %v8094_v25, %v8301_v41 }
 0xd89   : > { %8310 = vst.msk [vmem:[%s12490_s22 + $0x4] sm:$0x3] %vm8307_vm7, %v8305_v1  ;;  %v8306_v45 = vsel %vm8242_vm13, %v8230_v21, %v8302_v44 }
 0xd8a   : > { %8311 = vst.msk [vmem:[%s12490_s22 + $0x6] sm:$0x3] %vm8307_vm7, %v8306_v45 }
 0xd8b PF: > { %s13290_s5 = sld [smem:[#allocation62_spill]]  ;;  %s13291_s6 = sld [smem:[#allocation61_spill]] }
 0xd8c   : > { %s13292_s4 = sld [smem:[#allocation63_spill]]  ;;  %s13293_s10 = smov %s11861_s11 }
 0xd91   : > { %p80_p9 = scmp.ge.s32.totalorder %s13290_s5, 5  }
 0xd92   : > { %s13294_s11 = smov %s13292_s4 }
 0xd93   :  { %82 = sbr.rel (!%p80_p9) target bundleno = 64 (0x40), region = 311 }
 0xd9a   :  { %8346 = vsyncpa [#allocation6], 1 }
 0xd9b   :  { %8348 = vsyncpa [#allocation6 + $0x1], 1 }
 0xd9c   :  { %8349 = vsyncpa [#allocation8], 1 }
 0xd9d   :  { %8350 = vsyncpa [#allocation11], 1 }
 0xd9e   :  { %8351 = vsyncpa [#allocation14], 1 }
 0xd9f   :  { %8352 = vsyncpa [#allocation17], 1 }
 0xda0   :  { %8353 = vsyncpa [#allocation20], 1 }
 0xda1   :  { %8354 = vsyncpa [#allocation23], 1 }
 0xda2   :  { %8355 = vsyncpa [#allocation26], 1 }
 0xda3   :  { %8356 = vsyncpa [#allocation29], 1 }

</bundles_post_ra>
